<compile_context>
chip_gen: v5e
topology: v5e:2x2
jax: 0.10.0
libtpu: 0.0.40
codegen_flags: <defaults>
</compile_context>

<pallas_src>
import math
from functools import partial

import jax
import jax.numpy as jnp
from jax.experimental import pallas as pl
from jax.experimental.pallas import tpu as pltpu


def _round_up(v, m):
    return ((v + m - 1) // m) * m


def _vmem_budget_bytes():
    """Generation-aware VMEM budget (v7x: 64 MiB physical; v5e/v6e: 128 MiB)."""
    try:
        cap = int(pltpu.get_tpu_info().vmem_capacity_bytes)
    except Exception:              # emulator / unknown chip -> v7x-safe fallback
        cap = 64 << 20
    return (cap * 3) // 4          # leave headroom for Mosaic-internal scratch


# ---------------------------------------------------------------------------
# Fused im2col + GEMM + bias kernel.
#
# Grid: (batch n, output-row tile r).  Per step:
#   x_ref (1, Hp, Wp, Cin)  spatially pre-padded NHWC image (VMEM resident;
#                           block index only depends on n -> fetched once/img)
#   w_ref (K, Ncp)          filter flattened in (kh, kw, Cin) row order,
#                           Ncp = round_up(Cout*s^2, 128), cols in (si,sj,Cout)
#   b_ref (1, Ncp)          f32 bias
#   o_ref (1, TH, OW, Ncp)  one output row tile (lane-dense Ncp)
#
# The patch tile is assembled on the fly: for each filter tap (ki, kj) a
# (TH, OW, Cin) slab is sliced from the resident image and fed to the MXU
# against the matching Cin rows of w_ref, accumulating in f32.  The im2col
# matrix therefore never exists in HBM.
# ---------------------------------------------------------------------------
def _upsample_conv_kernel(x_ref, w_ref, b_ref, o_ref, *,
                          kh, kw, sh, sw, dh, dw, th, ow, cin):
    r = pl.program_id(1)
    row0 = r * (th * sh)                     # first padded-input row of this tile
    span_h = (th - 1) * sh + 1
    span_w = (ow - 1) * sw + 1

    acc = None
    for ki in range(kh):
        for kj in range(kw):
            slab = x_ref[0, pl.ds(row0 + ki * dh, span_h),
                            pl.ds(kj * dw, span_w), :]
            if sh > 1 or sw > 1:             # stride: keep every sh-th / sw-th pixel
                slab = slab[::sh, ::sw, :]
            a = slab.reshape(th * ow, cin)   # leading-dim collapse only
            w_blk = w_ref[pl.ds((ki * kw + kj) * cin, cin), :]
            part = jnp.dot(a, w_blk, preferred_element_type=jnp.float32)
            acc = part if acc is None else acc + part

    acc = acc + b_ref[...]                   # f32 epilogue
    # Rows past OH in the last (partial) row tile are conv-of-zero-padding
    # values; Pallas masks them out on the partial-block writeback.
    o_ref[...] = acc.reshape(o_ref.shape).astype(o_ref.dtype)


# ---------------------------------------------------------------------------
# UpsampleConv2d forward: fused conv kernel, then pixel_shuffle + NCHW in one
# permutation of contiguous Cout chunks.
# ---------------------------------------------------------------------------
def upsample_conv2d(x, weight, bias, *, stride=(1, 1), padding=(0, 0),
                    dilation=(1, 1), groups=1, scale_factor=1,
                    mxu_bf16=True, row_tile=None):
    """
    x:       (N, Cin, H, W)                       float32, NCHW
    weight:  (Cout*scale^2, Cin//groups, kh, kw)  float32
    bias:    (Cout*scale^2,)                      float32
    returns: (N, Cout, scale*OH, scale*OW)        x.dtype (NCHW, PyTorch layout)
    """
    assert groups == 1  # TODO(synk): grouped conv not implemented in this kernel
    N, Cin, H, W = x.shape
    Co_s2, _, kh, kw = weight.shape
    sh, sw = stride
    ph, pw = padding
    dh, dw = dilation
    s = scale_factor
    Cout = Co_s2 // (s * s)

    OH = (H + 2 * ph - dh * (kh - 1) - 1) // sh + 1
    OW = (W + 2 * pw - dw * (kw - 1) - 1) // sw + 1

    K = Cin * kh * kw                      # NOT padded: full-extent block is legal
    Ncp = _round_up(Co_s2, 128)            # lane-dense output channels
    comp_dtype = jnp.bfloat16 if mxu_bf16 else jnp.float32
    out_dtype = jnp.bfloat16 if mxu_bf16 else jnp.float32
    in_bytes = jnp.dtype(comp_dtype).itemsize
    out_bytes = jnp.dtype(out_dtype).itemsize

    # ---- row-tile selection under a generation-aware VMEM budget -----------
    Hp = H + 2 * ph
    Wp = W + 2 * pw
    budget = _vmem_budget_bytes()
    # Resident footprint: double-buffered image (block index changes with n),
    # weights (constant index, still 2 buffers by default), bias.
    fixed = 2 * Hp * Wp * Cin * in_bytes + 2 * K * Ncp * in_bytes + 2 * Ncp * 4

    def step_bytes(t):                     # per-row-tile working set (upper bound)
        return (t * OW * K * in_bytes      # patch slabs
                + t * OW * Ncp * 4         # f32 accumulator
                + 2 * t * OW * Ncp * out_bytes)  # double-buffered out block

    th = OH if row_tile is None else max(1, min(row_tile, OH))
    if N == 1 and OH > 1:
        th = min(th, (OH + 1) // 2)        # >=2 grid steps: v7x megacore + overlap
    while th > 1 and fixed + step_bytes(th) > budget:
        th = (th + 1) // 2
    # TODO(synk): if `fixed` alone exceeds the budget (very large images),
    # switch x to memory_space=pl.ANY + manual double-buffered haloed row-slab
    # DMA (pltpu.make_async_copy) instead of keeping the image resident.

    R = pl.cdiv(OH, th)
    # Extra bottom zero rows so the last (partial) row tile's haloed read
    # stays in bounds.
    Hp_ext = max(Hp, (R * th - 1) * sh + (kh - 1) * dh + 1)

    # ---- glue: one NCHW -> NHWC conversion + spatial zero pad --------------
    x_nhwc = jnp.transpose(x.astype(comp_dtype), (0, 2, 3, 1))
    x_pad = jnp.pad(x_nhwc, ((0, 0), (ph, Hp_ext - H - ph), (pw, pw), (0, 0)))

    # ---- weights / bias: output channels permuted to (s_i, s_j, Cout) so the
    # pixel-shuffle epilogue moves contiguous Cout chunks; rows flattened in
    # (kh, kw, Cin) order matching the in-kernel patch assembly; Ncp padded.
    w_r = weight.reshape(Cout, s, s, Cin, kh, kw).transpose(1, 2, 0, 3, 4, 5)
    w_r = w_r.reshape(Co_s2, Cin, kh, kw)
    w2d = jnp.transpose(w_r, (2, 3, 1, 0)).reshape(K, Co_s2)
    w2d = jnp.pad(w2d, ((0, 0), (0, Ncp - Co_s2))).astype(comp_dtype)
    b_r = bias.reshape(Cout, s, s).transpose(1, 2, 0).reshape(Co_s2)
    bias2d = jnp.pad(b_r, (0, Ncp - Co_s2)).reshape(1, Ncp).astype(jnp.float32)

    # ---- fused conv kernel --------------------------------------------------
    kernel = partial(_upsample_conv_kernel, kh=kh, kw=kw, sh=sh, sw=sw,
                     dh=dh, dw=dw, th=th, ow=OW, cin=Cin)
    cost = pl.CostEstimate(
        flops=2 * N * OH * OW * K * Ncp,
        transcendentals=0,
        bytes_accessed=(N * Hp_ext * Wp * Cin * in_bytes
                        + K * Ncp * in_bytes + Ncp * 4
                        + N * OH * OW * Ncp * out_bytes))

    out4d = pl.pallas_call(
        kernel,
        out_shape=jax.ShapeDtypeStruct((N, OH, OW, Ncp), out_dtype),
        grid_spec=pltpu.PrefetchScalarGridSpec(
            num_scalar_prefetch=0,
            grid=(N, R),
            in_specs=[
                pl.BlockSpec((1, Hp_ext, Wp, Cin), lambda n, r: (n, 0, 0, 0)),
                pl.BlockSpec((K, Ncp), lambda n, r: (0, 0)),
                pl.BlockSpec((1, Ncp), lambda n, r: (0, 0)),
            ],
            out_specs=pl.BlockSpec((1, th, OW, Ncp), lambda n, r: (n, r, 0, 0)),
        ),
        compiler_params=pltpu.CompilerParams(
            dimension_semantics=("parallel", "parallel"),
            vmem_limit_bytes=int(budget),
        ),
        cost_estimate=cost,
    )(x_pad, w2d, bias2d)

    # ---- pixel_shuffle + NHWC -> NCHW fused into ONE permutation -----------
    # Columns are ordered (s_i, s_j, Cout) -> contiguous Cout chunks move.
    y = out4d[..., :Co_s2].reshape(N, OH, OW, s, s, Cout)
    y = y.transpose(0, 5, 1, 3, 2, 4).reshape(N, Cout, OH * s, OW * s)
    return y.astype(x.dtype)


# ---------------------------------------------------------------------------
# Parameter init (mirrors reset_parameters' uniform(-stdv, stdv))
# ---------------------------------------------------------------------------
def init_params(key, in_channels, out_channels, kernel_size, scale_factor):
    kh, kw = kernel_size
    n = in_channels * kh * kw
    stdv = 1.0 / math.sqrt(n)
    kw_key, kb_key = jax.random.split(key)
    weight = jax.random.uniform(
        kw_key,
        (out_channels * scale_factor * scale_factor, in_channels, kh, kw),
        minval=-stdv, maxval=stdv, dtype=jnp.float32)
    bias = jax.random.uniform(
        kb_key, (out_channels * scale_factor * scale_factor,),
        minval=-stdv, maxval=stdv, dtype=jnp.float32)
    return weight, bias


if __name__ == "__main__":
    key = jax.random.PRNGKey(0)
    xk, pk = jax.random.split(key)

    N, Cin, H, W = 2, 4, 16, 16
    Cout, ksize, stride, padding, scale = 8, (3, 3), (1, 1), (1, 1), 2

    x = jax.random.normal(xk, (N, Cin, H, W), dtype=jnp.float32)
    weight, bias = init_params(pk, Cin, Cout, ksize, scale)

    fwd = jax.jit(partial(upsample_conv2d, stride=stride, padding=padding,
                          dilation=(1, 1), groups=1, scale_factor=scale,
                          mxu_bf16=True))
    out = fwd(x, weight, bias)
    jax.block_until_ready(out)

    # Reference: XLA f32 conv + pixel_shuffle (PyTorch semantics).
    conv_ref = jax.lax.conv_general_dilated(
        x, weight, window_strides=stride,
        padding=[(padding[0], padding[0]), (padding[1], padding[1])],
        dimension_numbers=("NCHW", "OIHW", "NCHW"))
    conv_ref = conv_ref + bias[None, :, None, None]
    OH, OW = conv_ref.shape[2], conv_ref.shape[3]
    ref = conv_ref.reshape(N, Cout, scale, scale, OH, OW)
    ref = ref.transpose(0, 1, 4, 2, 5, 3).reshape(N, Cout, OH * scale, OW * scale)

    assert out.shape == ref.shape, (out.shape, ref.shape)
    # bf16 MXU operands / bf16 kernel output (f32 accumulation) -> loosened
    # tolerance vs. the f32 reference.  Use mxu_bf16=False for f32-exact.
    err = float(jnp.max(jnp.abs(out - ref)))
    assert jnp.allclose(out, ref, rtol=2e-2, atol=2e-2), err
    print("KERNEL_OK")
</pallas_src>

<mosaic_0001>
module attributes {stable_mosaic.version = 11 : i64} {
  func.func @_upsample_conv_kernel(%arg0: i32, %arg1: i32, %arg2: memref<1x18x18x4xbf16, #tpu.memory_space<vmem>>, %arg3: memref<36x128xbf16, #tpu.memory_space<vmem>>, %arg4: memref<1x128xf32, #tpu.memory_space<vmem>>, %arg5: memref<1x16x16x128xbf16, #tpu.memory_space<vmem>>) attributes {dimension_semantics = [#tpu.dimension_semantics<parallel>, #tpu.dimension_semantics<parallel>], iteration_bounds = array<i64: 2, 1>, scalar_prefetch = 0 : i64, scratch_operands = 0 : i64, tpu.core_type = #tpu.core_type<tc>, window_params = [{transform_indices = @transform_0, window_bounds = array<i64: 1, 18, 18, 4>}, {pipeline_mode = #tpu.pipeline_mode<synchronous>, transform_indices = @transform_1, window_bounds = array<i64: 36, 128>}, {pipeline_mode = #tpu.pipeline_mode<synchronous>, transform_indices = @transform_2, window_bounds = array<i64: 1, 128>}, {transform_indices = @transform_3, window_bounds = array<i64: 1, 16, 16, 128>}]} {
    %c16_i32 = arith.constant 16 : i32
    %0 = arith.muli %arg1, %c16_i32 : i32
    %c0_i32 = arith.constant 0 : i32
    %1 = arith.addi %0, %c0_i32 : i32
    %c0 = arith.constant 0 : index
    %2 = arith.index_cast %1 : i32 to index
    %c0_0 = arith.constant 0 : index
    %c0_1 = arith.constant 0 : index
    %3 = vector.load %arg2[%c0, %2, %c0_0, %c0_1] : memref<1x18x18x4xbf16, #tpu.memory_space<vmem>>, vector<1x16x16x4xbf16>
    %4 = vector.shape_cast %3 : vector<1x16x16x4xbf16> to vector<16x16x4xbf16>
    %5 = vector.shape_cast %4 : vector<16x16x4xbf16> to vector<256x4xbf16>
    %c0_2 = arith.constant 0 : index
    %c0_3 = arith.constant 0 : index
    %6 = vector.load %arg3[%c0_2, %c0_3] : memref<36x128xbf16, #tpu.memory_space<vmem>>, vector<4x128xbf16>
    %cst = arith.constant dense<0.000000e+00> : vector<256x128xf32>
    %7 = tpu.matmul %5, %6, %cst {dimension_numbers = #tpu.dot_dimension_numbers<[1], [0], [0], [1], [0, 0, 1, 1], [], []>} : vector<256x4xbf16>, vector<4x128xbf16>, vector<256x128xf32> -> vector<256x128xf32>
    %c0_i32_4 = arith.constant 0 : i32
    %8 = arith.addi %0, %c0_i32_4 : i32
    %c0_5 = arith.constant 0 : index
    %9 = arith.index_cast %8 : i32 to index
    %c1 = arith.constant 1 : index
    %c0_6 = arith.constant 0 : index
    %10 = vector.load %arg2[%c0_5, %9, %c1, %c0_6] : memref<1x18x18x4xbf16, #tpu.memory_space<vmem>>, vector<1x16x16x4xbf16>
    %11 = vector.shape_cast %10 : vector<1x16x16x4xbf16> to vector<16x16x4xbf16>
    %12 = vector.shape_cast %11 : vector<16x16x4xbf16> to vector<256x4xbf16>
    %c4 = arith.constant 4 : index
    %c0_7 = arith.constant 0 : index
    %13 = vector.load %arg3[%c4, %c0_7] : memref<36x128xbf16, #tpu.memory_space<vmem>>, vector<4x128xbf16>
    %cst_8 = arith.constant dense<0.000000e+00> : vector<256x128xf32>
    %14 = tpu.matmul %12, %13, %cst_8 {dimension_numbers = #tpu.dot_dimension_numbers<[1], [0], [0], [1], [0, 0, 1, 1], [], []>} : vector<256x4xbf16>, vector<4x128xbf16>, vector<256x128xf32> -> vector<256x128xf32>
    %15 = arith.addf %7, %14 : vector<256x128xf32>
    %c0_i32_9 = arith.constant 0 : i32
    %16 = arith.addi %0, %c0_i32_9 : i32
    %c0_10 = arith.constant 0 : index
    %17 = arith.index_cast %16 : i32 to index
    %c2 = arith.constant 2 : index
    %c0_11 = arith.constant 0 : index
    %18 = vector.load %arg2[%c0_10, %17, %c2, %c0_11] : memref<1x18x18x4xbf16, #tpu.memory_space<vmem>>, vector<1x16x16x4xbf16>
    %19 = vector.shape_cast %18 : vector<1x16x16x4xbf16> to vector<16x16x4xbf16>
    %20 = vector.shape_cast %19 : vector<16x16x4xbf16> to vector<256x4xbf16>
    %c8 = arith.constant 8 : index
    %c0_12 = arith.constant 0 : index
    %21 = vector.load %arg3[%c8, %c0_12] : memref<36x128xbf16, #tpu.memory_space<vmem>>, vector<4x128xbf16>
    %cst_13 = arith.constant dense<0.000000e+00> : vector<256x128xf32>
    %22 = tpu.matmul %20, %21, %cst_13 {dimension_numbers = #tpu.dot_dimension_numbers<[1], [0], [0], [1], [0, 0, 1, 1], [], []>} : vector<256x4xbf16>, vector<4x128xbf16>, vector<256x128xf32> -> vector<256x128xf32>
    %23 = arith.addf %15, %22 : vector<256x128xf32>
    %c1_i32 = arith.constant 1 : i32
    %24 = arith.addi %0, %c1_i32 : i32
    %c0_14 = arith.constant 0 : index
    %25 = arith.index_cast %24 : i32 to index
    %c0_15 = arith.constant 0 : index
    %c0_16 = arith.constant 0 : index
    %26 = vector.load %arg2[%c0_14, %25, %c0_15, %c0_16] : memref<1x18x18x4xbf16, #tpu.memory_space<vmem>>, vector<1x16x16x4xbf16>
    %27 = vector.shape_cast %26 : vector<1x16x16x4xbf16> to vector<16x16x4xbf16>
    %28 = vector.shape_cast %27 : vector<16x16x4xbf16> to vector<256x4xbf16>
    %c12 = arith.constant 12 : index
    %c0_17 = arith.constant 0 : index
    %29 = vector.load %arg3[%c12, %c0_17] : memref<36x128xbf16, #tpu.memory_space<vmem>>, vector<4x128xbf16>
    %cst_18 = arith.constant dense<0.000000e+00> : vector<256x128xf32>
    %30 = tpu.matmul %28, %29, %cst_18 {dimension_numbers = #tpu.dot_dimension_numbers<[1], [0], [0], [1], [0, 0, 1, 1], [], []>} : vector<256x4xbf16>, vector<4x128xbf16>, vector<256x128xf32> -> vector<256x128xf32>
    %31 = arith.addf %23, %30 : vector<256x128xf32>
    %c1_i32_19 = arith.constant 1 : i32
    %32 = arith.addi %0, %c1_i32_19 : i32
    %c0_20 = arith.constant 0 : index
    %33 = arith.index_cast %32 : i32 to index
    %c1_21 = arith.constant 1 : index
    %c0_22 = arith.constant 0 : index
    %34 = vector.load %arg2[%c0_20, %33, %c1_21, %c0_22] : memref<1x18x18x4xbf16, #tpu.memory_space<vmem>>, vector<1x16x16x4xbf16>
    %35 = vector.shape_cast %34 : vector<1x16x16x4xbf16> to vector<16x16x4xbf16>
    %36 = vector.shape_cast %35 : vector<16x16x4xbf16> to vector<256x4xbf16>
    %c16 = arith.constant 16 : index
    %c0_23 = arith.constant 0 : index
    %37 = vector.load %arg3[%c16, %c0_23] : memref<36x128xbf16, #tpu.memory_space<vmem>>, vector<4x128xbf16>
    %cst_24 = arith.constant dense<0.000000e+00> : vector<256x128xf32>
    %38 = tpu.matmul %36, %37, %cst_24 {dimension_numbers = #tpu.dot_dimension_numbers<[1], [0], [0], [1], [0, 0, 1, 1], [], []>} : vector<256x4xbf16>, vector<4x128xbf16>, vector<256x128xf32> -> vector<256x128xf32>
    %39 = arith.addf %31, %38 : vector<256x128xf32>
    %c1_i32_25 = arith.constant 1 : i32
    %40 = arith.addi %0, %c1_i32_25 : i32
    %c0_26 = arith.constant 0 : index
    %41 = arith.index_cast %40 : i32 to index
    %c2_27 = arith.constant 2 : index
    %c0_28 = arith.constant 0 : index
    %42 = vector.load %arg2[%c0_26, %41, %c2_27, %c0_28] : memref<1x18x18x4xbf16, #tpu.memory_space<vmem>>, vector<1x16x16x4xbf16>
    %43 = vector.shape_cast %42 : vector<1x16x16x4xbf16> to vector<16x16x4xbf16>
    %44 = vector.shape_cast %43 : vector<16x16x4xbf16> to vector<256x4xbf16>
    %c20 = arith.constant 20 : index
    %c0_29 = arith.constant 0 : index
    %45 = vector.load %arg3[%c20, %c0_29] : memref<36x128xbf16, #tpu.memory_space<vmem>>, vector<4x128xbf16>
    %cst_30 = arith.constant dense<0.000000e+00> : vector<256x128xf32>
    %46 = tpu.matmul %44, %45, %cst_30 {dimension_numbers = #tpu.dot_dimension_numbers<[1], [0], [0], [1], [0, 0, 1, 1], [], []>} : vector<256x4xbf16>, vector<4x128xbf16>, vector<256x128xf32> -> vector<256x128xf32>
    %47 = arith.addf %39, %46 : vector<256x128xf32>
    %c2_i32 = arith.constant 2 : i32
    %48 = arith.addi %0, %c2_i32 : i32
    %c0_31 = arith.constant 0 : index
    %49 = arith.index_cast %48 : i32 to index
    %c0_32 = arith.constant 0 : index
    %c0_33 = arith.constant 0 : index
    %50 = vector.load %arg2[%c0_31, %49, %c0_32, %c0_33] : memref<1x18x18x4xbf16, #tpu.memory_space<vmem>>, vector<1x16x16x4xbf16>
    %51 = vector.shape_cast %50 : vector<1x16x16x4xbf16> to vector<16x16x4xbf16>
    %52 = vector.shape_cast %51 : vector<16x16x4xbf16> to vector<256x4xbf16>
    %c24 = arith.constant 24 : index
    %c0_34 = arith.constant 0 : index
    %53 = vector.load %arg3[%c24, %c0_34] : memref<36x128xbf16, #tpu.memory_space<vmem>>, vector<4x128xbf16>
    %cst_35 = arith.constant dense<0.000000e+00> : vector<256x128xf32>
    %54 = tpu.matmul %52, %53, %cst_35 {dimension_numbers = #tpu.dot_dimension_numbers<[1], [0], [0], [1], [0, 0, 1, 1], [], []>} : vector<256x4xbf16>, vector<4x128xbf16>, vector<256x128xf32> -> vector<256x128xf32>
    %55 = arith.addf %47, %54 : vector<256x128xf32>
    %c2_i32_36 = arith.constant 2 : i32
    %56 = arith.addi %0, %c2_i32_36 : i32
    %c0_37 = arith.constant 0 : index
    %57 = arith.index_cast %56 : i32 to index
    %c1_38 = arith.constant 1 : index
    %c0_39 = arith.constant 0 : index
    %58 = vector.load %arg2[%c0_37, %57, %c1_38, %c0_39] : memref<1x18x18x4xbf16, #tpu.memory_space<vmem>>, vector<1x16x16x4xbf16>
    %59 = vector.shape_cast %58 : vector<1x16x16x4xbf16> to vector<16x16x4xbf16>
    %60 = vector.shape_cast %59 : vector<16x16x4xbf16> to vector<256x4xbf16>
    %c28 = arith.constant 28 : index
    %c0_40 = arith.constant 0 : index
    %61 = vector.load %arg3[%c28, %c0_40] : memref<36x128xbf16, #tpu.memory_space<vmem>>, vector<4x128xbf16>
    %cst_41 = arith.constant dense<0.000000e+00> : vector<256x128xf32>
    %62 = tpu.matmul %60, %61, %cst_41 {dimension_numbers = #tpu.dot_dimension_numbers<[1], [0], [0], [1], [0, 0, 1, 1], [], []>} : vector<256x4xbf16>, vector<4x128xbf16>, vector<256x128xf32> -> vector<256x128xf32>
    %63 = arith.addf %55, %62 : vector<256x128xf32>
    %c2_i32_42 = arith.constant 2 : i32
    %64 = arith.addi %0, %c2_i32_42 : i32
    %c0_43 = arith.constant 0 : index
    %65 = arith.index_cast %64 : i32 to index
    %c2_44 = arith.constant 2 : index
    %c0_45 = arith.constant 0 : index
    %66 = vector.load %arg2[%c0_43, %65, %c2_44, %c0_45] : memref<1x18x18x4xbf16, #tpu.memory_space<vmem>>, vector<1x16x16x4xbf16>
    %67 = vector.shape_cast %66 : vector<1x16x16x4xbf16> to vector<16x16x4xbf16>
    %68 = vector.shape_cast %67 : vector<16x16x4xbf16> to vector<256x4xbf16>
    %c32 = arith.constant 32 : index
    %c0_46 = arith.constant 0 : index
    %69 = vector.load %arg3[%c32, %c0_46] : memref<36x128xbf16, #tpu.memory_space<vmem>>, vector<4x128xbf16>
    %cst_47 = arith.constant dense<0.000000e+00> : vector<256x128xf32>
    %70 = tpu.matmul %68, %69, %cst_47 {dimension_numbers = #tpu.dot_dimension_numbers<[1], [0], [0], [1], [0, 0, 1, 1], [], []>} : vector<256x4xbf16>, vector<4x128xbf16>, vector<256x128xf32> -> vector<256x128xf32>
    %71 = arith.addf %63, %70 : vector<256x128xf32>
    %c0_48 = arith.constant 0 : index
    %c0_49 = arith.constant 0 : index
    %72 = vector.load %arg4[%c0_48, %c0_49] : memref<1x128xf32, #tpu.memory_space<vmem>>, vector<1x128xf32>
    %73 = vector.broadcast %72 : vector<1x128xf32> to vector<256x128xf32>
    %74 = arith.addf %71, %73 : vector<256x128xf32>
    %75 = vector.shape_cast %74 : vector<256x128xf32> to vector<1x16x16x128xf32>
    %76 = arith.truncf %75 : vector<1x16x16x128xf32> to vector<1x16x16x128xbf16>
    %c0_50 = arith.constant 0 : index
    %c0_51 = arith.constant 0 : index
    %c0_52 = arith.constant 0 : index
    %c0_53 = arith.constant 0 : index
    %77 = vector.load %arg5[%c0_50, %c0_51, %c0_52, %c0_53] : memref<1x16x16x128xbf16, #tpu.memory_space<vmem>>, vector<1x16x16x128xbf16>
    tpu.vector_store %arg5[%c0_50, %c0_51, %c0_52, %c0_53], %76 {strides = array<i32>} : memref<1x16x16x128xbf16, #tpu.memory_space<vmem>>, vector<1x16x16x128xbf16>,
    return
  }
  func.func @transform_0(%arg0: i32, %arg1: i32) -> (i32, i32, i32, i32) {
    %c0_i32 = arith.constant 0 : i32
    %c0_i32_0 = arith.constant 0 : i32
    %c0_i32_1 = arith.constant 0 : i32
    %c0_i32_2 = arith.constant 0 : i32
    return %arg0, %c0_i32, %c0_i32_0, %c0_i32_1 : i32, i32, i32, i32
  }
  func.func @transform_1(%arg0: i32, %arg1: i32) -> (i32, i32) {
    %c0_i32 = arith.constant 0 : i32
    %c0_i32_0 = arith.constant 0 : i32
    %c0_i32_1 = arith.constant 0 : i32
    return %c0_i32, %c0_i32_0 : i32, i32
  }
  func.func @transform_2(%arg0: i32, %arg1: i32) -> (i32, i32) {
    %c0_i32 = arith.constant 0 : i32
    %c0_i32_0 = arith.constant 0 : i32
    %c0_i32_1 = arith.constant 0 : i32
    return %c0_i32, %c0_i32_0 : i32, i32
  }
  func.func @transform_3(%arg0: i32, %arg1: i32) -> (i32, i32, i32, i32) {
    %c0_i32 = arith.constant 0 : i32
    %c0_i32_0 = arith.constant 0 : i32
    %c0_i32_1 = arith.constant 0 : i32
    return %arg0, %arg1, %c0_i32, %c0_i32_0 : i32, i32, i32, i32
  }
}

</mosaic_0001>

<bundles_post_ra>
// kernel: upsample_conv2d.1
= control target key start
LH: loop header
LB: loop body
LE: loop exit
PB: predicated region body
PF: predicated region fallthrough
CT: control target
= control target key end

     0   :  { %s5177_s12 = smov 0   ;;  %s5179_s13 = smov 0   ;;  %s6578_s0 = inlined_call_operand.vmem [shape: bf16[2,18,18,4], index: 0, kind: input, shape index: {}]   ;;  %s6579_s1 = inlined_call_operand.vmem [shape: bf16[36,128], index: 1, kind: input, shape index: {}]   ;;  %s6580_s2 = inlined_call_operand.vmem [shape: f32[1,128], index: 2, kind: input, shape index: {}]   ;;  %s6581_s3 = inlined_call_operand.vmem [shape: bf16[2,16,16,128], index: 3, kind: output, shape index: {}]  }
   0x1   :  { %s5181_s14 = smov 0  }
   0x2 LB: > { %s25_s15 = sadd.s32 1, %s5151_s13  ;;  %p4327_p0 = scmp.ge.s32.totalorder %s5155_s14, 1  ;;  %s5155_s14 = sphi %s5181_s14, %s13_s14   ;;  %s5151_s13 = sphi %s5179_s13, %s6595_s13   ;;  %s5147_s12 = sphi %s5177_s12, %s6594_s12  }
   0x3   : > { %p27_p1 = scmp.ge.s32.totalorder %s25_s15, 2  ;;  %p151_p2 = scmp.lt.s32.totalorder %s5155_s14, 3 }
   0x5   : > { %s6597_s15 = smov (%p27_p1, %s25_s15), 0  ;;  %p152_p3 = pnand %p4327_p0, %p151_p2 }
   0x7   : > { %155 = sbr.rel (%p152_p3) target bundleno = 760 (0x2f8), region = 32 }
   0xc   : > { %v637_v0 = vld [vmem:[%s6579_s1] sm:$0xc]  ;;  %p180_p4 = scmp.lt.s32.totalorder %s5147_s12, 1  ;;  %v1215_v3 = vld [vmem:[%s6579_s1 + $0x4] sm:$0x3]  ;;  %vm739_vm0 = vcmask 1041408  }
   0xd   : > { %v687_v1 = vunpack.c.l.b16 %v637_v0  ;;  %v233_v4 = vld [vmem:[%s6579_s1] sm:$0x3]  ;;  %v2161_v5 = vld [vmem:[%s6579_s1 + $0x8] sm:$0x3]  ;;  %vm250_vm1 = vsmask.f32 3328 }
   0xe   : > { %s6599_s12 = smov (!%p180_p4, %s5147_s12), 1  ;;  %vm251_vm2 = vsmask.f32 7440  ;;  %v1313_v7 = vsel %vm739_vm0, %v1215_v3, 0  ;;  %v1472_v8 = vld [vmem:[%s6579_s1 + $0x4] sm:$0xc] }
   0xf   : > { %v688_v2 = vpack.c.b16 %v687_v1, %v687_v1  ;;  %s5056_s22 = smul.u32 216, %s6599_s12  ;;  %v961_v9 = vsel %vm739_vm0, %v233_v4, 0  ;;  %v2259_v13 = vsel %vm739_vm0, %v2161_v5, 0  ;;  %v1554_v22 = vunpack.c.l.b16 %v1472_v8  ;;  %vm5232_vm4 = vmor %vm250_vm1, %vm251_vm2  ;;  %s4909_s17 = sshll.u32 %s6599_s12, 7 }
  0x10   : > { %vm690_vm3 = vcmask 31744   ;;  %vm1100_vm5 = vcmask 1042432   ;;  %vm1101_vm6 = vcmask 1046532   ;;  %s6307_s19 = scalar_lea.vmem %s6581_s3, %s4909_s17 }
  0x11   : > { %v689_v6 = vrot.slane %v688_v2, 2  ;;  %s5213_s27 = scalar_lea.vmem %s6578_s0, %s5056_s22  ;;  %v1555_v42 = vpack.c.b16 %v1554_v22, %v1554_v22  ;;  %vm5407_vm7 = vmor %vm1100_vm5, %vm1101_vm6 }
  0x12   : > { %v209_v11 = vld [vmem:[%s5213_s27 + $0x30] sm:$0xf]  ;;  %v210_v12 = vld [vmem:[%s5213_s27 + $0x34] sm:$0xf]  ;;  %v238_v14 = vld [vmem:[%s5213_s27 + $0x38] sm:$0x1] }
  0x13   : > { %v741_v10 = vsel %vm739_vm0, %v689_v6, 0  ;;  %v350_v15 = vshrl.u32 %v209_v11, 16  ;;  %v353_v16 = vshll.u32 %v209_v11, 16  ;;  %v359_v17 = vshll.u32 %v210_v12, 16  ;;  %v217_v20 = vld [vmem:[%s5213_s27 + $0x60] sm:$0xf] }
  0x14   : > { %5053 = vmatpush.bf16.msra.mxu1 %v741_v10  ;;  %5054 = vmatpush.bf16.msra.mxu2 %v741_v10  ;;  %v363_v18 = vshrl.u32 %v210_v12, 16  ;;  %v369_v19 = vshll.u32 %v238_v14, 16  ;;  %v218_v21 = vld [vmem:[%s5213_s27 + $0x64] sm:$0xf]  ;;  %v242_v27 = vld [vmem:[%s5213_s27 + $0x68] sm:$0x1] }
  0x15   : > { %5055 = vmatpush.bf16.msra.mxu3 %v741_v10  ;;  %750 = vmatpush.bf16.msra.mxu0 %v741_v10  ;;  %v352_v23 = vrot.slane %v350_v15, 4  ;;  %v355_v24 = vrot.slane %v353_v16, 5  ;;  %v361_v25 = vrot.slane %v359_v17, 5  ;;  %v446_v29 = vshrl.u32 %v217_v20, 16  ;;  %v225_v36 = vld [vmem:[%s5213_s27 + $0x90] sm:$0xf] }
  0x16   : > { %v365_v26 = vrot.slane %v363_v18, 4  ;;  %v371_v28 = vrot.slane %v369_v19, 5  ;;  %v449_v30 = vshll.u32 %v217_v20, 16  ;;  %v455_v31 = vshll.u32 %v218_v21, 16  ;;  %v226_v37 = vld [vmem:[%s5213_s27 + $0x94] sm:$0xf] }
  0x17   : > { %v356_v32 = vor.u32 %v355_v24, %v352_v23  ;;  %v459_v34 = vshrl.u32 %v218_v21, 16  ;;  %v465_v35 = vshll.u32 %v242_v27, 16  ;;  %v448_v39 = vrot.slane %v446_v29, 4  ;;  %v246_v54 = vld [vmem:[%s5213_s27 + $0x98] sm:$0x1] }
  0x18   : > { %1322 = vmatpush.bf16.msrb.mxu2 %v1313_v7  ;;  %970 = vmatpush.bf16.msrb.mxu1 %v961_v9  ;;  %v366_v33 = vor.u32 %v365_v26, %v361_v25  ;;  %v451_v40 = vrot.slane %v449_v30, 5  ;;  %v457_v41 = vrot.slane %v455_v31, 5  ;;  %v542_v48 = vshrl.u32 %v225_v36, 16  ;;  %v201_v0 = vld [vmem:[%s5213_s27] sm:$0xf] }
  0x19   : > { %2268 = vmatpush.bf16.msrb.mxu0 %v2259_v13  ;;  %v357_v43 = vrot.slane %v356_v32, 4  ;;  %v461_v45 = vrot.slane %v459_v34, 4  ;;  %v467_v46 = vrot.slane %v465_v35, 5  ;;  %v545_v49 = vshll.u32 %v225_v36, 16  ;;  %v5245_v4 = vld [vmem:[%s5213_s27 + $0x4] sm:$0xf] }
  0x1a   : > { %v367_v44 = vrot.slane %v366_v33, 4  ;;  %v452_v47 = vor.u32 %v451_v40, %v448_v39  ;;  %v551_v50 = vshll.u32 %v226_v37, 16  ;;  %v555_v55 = vshrl.u32 %v226_v37, 16  ;;  %v5250_v10 = vld [vmem:[%s5213_s27 + $0x8] sm:$0x1] }
  0x1b   : > { %v362_v51 = vsel %vm5232_vm4, %v357_v43, %v361_v25  ;;  %v462_v53 = vor.u32 %v461_v45, %v457_v41  ;;  %v544_v59 = vrot.slane %v542_v48, 4  ;;  %v547_v61 = vrot.slane %v545_v49, 5  ;;  %v211_v23 = vld [vmem:[%s5213_s27 + $0x3c] sm:$0xf]  ;;  %v5266_v32 = vld [vmem:[%s5213_s27 + $0x44] sm:$0x1] }
  0x1c   : > { %v372_v52 = vsel %vm5232_vm4, %v367_v44, %v371_v28  ;;  %v646_v56 = vunpack.c.l.b16 %v362_v51  ;;  %v453_v58 = vrot.slane %v452_v47, 4  ;;  %v553_v62 = vrot.slane %v551_v50, 5  ;;  %v5262_v28 = vld [vmem:[%s5213_s27 + $0x40] sm:$0xf]  ;;  %v219_v37 = vld [vmem:[%s5213_s27 + $0x6c] sm:$0xf] }
  0x1d   : > { %v647_v57 = vunpack.c.l.b16 %v372_v52  ;;  %v463_v60 = vrot.slane %v462_v53, 4  ;;  %v557_v63 = vrot.slane %v555_v55, 4  ;;  %v561_v3 = vshll.u32 %v246_v54, 16  ;;  %v220_v47 = vld [vmem:[%s5213_s27 + $0x70] sm:$0xf] }
  0x1e   : > { %v458_v2 = vsel %vm5232_vm4, %v453_v58, %v457_v41  ;;  %v1556_v5 = vrot.slane %v1555_v42, 2  ;;  %v548_v8 = vor.u32 %v547_v61, %v544_v59  ;;  %v254_v13 = vshrl.u32 %v201_v0, 16  ;;  %v243_v51 = vld [vmem:[%s5213_s27 + $0x74] sm:$0x1] }
  0x1f   : > { %v674_v1 = vpack.c.b16 %v647_v57, %v646_v56  ;;  %v468_v6 = vsel %vm5232_vm4, %v463_v60, %v467_v46  ;;  %v654_v7 = vunpack.c.l.b16 %v458_v2  ;;  %v558_v9 = vor.u32 %v557_v63, %v553_v62 }
  0x20   : > { %v655_v11 = vunpack.c.l.b16 %v468_v6  ;;  %v563_v12 = vrot.slane %v561_v3, 5  ;;  %v257_v14 = vshll.u32 %v201_v0, 16  ;;  %v549_v15 = vrot.slane %v548_v8, 4  ;;  %v228_v6 = vld [vmem:[%s5213_s27 + $0xa0] sm:$0xf] }
  0x21   : > { %4335 = vmatmul.msk.bf16.vlgmr.msra.gmra.mxu1 %vm690_vm3, %v674_v1  ;;  %v559_v16 = vrot.slane %v558_v9, 4  ;;  %v263_v17 = vshll.u32 %v5245_v4, 16  ;;  %v267_v18 = vshrl.u32 %v5245_v4, 16  ;;  %v256_v20 = vrot.slane %v254_v13, 4  ;;  %v227_v1 = vld [vmem:[%s5213_s27 + $0x9c] sm:$0xf] }
  0x22   : > { %v678_v19 = vpack.c.b16 %v655_v11, %v654_v7  ;;  %v259_v21 = vrot.slane %v257_v14, 5  ;;  %v273_v22 = vshll.u32 %v5250_v10, 16  ;;  %v554_v24 = vsel %vm5232_vm4, %v549_v15, %v553_v62  ;;  %v247_v14 = vld [vmem:[%s5213_s27 + $0xa4] sm:$0x1] }
  0x23   : > { %v564_v25 = vsel %vm5232_vm4, %v559_v16, %v563_v12  ;;  %v265_v26 = vrot.slane %v263_v17, 5  ;;  %v269_v27 = vrot.slane %v267_v18, 4  ;;  %v662_v29 = vunpack.c.l.b16 %v554_v24 }
  0x24   : > { %4339 = vmatmul.msk.bf16.vlgmr.msra.gmra.mxu2 %vm690_vm3, %v678_v19  ;;  %v663_v30 = vunpack.c.l.b16 %v564_v25  ;;  %v260_v31 = vor.u32 %v259_v21, %v256_v20  ;;  %v275_v34 = vrot.slane %v273_v22, 5  ;;  %v1606_v35 = vsel %vm739_vm0, %v1556_v5, 0 }
  0x25   : > { %v270_v33 = vor.u32 %v269_v27, %v265_v26  ;;  %v374_v36 = vshrl.u32 %v211_v23, 16  ;;  %1615 = vmatpush.bf16.msrb.mxu3 %v1606_v35  ;;  %v377_v41 = vshll.u32 %v211_v23, 16  ;;  %v383_v42 = vshll.u32 %v5262_v28, 16  ;;  %v5292_v35 = vld [vmem:[%s5213_s27 + $0x10] sm:$0xf] }
  0x26   : > { %v682_v39 = vpack.c.b16 %v663_v30, %v662_v29  ;;  %v261_v40 = vrot.slane %v260_v31, 4  ;;  %v387_v45 = vshrl.u32 %v5262_v28, 16  ;;  %v393_v46 = vshll.u32 %v5266_v32, 16  ;;  %v203_v30 = vld [vmem:[%s5213_s27 + $0xc] sm:$0xf] }
  0x27   : > { %v271_v43 = vrot.slane %v270_v33, 4  ;;  %v376_v44 = vrot.slane %v374_v36, 4  ;;  %v379_v49 = vrot.slane %v377_v41, 5  ;;  %v385_v50 = vrot.slane %v383_v42, 5  ;;  %v5295_v36 = vld [vmem:[%s5213_s27 + $0x14] sm:$0x1] }
  0x28   : > { %4343 = vmatmul.msk.bf16.vlgmr.msra.gmra.mxu3 %vm690_vm3, %v682_v39  ;;  %v266_v48 = vsel %vm5232_vm4, %v261_v40, %v265_v26  ;;  %v470_v52 = vshrl.u32 %v219_v37, 16  ;;  %v389_v55 = vrot.slane %v387_v45, 4  ;;  %v395_v56 = vrot.slane %v393_v46, 5 }
  0x29   : > { %v276_v53 = vsel %vm5232_vm4, %v271_v43, %v275_v34  ;;  %v638_v54 = vunpack.c.l.b16 %v266_v48  ;;  %v380_v58 = vor.u32 %v379_v49, %v376_v44  ;;  %v473_v60 = vshll.u32 %v219_v37, 16 }
  0x2a   : > { %v639_v57 = vunpack.c.l.b16 %v276_v53  ;;  %v472_v59 = vrot.slane %v470_v52, 4  ;;  %v390_v61 = vor.u32 %v389_v55, %v385_v50  ;;  %v479_v62 = vshll.u32 %v220_v47, 16  ;;  %v5307_v55 = vld [vmem:[%s5213_s27 + $0x4c] sm:$0xf] }
  0x2b   : > { %v483_v63 = vshrl.u32 %v220_v47, 16  ;;  %v489_v0 = vshll.u32 %v243_v51, 16  ;;  %v381_v3 = vrot.slane %v380_v58, 4  ;;  %v475_v5 = vrot.slane %v473_v60, 5 }
  0x2c   : > { %v670_v2 = vpack.c.b16 %v639_v57, %v638_v54  ;;  %v391_v7 = vrot.slane %v390_v61, 4  ;;  %v481_v8 = vrot.slane %v479_v62, 5  ;;  %v566_v15 = vshrl.u32 %v227_v1, 16  ;;  %v5311_v62 = vld [vmem:[%s5213_s27 + $0x50] sm:$0x1] }
  0x2d   : > { %v485_v9 = vrot.slane %v483_v63, 4  ;;  %v491_v11 = vrot.slane %v489_v0, 5  ;;  %v386_v12 = vsel %vm5232_vm4, %v381_v3, %v385_v50  ;;  %v476_v13 = vor.u32 %v475_v5, %v472_v59  ;;  %v213_v50 = vld [vmem:[%s5213_s27 + $0x48] sm:$0xf] }
  0x2e   : > { %4331 = vmatmul.msk.bf16.vlgmr.msra.gmra.mxu0 %vm690_vm3, %v670_v2  ;;  %v569_v16 = vshll.u32 %v227_v1, 16  ;;  %v396_v17 = vsel %vm5232_vm4, %v391_v7, %v395_v56  ;;  %v648_v18 = vunpack.c.l.b16 %v386_v12  ;;  %v575_v20 = vshll.u32 %v228_v6, 16 }
  0x2f   : > { %v486_v19 = vor.u32 %v485_v9, %v481_v8  ;;  %v649_v21 = vunpack.c.l.b16 %v396_v17  ;;  %v477_v22 = vrot.slane %v476_v13, 4  ;;  %v568_v23 = vrot.slane %v566_v15, 4 }
  0x30   : > { %v571_v24 = vrot.slane %v569_v16, 5  ;;  %v577_v26 = vrot.slane %v575_v20, 5  ;;  %v579_v27 = vshrl.u32 %v228_v6, 16  ;;  %v585_v29 = vshll.u32 %v247_v14, 16  ;;  %v221_v6 = vld [vmem:[%s5213_s27 + $0x78] sm:$0xf] }
  0x31   : > { %v487_v25 = vrot.slane %v486_v19, 4  ;;  %v675_v31 = vpack.c.b16 %v649_v21, %v648_v18  ;;  %v482_v33 = vsel %vm5232_vm4, %v477_v22, %v481_v8  ;;  %v278_v44 = vshrl.u32 %v203_v30, 16  ;;  %v222_v19 = vld [vmem:[%s5213_s27 + $0x7c] sm:$0xf]  ;;  %v244_v20 = vld [vmem:[%s5213_s27 + $0x80] sm:$0x1] }
  0x32   : > { %v572_v34 = vor.u32 %v571_v24, %v568_v23  ;;  %v656_v39 = vunpack.c.l.b16 %v482_v33  ;;  %v581_v40 = vrot.slane %v579_v27, 4  ;;  %v587_v41 = vrot.slane %v585_v29, 5 }
  0x33   : > { %v492_v37 = vsel %vm5232_vm4, %v487_v25, %v491_v11  ;;  %4336 = vmatmul.msk.bf16.gmra.mxu1 %vm690_vm3, %v675_v31  ;;  %v281_v45 = vshll.u32 %v203_v30, 16  ;;  %v287_v47 = vshll.u32 %v5292_v35, 16  ;;  %v291_v48 = vshrl.u32 %v5292_v35, 16 }
  0x34   : > { %v657_v42 = vunpack.c.l.b16 %v492_v37  ;;  %v573_v43 = vrot.slane %v572_v34, 4  ;;  %v582_v46 = vor.u32 %v581_v40, %v577_v26  ;;  %v297_v49 = vshll.u32 %v5295_v36, 16 }
  0x35   : > { %v280_v53 = vrot.slane %v278_v44, 4  ;;  %v283_v54 = vrot.slane %v281_v45, 5  ;;  %v289_v58 = vrot.slane %v287_v47, 5  ;;  %v293_v59 = vrot.slane %v291_v48, 4  ;;  %v248_v48 = vld [vmem:[%s5213_s27 + $0xb0] sm:$0x1] }
  0x36   : > { %v679_v51 = vpack.c.b16 %v657_v42, %v656_v39  ;;  %v578_v52 = vsel %vm5232_vm4, %v573_v43, %v577_v26  ;;  %v583_v56 = vrot.slane %v582_v46, 4  ;;  %v299_v61 = vrot.slane %v297_v49, 5  ;;  %v229_v39 = vld [vmem:[%s5213_s27 + $0xa8] sm:$0xf]  ;;  %v230_v43 = vld [vmem:[%s5213_s27 + $0xac] sm:$0xf] }
  0x37   : > { %v664_v57 = vunpack.c.l.b16 %v578_v52  ;;  %v284_v60 = vor.u32 %v283_v54, %v280_v53  ;;  %v398_v63 = vshrl.u32 %v213_v50, 16  ;;  %v401_v0 = vshll.u32 %v213_v50, 16 }
  0x38   : > { %4340 = vmatmul.msk.bf16.gmra.mxu2 %vm690_vm3, %v679_v51  ;;  %v588_v1 = vsel %vm5232_vm4, %v583_v56, %v587_v41  ;;  %v294_v2 = vor.u32 %v293_v59, %v289_v58  ;;  %v407_v3 = vshll.u32 %v5307_v55, 16  ;;  %v411_v5 = vshrl.u32 %v5307_v55, 16 }
  0x39   : > { %v665_v7 = vunpack.c.l.b16 %v588_v1  ;;  %v285_v8 = vrot.slane %v284_v60, 4  ;;  %v400_v9 = vrot.slane %v398_v63, 4  ;;  %v403_v11 = vrot.slane %v401_v0, 5 }
  0x3a   : > { %v295_v12 = vrot.slane %v294_v2, 4  ;;  %v409_v13 = vrot.slane %v407_v3, 5  ;;  %v413_v14 = vrot.slane %v411_v5, 4  ;;  %v417_v15 = vshll.u32 %v5311_v62, 16  ;;  %v5336_v5 = vld [vmem:[%s5213_s27 + $0x1c] sm:$0xf] }
  0x3b   : > { %v683_v16 = vpack.c.b16 %v665_v7, %v664_v57  ;;  %v290_v17 = vsel %vm5232_vm4, %v285_v8, %v289_v58  ;;  %v404_v18 = vor.u32 %v403_v11, %v400_v9  ;;  %v494_v21 = vshrl.u32 %v221_v6, 16  ;;  %v205_v58 = vld [vmem:[%s5213_s27 + $0x18] sm:$0xf]  ;;  %v5342_v8 = vld [vmem:[%s5213_s27 + $0x20] sm:$0x1] }
  0x3c   : > { %v300_v22 = vsel %vm5232_vm4, %v295_v12, %v299_v61  ;;  %v640_v23 = vunpack.c.l.b16 %v290_v17  ;;  %v414_v24 = vor.u32 %v413_v14, %v409_v13  ;;  %v419_v25 = vrot.slane %v417_v15, 5  ;;  %v215_v15 = vld [vmem:[%s5213_s27 + $0x54] sm:$0xf] }
  0x3d   : > { %4344 = vmatmul.msk.bf16.gmra.mxu3 %vm690_vm3, %v683_v16  ;;  %v641_v26 = vunpack.c.l.b16 %v300_v22  ;;  %v405_v27 = vrot.slane %v404_v18, 4  ;;  %v496_v29 = vrot.slane %v494_v21, 4  ;;  %v497_v30 = vshll.u32 %v221_v6, 16 }
  0x3e   : > { %v415_v31 = vrot.slane %v414_v24, 4  ;;  %v503_v33 = vshll.u32 %v222_v19, 16  ;;  %v507_v34 = vshrl.u32 %v222_v19, 16  ;;  %v513_v37 = vshll.u32 %v244_v20, 16 }
  0x3f   : > { %v671_v40 = vpack.c.b16 %v641_v26, %v640_v23  ;;  %v410_v41 = vsel %vm5232_vm4, %v405_v27, %v409_v13  ;;  %v499_v42 = vrot.slane %v497_v30, 5  ;;  %v590_v52 = vshrl.u32 %v229_v39, 16  ;;  %v5351_v27 = vld [vmem:[%s5213_s27 + $0x58] sm:$0xf] }
  0x40   : > { %v420_v44 = vsel %vm5232_vm4, %v415_v31, %v419_v25  ;;  %v650_v45 = vunpack.c.l.b16 %v410_v41  ;;  %v505_v46 = vrot.slane %v503_v33, 5  ;;  %v509_v47 = vrot.slane %v507_v34, 4 }
  0x41   : > { %4332 = vmatmul.msk.bf16.gmra.mxu0 %vm690_vm3, %v671_v40  ;;  %v651_v49 = vunpack.c.l.b16 %v420_v44  ;;  %v500_v50 = vor.u32 %v499_v42, %v496_v29  ;;  %v515_v51 = vrot.slane %v513_v37, 5  ;;  %v593_v54 = vshll.u32 %v229_v39, 16  ;;  %v5358_v37 = vld [vmem:[%s5213_s27 + $0x5c] sm:$0x1]  ;;  %v223_v39 = vld [vmem:[%s5213_s27 + $0x84] sm:$0xf] }
  0x42   : > { %v510_v53 = vor.u32 %v509_v47, %v505_v46  ;;  %v599_v56 = vshll.u32 %v230_v43, 16  ;;  %v603_v57 = vshrl.u32 %v230_v43, 16  ;;  %v592_v61 = vrot.slane %v590_v52, 4 }
  0x43   : > { %v676_v59 = vpack.c.b16 %v651_v49, %v650_v45  ;;  %v501_v60 = vrot.slane %v500_v50, 4  ;;  %v609_v63 = vshll.u32 %v248_v48, 16  ;;  %v595_v1 = vrot.slane %v593_v54, 5 }
  0x44   : > { %v511_v0 = vrot.slane %v510_v53, 4  ;;  %v601_v2 = vrot.slane %v599_v56, 5  ;;  %v605_v3 = vrot.slane %v603_v57, 4  ;;  %v302_v9 = vshrl.u32 %v205_v58, 16  ;;  %v224_v57 = vld [vmem:[%s5213_s27 + $0x88] sm:$0xf] }
  0x45   : > { %4337 = vmatmul.msk.bf16.gmra.mxu1 %vm690_vm3, %v676_v59  ;;  %v506_v6 = vsel %vm5232_vm4, %v501_v60, %v505_v46  ;;  %v611_v7 = vrot.slane %v609_v63, 5  ;;  %v596_v13 = vor.u32 %v595_v1, %v592_v61  ;;  %v305_v18 = vshll.u32 %v205_v58, 16  ;;  %v245_v60 = vld [vmem:[%s5213_s27 + $0x8c] sm:$0x1] }
  0x46   : > { %v516_v11 = vsel %vm5232_vm4, %v511_v0, %v515_v51  ;;  %v658_v12 = vunpack.c.l.b16 %v506_v6  ;;  %v606_v14 = vor.u32 %v605_v3, %v601_v2  ;;  %v304_v17 = vrot.slane %v302_v9, 4 }
  0x47   : > { %v659_v16 = vunpack.c.l.b16 %v516_v11  ;;  %v311_v19 = vshll.u32 %v5336_v5, 16  ;;  %v597_v20 = vrot.slane %v596_v13, 4  ;;  %v315_v22 = vshrl.u32 %v5336_v5, 16 }
  0x48   : > { %v607_v21 = vrot.slane %v606_v14, 4  ;;  %v321_v23 = vshll.u32 %v5342_v8, 16  ;;  %v307_v25 = vrot.slane %v305_v18, 5  ;;  %v422_v29 = vshrl.u32 %v215_v15, 16 }
  0x49   : > { %v680_v24 = vpack.c.b16 %v659_v16, %v658_v12  ;;  %v313_v26 = vrot.slane %v311_v19, 5  ;;  %v602_v30 = vsel %vm5232_vm4, %v597_v20, %v601_v2  ;;  %v317_v33 = vrot.slane %v315_v22, 4  ;;  %v231_v12 = vld [vmem:[%s5213_s27 + $0xb4] sm:$0xf]  ;;  %v232_v20 = vld [vmem:[%s5213_s27 + $0xb8] sm:$0xf] }
  0x4a   : > { %v612_v31 = vsel %vm5232_vm4, %v607_v21, %v611_v7  ;;  %v323_v34 = vrot.slane %v321_v23, 5  ;;  %v666_v40 = vunpack.c.l.b16 %v602_v30  ;;  %v308_v42 = vor.u32 %v307_v25, %v304_v17 }
  0x4b   : > { %4341 = vmatmul.msk.bf16.gmra.mxu2 %vm690_vm3, %v680_v24  ;;  %v667_v41 = vunpack.c.l.b16 %v612_v31  ;;  %v424_v43 = vrot.slane %v422_v29, 4  ;;  %v318_v44 = vor.u32 %v317_v33, %v313_v26  ;;  %v425_v45 = vshll.u32 %v215_v15, 16  ;;  %v249_v24 = vld [vmem:[%s5213_s27 + $0xbc] sm:$0x1] }
  0x4c   : > { %v431_v46 = vshll.u32 %v5351_v27, 16  ;;  %v435_v47 = vshrl.u32 %v5351_v27, 16  ;;  %v309_v49 = vrot.slane %v308_v42, 4  ;;  %v441_v50 = vshll.u32 %v5358_v37, 16 }
  0x4d   : > { %v684_v48 = vpack.c.b16 %v667_v41, %v666_v40  ;;  %v518_v51 = vshrl.u32 %v223_v39, 16  ;;  %v319_v52 = vrot.slane %v318_v44, 4  ;;  %v427_v53 = vrot.slane %v425_v45, 5  ;;  %v207_v41 = vld [vmem:[%s5213_s27 + $0x24] sm:$0xf] }
  0x4e   : > { %v433_v54 = vrot.slane %v431_v46, 5  ;;  %v437_v56 = vrot.slane %v435_v47, 4  ;;  %v314_v58 = vsel %vm5232_vm4, %v309_v49, %v313_v26  ;;  %v443_v59 = vrot.slane %v441_v50, 5  ;;  %v5384_v46 = vld [vmem:[%s5213_s27 + $0x28] sm:$0xf] }
  0x4f   : > { %4345 = vmatmul.msk.bf16.gmra.mxu3 %vm690_vm3, %v684_v48  ;;  %v520_v61 = vrot.slane %v518_v51, 4  ;;  %v521_v63 = vshll.u32 %v223_v39, 16  ;;  %v324_v0 = vsel %vm5232_vm4, %v319_v52, %v323_v34  ;;  %v642_v1 = vunpack.c.l.b16 %v314_v58  ;;  %v5387_v51 = vld [vmem:[%s5213_s27 + $0x2c] sm:$0x1] }
  0x50   : > { %v428_v2 = vor.u32 %v427_v53, %v424_v43  ;;  %v438_v3 = vor.u32 %v437_v56, %v433_v54  ;;  %v643_v6 = vunpack.c.l.b16 %v324_v0  ;;  %v527_v9 = vshll.u32 %v224_v57, 16 }
  0x51   : > { %v523_v7 = vrot.slane %v521_v63, 5  ;;  %v531_v11 = vshrl.u32 %v224_v57, 16  ;;  %v537_v15 = vshll.u32 %v245_v60, 16  ;;  %v614_v25 = vshrl.u32 %v231_v12, 16 }
  0x52   : > { %v429_v13 = vrot.slane %v428_v2, 4  ;;  %v439_v14 = vrot.slane %v438_v3, 4  ;;  %v672_v16 = vpack.c.b16 %v643_v6, %v642_v1  ;;  %v529_v18 = vrot.slane %v527_v9, 5  ;;  %v4571_v9 = vld [vmem:[%s5213_s27 + $0xc] sm:$0xf] }
  0x53   : > { %v524_v17 = vor.u32 %v523_v7, %v520_v61  ;;  %v533_v19 = vrot.slane %v531_v11, 4  ;;  %v539_v23 = vrot.slane %v537_v15, 5  ;;  %v616_v33 = vrot.slane %v614_v25, 4 }
  0x54   : > { %v434_v21 = vsel %vm5232_vm4, %v429_v13, %v433_v54  ;;  %v444_v22 = vsel %vm5232_vm4, %v439_v14, %v443_v59  ;;  %4333 = vmatmul.msk.bf16.gmra.mxu0 %vm690_vm3, %v672_v16  ;;  %v617_v34 = vshll.u32 %v231_v12, 16  ;;  %v623_v39 = vshll.u32 %v232_v20, 16  ;;  %v2819_v14 = vld [vmem:[%s6579_s1 + $0xc] sm:$0x3] }
  0x55   : > { %v652_v26 = vunpack.c.l.b16 %v434_v21  ;;  %v653_v29 = vunpack.c.l.b16 %v444_v22  ;;  %v525_v30 = vrot.slane %v524_v17, 4  ;;  %v534_v31 = vor.u32 %v533_v19, %v529_v18 }
  0x56   : > { %v627_v40 = vshrl.u32 %v232_v20, 16  ;;  %v633_v45 = vshll.u32 %v249_v24, 16  ;;  %v619_v48 = vrot.slane %v617_v34, 5  ;;  %v625_v49 = vrot.slane %v623_v39, 5 }
  0x57   : > { %v677_v42 = vpack.c.b16 %v653_v29, %v652_v26  ;;  %v530_v43 = vsel %vm5232_vm4, %v525_v30, %v529_v18  ;;  %v535_v44 = vrot.slane %v534_v31, 4  ;;  %v1108_v52 = vrot.slane %v5250_v10, 5  ;;  %v1052_v10 = vld [vmem:[%s5213_s27] sm:$0xe]  ;;  %v4572_v18 = vld [vmem:[%s5213_s27 + $0x10] sm:$0xf] }
  0x58   : > { %v660_v47 = vunpack.c.l.b16 %v530_v43  ;;  %v629_v50 = vrot.slane %v627_v40, 4  ;;  %v635_v54 = vrot.slane %v633_v45, 5  ;;  %v326_v56 = vshrl.u32 %v207_v41, 16 }
  0x59   : > { %4338 = vmatmul.msk.bf16.gmra.mxu1 %vm690_vm3, %v677_v42  ;;  %v540_v53 = vsel %vm5232_vm4, %v535_v44, %v539_v23  ;;  %v620_v58 = vor.u32 %v619_v48, %v616_v33  ;;  %v329_v60 = vshll.u32 %v207_v41, 16  ;;  %v335_v63 = vshll.u32 %v5384_v46, 16  ;;  %v4573_v42 = vld [vmem:[%s5213_s27 + $0x14] sm:$0x1]  ;;  %v3504_v48 = vld [vmem:[%s6579_s1 + $0xc] sm:$0xc] }
  0x5a   : > { %v661_v57 = vunpack.c.l.b16 %v540_v53  ;;  %v630_v59 = vor.u32 %v629_v50, %v625_v49  ;;  %v328_v61 = vrot.slane %v326_v56, 4  ;;  %v339_v0 = vshrl.u32 %v5384_v46, 16  ;;  %v4910_v56 = vld [vmem:[%s5213_s27] sm:$0xff] }
  0x5b   : > { %v345_v1 = vshll.u32 %v5387_v51, 16  ;;  %v621_v3 = vrot.slane %v620_v58, 4  ;;  %v331_v7 = vrot.slane %v329_v60, 5  ;;  %v337_v11 = vrot.slane %v335_v63, 5  ;;  %v2558_v60 = vld [vmem:[%s6579_s1 + $0x8] sm:$0xc] }
  0x5c   : > { %v681_v2 = vpack.c.b16 %v661_v57, %v660_v47  ;;  %v631_v6 = vrot.slane %v630_v59, 4  ;;  %v341_v12 = vrot.slane %v339_v0, 4  ;;  %v4427_v23 = vrot.slane %v1052_v10, 9 }
  0x5d   : > { %v347_v13 = vrot.slane %v345_v1, 5  ;;  %v626_v15 = vsel %vm5232_vm4, %v621_v3, %v625_v49  ;;  %v332_v17 = vor.u32 %v331_v7, %v328_v61  ;;  %v1105_v25 = vrot.slane %v5245_v4, 5  ;;  %v3905_v61 = vld [vmem:[%s6579_s1 + $0x10] sm:$0x3] }
  0x5e   : > { %4342 = vmatmul.msk.bf16.gmra.mxu2 %vm690_vm3, %v681_v2  ;;  %v636_v16 = vsel %vm5232_vm4, %v631_v6, %v635_v54  ;;  %v668_v19 = vunpack.c.l.b16 %v626_v15  ;;  %v342_v21 = vor.u32 %v341_v12, %v337_v11  ;;  %v2949_v26 = vsel %vm739_vm0, %v2819_v14, 0 }
  0x5f   : > { %v669_v20 = vunpack.c.l.b16 %v636_v16  ;;  %v333_v24 = vrot.slane %v332_v17, 4  ;;  %v1778_v29 = vshrl.u32 %v4571_v9, 16  ;;  %2958 = vmatpush.bf16.msra.mxu2 %v2949_v26  ;;  %v1781_v33 = vshll.u32 %v4571_v9, 16  ;;  %v4575_v16 = vld [vmem:[%s5213_s27 + $0x1c] sm:$0xf] }
  0x60   : > { %v343_v31 = vrot.slane %v342_v21, 4  ;;  %v1787_v34 = vshll.u32 %v4572_v18, 16  ;;  %v1106_v40 = vsel %vm5407_vm7, %v4427_v23, %v1105_v25  ;;  %v1107_v41 = vrot.slane %v1105_v25, 4 }
  0x61   : > { %v685_v30 = vpack.c.b16 %v669_v20, %v668_v19  ;;  %v338_v39 = vsel %vm5232_vm4, %v333_v24, %v337_v11  ;;  %v1780_v43 = vrot.slane %v1778_v29, 4  ;;  %v1216_v45 = vunpack.c.l.b16 %v1106_v40  ;;  %v4574_v11 = vld [vmem:[%s5213_s27 + $0x18] sm:$0xf]  ;;  %v1053_v19 = vld [vmem:[%s5213_s27 + $0xc] sm:$0xe] }
  0x62   : > { %v348_v4 = vsel %vm5232_vm4, %v343_v31, %v347_v13  ;;  %v644_v44 = vunpack.c.l.b16 %v338_v39  ;;  %v1783_v47 = vrot.slane %v1781_v33, 5  ;;  %v1109_v50 = vsel %vm5407_vm7, %v1107_v41, %v1108_v52  ;;  %v4926_v29 = vld [vmem:[%s5213_s27 + $0xc] sm:$0xff] }
  0x63   : > { %4346 = vmatmul.msk.bf16.gmra.mxu3 %vm690_vm3, %v685_v30  ;;  %v645_v49 = vunpack.c.l.b16 %v348_v4  ;;  %v1789_v53 = vrot.slane %v1787_v34, 5  ;;  %v1791_v54 = vshrl.u32 %v4572_v18, 16  ;;  %v1217_v57 = vunpack.c.l.b16 %v1109_v50  ;;  %v4576_v4 = vld [vmem:[%s5213_s27 + $0x20] sm:$0x1] }
  0x64   : > { %v1784_v58 = vor.u32 %v1783_v47, %v1780_v43  ;;  %v1797_v59 = vshll.u32 %v4573_v42, 16  ;;  %v3554_v1 = vunpack.c.l.b16 %v3504_v48  ;;  %v2608_v3 = vunpack.c.l.b16 %v2558_v60  ;;  %v4911_v48 = vld [vmem:[%s5213_s27 + $0xc] sm:$0xff]  ;;  %v4578_v60 = vld [vmem:[%s5213_s27 + $0x28] sm:$0xf] }
  0x65   : > { %v673_v63 = vpack.c.b16 %v645_v49, %v644_v44  ;;  %v1793_v0 = vrot.slane %v1791_v54, 4  ;;  %v1248_v52 = vpack.c.b16 %v1217_v57, %v1216_v45  ;;  %v4003_v6 = vsel %vm739_vm0, %v3905_v61, 0  ;;  %v4577_v57 = vld [vmem:[%s5213_s27 + $0x24] sm:$0xf] }
  0x66   : > { %v3555_v2 = vpack.c.b16 %v3554_v1, %v3554_v1  ;;  %v1785_v7 = vrot.slane %v1784_v58, 4  ;;  %v1799_v9 = vrot.slane %v1797_v59, 5  ;;  %4012 = vmatpush.bf16.msra.mxu0 %v4003_v6  ;;  %v2609_v14 = vpack.c.b16 %v2608_v3, %v2608_v3 }
  0x67   : > { %4334 = vmatmul.msk.bf16.gmra.mxu0 %vm690_vm3, %v673_v63  ;;  %v1794_v10 = vor.u32 %v1793_v0, %v1789_v53  ;;  %v1112_v15 = vrot.slane %v5292_v35, 5  ;;  %v1802_v20 = vshrl.u32 %v4574_v11, 16  ;;  %v1805_v21 = vshll.u32 %v4574_v11, 16  ;;  %v1054_v63 = vld [vmem:[%s5213_s27 + $0x18] sm:$0xe] }
  0x68   : > { %v3556_v13 = vrot.slane %v3555_v2, 2  ;;  %v2610_v18 = vrot.slane %v2609_v14, 2  ;;  %v1790_v23 = vsel %vm5232_vm4, %v1785_v7, %v1789_v53  ;;  %v1811_v35 = vshll.u32 %v4575_v16, 16 }
  0x69   : > { %4411 = vmatmul.msk.bf16.vlgmr.msrb.gmra.mxu1 %vm690_vm3, %v4910_v56  ;;  %v1795_v12 = vrot.slane %v1794_v10, 4  ;;  %v1815_v26 = vshrl.u32 %v4575_v16, 16  ;;  %v4428_v30 = vrot.slane %v1053_v19, 9  ;;  %v1114_v31 = vrot.slane %v1112_v15, 4 }
  0x6a   : > { %v3606_v17 = vsel %vm739_vm0, %v3556_v13, 0  ;;  %v2660_v25 = vsel %vm739_vm0, %v2610_v18, 0  ;;  %v1115_v33 = vrot.slane %v5295_v36, 5  ;;  %v2162_v34 = vunpack.c.l.b16 %v1790_v23  ;;  %v4579_v18 = vld [vmem:[%s5213_s27 + $0x2c] sm:$0x1] }
  0x6b   : > { %v1800_v24 = vsel %vm5232_vm4, %v1795_v12, %v1799_v9  ;;  %3615 = vmatpush.bf16.msra.mxu3 %v3606_v17  ;;  %2669 = vmatpush.bf16.msra.mxu1 %v2660_v25  ;;  %v1804_v40 = vrot.slane %v1802_v20, 4  ;;  %v1807_v41 = vrot.slane %v1805_v21, 5  ;;  %v1813_v42 = vrot.slane %v1811_v35, 5  ;;  %v4927_v9 = vld [vmem:[%s5213_s27 + $0x18] sm:$0xff] }
  0x6c   : > { %v2163_v39 = vunpack.c.l.b16 %v1800_v24  ;;  %v1817_v43 = vrot.slane %v1815_v26, 4  ;;  %v1113_v44 = vsel %vm5407_vm7, %v4428_v30, %v1112_v15  ;;  %v1116_v45 = vsel %vm5407_vm7, %v1114_v31, %v1115_v33  ;;  %v4912_v25 = vld [vmem:[%s5213_s27 + $0x18] sm:$0xff] }
  0x6d   : > { %v1808_v36 = vor.u32 %v1807_v41, %v1804_v40  ;;  %v1821_v50 = vshll.u32 %v4576_v4, 16  ;;  %v1218_v53 = vunpack.c.l.b16 %v1113_v44  ;;  %v1219_v54 = vunpack.c.l.b16 %v1116_v45 }
  0x6e   : > { %4443 = vmatmul.msk.bf16.vlgmr.msrb.gmra.mxu2 %vm690_vm3, %v1248_v52  ;;  %v2194_v47 = vpack.c.b16 %v2163_v39, %v2162_v34  ;;  %v1818_v49 = vor.u32 %v1817_v43, %v1813_v42  ;;  %v1119_v0 = vrot.slane %v5336_v5, 5  ;;  %v1826_v1 = vshrl.u32 %v4577_v57, 16  ;;  %v4580_v34 = vld [vmem:[%s5213_s27 + $0x30] sm:$0xf]  ;;  %v4581_v39 = vld [vmem:[%s5213_s27 + $0x34] sm:$0xf] }
  0x6f   : > { %v1809_v56 = vrot.slane %v1808_v36, 4  ;;  %v1823_v59 = vrot.slane %v1821_v50, 5  ;;  %v1249_v61 = vpack.c.b16 %v1219_v54, %v1218_v53  ;;  %v1829_v10 = vshll.u32 %v4577_v57, 16  ;;  %v1055_v43 = vld [vmem:[%s5213_s27 + $0x24] sm:$0xe] }
  0x70   : > { %v1819_v58 = vrot.slane %v1818_v49, 4  ;;  %v1835_v2 = vshll.u32 %v4578_v60, 16  ;;  %v1839_v3 = vshrl.u32 %v4578_v60, 16  ;;  %v4429_v7 = vrot.slane %v1054_v63, 9  ;;  %v4928_v36 = vld [vmem:[%s5213_s27 + $0x24] sm:$0xff] }
  0x71   : > { %v1814_v52 = vsel %vm5232_vm4, %v1809_v56, %v1813_v42  ;;  %v1121_v12 = vrot.slane %v1119_v0, 4  ;;  %v1122_v5 = vrot.slane %v5342_v8, 5  ;;  %v1828_v13 = vrot.slane %v1826_v1, 4 }
  0x72   : > { %v1824_v6 = vsel %vm5232_vm4, %v1819_v58, %v1823_v59  ;;  %v2164_v11 = vunpack.c.l.b16 %v1814_v52  ;;  %v1831_v15 = vrot.slane %v1829_v10, 5  ;;  %v1837_v16 = vrot.slane %v1835_v2, 5  ;;  %v4582_v59 = vld [vmem:[%s5213_s27 + $0x38] sm:$0x1] }
  0x73   : > { %4555 = vmatmul.msk.bf16.vlgmr.msrb.gmra.mxu3 %vm690_vm3, %v4926_v29  ;;  %v2165_v14 = vunpack.c.l.b16 %v1824_v6  ;;  %v1841_v17 = vrot.slane %v1839_v3, 4  ;;  %v1120_v19 = vsel %vm5407_vm7, %v4429_v7, %v1119_v0  ;;  %v1123_v20 = vsel %vm5407_vm7, %v1121_v12, %v1122_v5  ;;  %v4583_v3 = vld [vmem:[%s5213_s27 + $0x3c] sm:$0xf]  ;;  %v4584_v6 = vld [vmem:[%s5213_s27 + $0x40] sm:$0xf] }
  0x74   : > { %v1832_v23 = vor.u32 %v1831_v15, %v1828_v13  ;;  %v1845_v8 = vshll.u32 %v4579_v18, 16  ;;  %v1220_v35 = vunpack.c.l.b16 %v1120_v19  ;;  %v1221_v26 = vunpack.c.l.b16 %v1123_v20  ;;  %v5082_v5 = vld [vmem:[%s5213_s27 + $0x34] sm:$0xf] }
  0x75   : > { %v2195_v21 = vpack.c.b16 %v2165_v14, %v2164_v11  ;;  %v1842_v24 = vor.u32 %v1841_v17, %v1837_v16  ;;  %v1126_v40 = vrot.slane %v5384_v46, 5  ;;  %v1850_v4 = vshrl.u32 %v4580_v34, 16  ;;  %v1056_v14 = vld [vmem:[%s5213_s27 + $0x30] sm:$0xe] }
  0x76   : > { %v1833_v29 = vrot.slane %v1832_v23, 4  ;;  %v1847_v31 = vrot.slane %v1845_v8, 5  ;;  %v1250_v33 = vpack.c.b16 %v1221_v26, %v1220_v35  ;;  %v1853_v44 = vshll.u32 %v4580_v34, 16  ;;  %v5083_v8 = vld [vmem:[%s5213_s27 + $0x38] sm:$0x1]  ;;  %v4929_v35 = vld [vmem:[%s5213_s27 + $0x30] sm:$0xff] }
  0x77   : > { %4619 = vmatmul.msk.bf16.vlgmr.msrb.gmra.mxu0 %vm690_vm3, %v2194_v47  ;;  %v1843_v30 = vrot.slane %v1842_v24, 4  ;;  %v1859_v45 = vshll.u32 %v4581_v39, 16  ;;  %v1863_v47 = vshrl.u32 %v4581_v39, 16  ;;  %v1128_v49 = vrot.slane %v1126_v40, 4  ;;  %v4585_v39 = vld [vmem:[%s5213_s27 + $0x44] sm:$0x1] }
  0x78   : > { %v1838_v41 = vsel %vm5232_vm4, %v1833_v29, %v1837_v16  ;;  %v1129_v46 = vrot.slane %v5387_v51, 5  ;;  %v1852_v54 = vrot.slane %v1850_v4, 4  ;;  %v1855_v56 = vrot.slane %v1853_v44, 5  ;;  %v4913_v51 = vld [vmem:[%s5213_s27 + $0x24] sm:$0xff] }
  0x79   : > { %4412 = vmatmul.msk.bf16.gmra.mxu1 %vm690_vm3, %v4911_v48  ;;  %v1848_v42 = vsel %vm5232_vm4, %v1843_v30, %v1847_v31  ;;  %v4430_v48 = vrot.slane %v1055_v43, 9  ;;  %v2166_v50 = vunpack.c.l.b16 %v1838_v41  ;;  %v1861_v57 = vrot.slane %v1859_v45, 5  ;;  %v4914_v45 = vld [vmem:[%s5213_s27 + $0x30] sm:$0xff] }
  0x7a   : > { %v2167_v53 = vunpack.c.l.b16 %v1848_v42  ;;  %v1865_v58 = vrot.slane %v1863_v47, 4  ;;  %v1856_v0 = vor.u32 %v1855_v56, %v1852_v54  ;;  %v1869_v52 = vshll.u32 %v4582_v59, 16  ;;  %v4586_v54 = vld [vmem:[%s5213_s27 + $0x48] sm:$0xf]  ;;  %v4587_v56 = vld [vmem:[%s5213_s27 + $0x4c] sm:$0xf] }
  0x7b   : > { %v1127_v60 = vsel %vm5407_vm7, %v4430_v48, %v1126_v40  ;;  %v1133_v13 = vrot.slane %v5082_v5, 5  ;;  %v1874_v15 = vshrl.u32 %v4583_v3, 16  ;;  %v1877_v16 = vshll.u32 %v4583_v3, 16  ;;  %v4930_v3 = vld [vmem:[%s5213_s27 + $0x3c] sm:$0xff] }
  0x7c   : > { %v2196_v63 = vpack.c.b16 %v2167_v53, %v2166_v50  ;;  %v1866_v1 = vor.u32 %v1865_v58, %v1861_v57  ;;  %v1222_v10 = vunpack.c.l.b16 %v1127_v60  ;;  %v1857_v7 = vrot.slane %v1856_v0, 4 }
  0x7d   : > { %v1871_v11 = vrot.slane %v1869_v52, 5  ;;  %v1883_v17 = vshll.u32 %v4584_v6, 16  ;;  %v1887_v18 = vshrl.u32 %v4584_v6, 16  ;;  %v4431_v23 = vrot.slane %v1056_v14, 9 }
  0x7e   : > { %4444 = vmatmul.msk.bf16.gmra.mxu2 %vm690_vm3, %v1249_v61  ;;  %v1130_v61 = vsel %vm5407_vm7, %v1128_v49, %v1129_v46  ;;  %v1862_v20 = vsel %vm5232_vm4, %v1857_v7, %v1861_v57  ;;  %v1135_v24 = vrot.slane %v1133_v13, 4  ;;  %v1876_v26 = vrot.slane %v1874_v15, 4 }
  0x7f   : > { %v1223_v2 = vunpack.c.l.b16 %v1130_v61  ;;  %v1879_v29 = vrot.slane %v1877_v16, 5  ;;  %v1885_v30 = vrot.slane %v1883_v17, 5  ;;  %v1889_v31 = vrot.slane %v1887_v18, 4  ;;  %v4588_v16 = vld [vmem:[%s5213_s27 + $0x50] sm:$0x1] }
  0x80   : > { %v1134_v40 = vsel %vm5407_vm7, %v4431_v23, %v1133_v13  ;;  %v1893_v4 = vshll.u32 %v4585_v39, 16  ;;  %v1140_v61 = vrot.slane %v5262_v28, 5  ;;  %v1898_v0 = vshrl.u32 %v4586_v54, 16 }
  0x81   : > { %v1251_v12 = vpack.c.b16 %v1223_v2, %v1222_v10  ;;  %v1880_v42 = vor.u32 %v1879_v29, %v1876_v26  ;;  %v1890_v43 = vor.u32 %v1889_v31, %v1885_v30  ;;  %v1224_v47 = vunpack.c.l.b16 %v1134_v40  ;;  %v4589_v40 = vld [vmem:[%s5213_s27 + $0x54] sm:$0xf] }
  0x82   : > { %v1895_v53 = vrot.slane %v1893_v4, 5  ;;  %v1907_v52 = vshll.u32 %v4587_v56, 16  ;;  %v1911_v10 = vshrl.u32 %v4587_v56, 16  ;;  %v1900_v5 = vrot.slane %v1898_v0, 4 }
  0x83   : > { %4556 = vmatmul.msk.bf16.gmra.mxu3 %vm690_vm3, %v4927_v9  ;;  %v1867_v9 = vrot.slane %v1866_v1, 4  ;;  %v1881_v46 = vrot.slane %v1880_v42, 4  ;;  %v1891_v50 = vrot.slane %v1890_v43, 4  ;;  %v1901_v1 = vshll.u32 %v4586_v54, 16 }
  0x84   : > { %v1909_v14 = vrot.slane %v1907_v52, 5  ;;  %v1913_v15 = vrot.slane %v1911_v10, 4  ;;  %v1147_v42 = vrot.slane %v5307_v55, 5  ;;  %v1150_v55 = vrot.slane %v5311_v62, 5  ;;  %v4591_v10 = vld [vmem:[%s5213_s27 + $0x5c] sm:$0x1] }
  0x85   : > { %v1886_v59 = vsel %vm5232_vm4, %v1881_v46, %v1885_v30  ;;  %v1896_v60 = vsel %vm5232_vm4, %v1891_v50, %v1895_v53  ;;  %v1903_v13 = vrot.slane %v1901_v1, 5  ;;  %v4931_v53 = vld [vmem:[%s5213_s27 + $0x48] sm:$0xff] }
  0x86   : > { %v2170_v2 = vunpack.c.l.b16 %v1886_v59  ;;  %v2171_v6 = vunpack.c.l.b16 %v1896_v60  ;;  %v1914_v23 = vor.u32 %v1913_v15, %v1909_v14  ;;  %v1149_v56 = vrot.slane %v1147_v42, 4  ;;  %v4592_v15 = vld [vmem:[%s5213_s27 + $0x60] sm:$0xf] }
  0x87   : > { %4620 = vmatmul.msk.bf16.gmra.mxu0 %vm690_vm3, %v2195_v21  ;;  %v1872_v21 = vsel %vm5232_vm4, %v1867_v9, %v1871_v11  ;;  %v1142_v9 = vrot.slane %v1140_v61, 4  ;;  %v1143_v11 = vrot.slane %v5266_v32, 5 }
  0x88   : > { %v2169_v34 = vunpack.c.l.b16 %v1872_v21  ;;  %v1904_v21 = vor.u32 %v1903_v13, %v1900_v5  ;;  %v1915_v30 = vrot.slane %v1914_v23, 4  ;;  %v1151_v62 = vsel %vm5407_vm7, %v1149_v56, %v1150_v55  ;;  %v4594_v56 = vld [vmem:[%s5213_s27 + $0x68] sm:$0x1] }
  0x89   : > { %4413 = vmatmul.msk.bf16.gmra.mxu1 %vm690_vm3, %v4912_v25  ;;  %v1136_v25 = vrot.slane %v5083_v8, 5  ;;  %v1144_v18 = vsel %vm5407_vm7, %v1142_v9, %v1143_v11  ;;  %v4915_v8 = vld [vmem:[%s5213_s27 + $0x3c] sm:$0xff]  ;;  %v1941_v5 = vshll.u32 %v4591_v10, 16  ;;  %v4917_v10 = vld [vmem:[%s5213_s27 + $0x54] sm:$0xff] }
  0x8a   : > { %v1227_v26 = vunpack.c.l.b16 %v1144_v18  ;;  %v1905_v29 = vrot.slane %v1904_v21, 4 }
  0x8b   : > { %v1137_v41 = vsel %vm5407_vm7, %v1135_v24, %v1136_v25  ;;  %v1917_v24 = vshll.u32 %v4588_v16, 16  ;;  %v4593_v16 = vld [vmem:[%s5213_s27 + $0x64] sm:$0xf]  ;;  %v1943_v23 = vrot.slane %v1941_v5, 5 }
  0x8c   : > { %v1910_v43 = vsel %vm5232_vm4, %v1905_v29, %v1909_v14  ;;  %v1229_v14 = vunpack.c.l.b16 %v1151_v62  ;;  %v1154_v29 = vrot.slane %v5351_v27, 5 }
  0x8d   : > { %v1919_v31 = vrot.slane %v1917_v24, 5 }
  0x8e   : > { %4445 = vmatmul.msk.bf16.gmra.mxu2 %vm690_vm3, %v1250_v33  ;;  %v2168_v33 = vunpack.c.l.b16 %v1862_v20  ;;  %v2198_v20 = vpack.c.b16 %v2171_v6, %v2170_v2 }
  0x8f   : > { %v1920_v4 = vsel %vm5232_vm4, %v1915_v30, %v1919_v31  ;;  %v1959_v30 = vshrl.u32 %v4593_v16, 16 }
  0x90   : > { %v2197_v44 = vpack.c.b16 %v2169_v34, %v2168_v33  ;;  %v2173_v59 = vunpack.c.l.b16 %v1920_v4 }
  0x93   : > { %4557 = vmatmul.msk.bf16.gmra.mxu3 %vm690_vm3, %v4928_v36  ;;  %v1225_v36 = vunpack.c.l.b16 %v1137_v41  ;;  %v4590_v41 = vld [vmem:[%s5213_s27 + $0x58] sm:$0xf] }
  0x94   : > { %v1935_v46 = vshrl.u32 %v4590_v41, 16 }
  0x95   : > { %v1252_v58 = vpack.c.b16 %v1225_v36, %v1224_v47  ;;  %v1925_v47 = vshll.u32 %v4589_v40, 16  ;;  %v1931_v36 = vshll.u32 %v4590_v41, 16 }
  0x96   : > { %v1937_v1 = vrot.slane %v1935_v46, 4  ;;  %v1961_v46 = vrot.slane %v1959_v30, 4 }
  0x97   : > { %4621 = vmatmul.msk.bf16.gmra.mxu0 %vm690_vm3, %v2196_v63  ;;  %v1933_v0 = vrot.slane %v1931_v36, 5  ;;  %v1157_v36 = vrot.slane %v5358_v37, 5 }
  0x99   : > { %4414 = vmatmul.msk.bf16.gmra.mxu1 %vm690_vm3, %v4913_v51  ;;  %v1057_v51 = vld [vmem:[%s5213_s27 + $0x3c] sm:$0xe]  ;;  %v1938_v11 = vor.u32 %v1937_v1, %v1933_v0 }
  0x9a   : > { %v4432_v7 = vrot.slane %v1057_v51, 9  ;;  %v1927_v51 = vrot.slane %v1925_v47, 5  ;;  %v1156_v47 = vrot.slane %v1154_v29, 4 }
  0x9b   : > { %v1939_v21 = vrot.slane %v1938_v11, 4 }
  0x9c   : > { %v1141_v17 = vsel %vm5407_vm7, %v4432_v7, %v1140_v61  ;;  %v4916_v7 = vld [vmem:[%s5213_s27 + $0x48] sm:$0xff] }
  0x9d   : > { %v1944_v41 = vsel %vm5232_vm4, %v1939_v21, %v1943_v23  ;;  %v5084_v23 = vld [vmem:[%s5213_s27 + $0x64] sm:$0xf] }
  0x9e   : > { %v5502_v19 = vpop.f32.mrf.mxu1  ;;  %4446 = vmatmul.msk.bf16.gmra.mxu2 %vm690_vm3, %v1251_v12 }
  0xa3   : > { %4558 = vmatmul.msk.bf16.gmra.mxu3 %vm690_vm3, %v4929_v35  ;;  %v1226_v35 = vunpack.c.l.b16 %v1141_v17 }
  0xa5   : > { %v1253_v34 = vpack.c.b16 %v1227_v26, %v1226_v35  ;;  %v1949_v35 = vshll.u32 %v4592_v15, 16  ;;  %v1955_v26 = vshll.u32 %v4593_v16, 16 }
  0xa6   : > { %v5520_v49 = vpop.f32.mrf.mxu1 }
  0xa7   : > { %v5518_v48 = vpop.f32.mrf.mxu2  ;;  %4622 = vmatmul.msk.bf16.gmra.mxu0 %vm690_vm3, %v2197_v44  ;;  %v1058_v44 = vld [vmem:[%s5213_s27 + $0x48] sm:$0xe]  ;;  %v1951_v4 = vrot.slane %v1949_v35, 5  ;;  %v1060_v35 = vld [vmem:[%s5213_s27 + $0x60] sm:$0xe] }
  0xa8   : > { %v4433_v54 = vrot.slane %v1058_v44, 9  ;;  %v1957_v44 = vrot.slane %v1955_v26, 5 }
  0xa9   : > { %4415 = vmatmul.msk.bf16.gmra.mxu1 %vm690_vm3, %v4914_v45  ;;  %v1922_v45 = vshrl.u32 %v4589_v40, 16 }
  0xaa   : > { %v1148_v2 = vsel %vm5407_vm7, %v4433_v54, %v1147_v42  ;;  %v2175_v54 = vunpack.c.l.b16 %v1944_v41  ;;  %v1962_v37 = vor.u32 %v1961_v46, %v1957_v44 }
  0xab   : > { %v5526_v57 = vpop.f32.mrf.mxu0  ;;  %v5533_v63 = vpop.f32.mrf.mxu3  ;;  %v1924_v61 = vrot.slane %v1922_v45, 4  ;;  %v1228_v13 = vunpack.c.l.b16 %v1148_v2  ;;  %v4932_v45 = vld [vmem:[%s5213_s27 + $0x54] sm:$0xff] }
  0xac   : > { %v1963_v11 = vrot.slane %v1962_v37, 4 }
  0xad   : > { %v1928_v9 = vor.u32 %v1927_v51, %v1924_v61  ;;  %v1254_v24 = vpack.c.b16 %v1229_v14, %v1228_v13  ;;  %v1158_v51 = vsel %vm5407_vm7, %v1156_v47, %v1157_v36  ;;  %v4595_v13 = vld [vmem:[%s5213_s27 + $0x6c] sm:$0xf]  ;;  %v4596_v14 = vld [vmem:[%s5213_s27 + $0x70] sm:$0xf] }
  0xae   : > { %4447 = vmatmul.msk.bf16.gmra.mxu2 %vm690_vm3, %v1252_v58  ;;  %v2172_v58 = vunpack.c.l.b16 %v1910_v43  ;;  %v1970_v26 = vshrl.u32 %v4595_v13, 16  ;;  %v1979_v30 = vshll.u32 %v4596_v14, 16 }
  0xaf   : > { %v5539_v12 = vpop.f32.mrf.mxu2 }
  0xb0   : > { %v5541_v28 = vpop.f32.mrf.mxu1  ;;  %v1972_v36 = vrot.slane %v1970_v26, 4  ;;  %v4599_v26 = vld [vmem:[%s5213_s27 + $0x7c] sm:$0xf] }
  0xb3   : > { %4559 = vmatmul.msk.bf16.gmra.mxu3 %vm690_vm3, %v4930_v3  ;;  %v5549_v32 = vpop.f32.mrf.mxu0  ;;  %v5552_v25 = vpop.f32.mrf.mxu3  ;;  %v2199_v3 = vpack.c.b16 %v2173_v59, %v2172_v58 }
  0xb7   : > { %4623 = vmatmul.msk.bf16.gmra.mxu0 %vm690_vm3, %v2198_v20  ;;  %v1929_v20 = vrot.slane %v1928_v9, 4 }
  0xb8   : > { %v5555_v33 = vpop.f32.mrf.mxu1 }
  0xb9   : > { %4416 = vmatmul.msk.bf16.gmra.mxu1 %vm690_vm3, %v4915_v8  ;;  %v1946_v8 = vshrl.u32 %v4592_v15, 16  ;;  %v1934_v40 = vsel %vm5232_vm4, %v1929_v20, %v1933_v0  ;;  %v1965_v0 = vshll.u32 %v4594_v56, 16 }
  0xbb   : > { %v5558_v39 = vpop.f32.mrf.mxu2  ;;  %v1948_v43 = vrot.slane %v1946_v8, 4  ;;  %v1967_v5 = vrot.slane %v1965_v0, 5 }
  0xbd   : > { %v1952_v59 = vor.u32 %v1951_v4, %v1948_v43  ;;  %v1968_v21 = vsel %vm5232_vm4, %v1963_v11, %v1967_v5  ;;  %v4933_v4 = vld [vmem:[%s5213_s27 + $0x60] sm:$0xff] }
  0xbe   : > { %v5568_v50 = vpop.f32.mrf.mxu0  ;;  %4448 = vmatmul.msk.bf16.gmra.mxu2 %vm690_vm3, %v1253_v34  ;;  %v1059_v34 = vld [vmem:[%s5213_s27 + $0x54] sm:$0xe] }
  0xbf   : > { %v4434_v27 = vrot.slane %v1059_v34, 9  ;;  %v1953_v9 = vrot.slane %v1952_v59, 4  ;;  %v1983_v34 = vshrl.u32 %v4596_v14, 16  ;;  %v4597_v59 = vld [vmem:[%s5213_s27 + $0x74] sm:$0x1] }
  0xc0   : > { %v5573_v60 = vpop.f32.mrf.mxu3 }
  0xc1   : > { %v1155_v61 = vsel %vm5407_vm7, %v4434_v27, %v1154_v29  ;;  %v1958_v20 = vsel %vm5232_vm4, %v1953_v9, %v1957_v44  ;;  %v1973_v29 = vshll.u32 %v4595_v13, 16  ;;  %v4435_v27 = vrot.slane %v1060_v35, 9  ;;  %v4598_v35 = vld [vmem:[%s5213_s27 + $0x78] sm:$0xf] }
  0xc2   : > { %v5575_v52 = vpop.f32.mrf.mxu1  ;;  %v1230_v62 = vunpack.c.l.b16 %v1155_v61  ;;  %v2176_v44 = vunpack.c.l.b16 %v1958_v20 }
  0xc3   : > { %4560 = vmatmul.msk.bf16.gmra.mxu3 %vm690_vm3, %v4931_v53  ;;  %v5583_v6 = vpop.f32.mrf.mxu2  ;;  %v2174_v53 = vunpack.c.l.b16 %v1934_v40  ;;  %v5085_v40 = vld [vmem:[%s5213_s27 + $0x68] sm:$0x1]  ;;  %v1975_v46 = vrot.slane %v1973_v29, 5  ;;  %v5086_v29 = vld [vmem:[%s5213_s27 + $0x70] sm:$0xf] }
  0xc4   : > { %v1164_v41 = vrot.slane %v5085_v40, 5  ;;  %v1061_v40 = vld [vmem:[%s5213_s27 + $0x6c] sm:$0xe] }
  0xc5   : > { %v2200_v1 = vpack.c.b16 %v2175_v54, %v2174_v53  ;;  %v1981_v53 = vrot.slane %v1979_v30, 5  ;;  %v1985_v54 = vrot.slane %v1983_v34, 4  ;;  %v1976_v0 = vor.u32 %v1975_v46, %v1972_v36  ;;  %v5087_v46 = vld [vmem:[%s5213_s27 + $0x74] sm:$0x1] }
  0xc6   : > { %v5589_v17 = vpop.f32.mrf.mxu0  ;;  %v1168_v30 = vrot.slane %v5086_v29, 5 }
  0xc7   : > { %4624 = vmatmul.msk.bf16.gmra.mxu0 %vm690_vm3, %v2199_v3  ;;  %v1231_v3 = vunpack.c.l.b16 %v1158_v51 }
  0xc8   : > { %v5591_v18 = vpop.f32.mrf.mxu3 }
  0xc9   : > { %4417 = vmatmul.msk.bf16.gmra.mxu1 %vm690_vm3, %v4916_v7  ;;  %v1255_v15 = vpack.c.b16 %v1231_v3, %v1230_v62  ;;  %v4918_v3 = vld [vmem:[%s5213_s27 + $0x60] sm:$0xff] }
  0xca   : > { %v5595_v31 = vpop.f32.mrf.mxu1 }
  0xce   : > { %4449 = vmatmul.msk.bf16.gmra.mxu2 %vm690_vm3, %v1254_v24  ;;  %v5603_v42 = vpop.f32.mrf.mxu2  ;;  %v1161_v24 = vrot.slane %v5084_v23, 5 }
  0xd0   : > { %v1163_v47 = vrot.slane %v1161_v24, 4  ;;  %v1162_v61 = vsel %vm5407_vm7, %v4435_v27, %v1161_v24  ;;  %v2007_v27 = vshrl.u32 %v4599_v26, 16 }
  0xd1   : > { %v5608_v55 = vpop.f32.mrf.mxu0  ;;  %v1232_v5 = vunpack.c.l.b16 %v1162_v61  ;;  %v4436_v61 = vrot.slane %v1061_v40, 9 }
  0xd2   : > { %v5610_v58 = vpop.f32.mrf.mxu3  ;;  %v1165_v51 = vsel %vm5407_vm7, %v1163_v47, %v1164_v41 }
  0xd3   : > { %4561 = vmatmul.msk.bf16.gmra.mxu3 %vm690_vm3, %v4932_v45  ;;  %v2177_v45 = vunpack.c.l.b16 %v1968_v21  ;;  %v1233_v13 = vunpack.c.l.b16 %v1165_v51  ;;  %v1170_v51 = vrot.slane %v1168_v30, 4 }
  0xd5   : > { %v2201_v37 = vpack.c.b16 %v2177_v45, %v2176_v44  ;;  %v1256_v24 = vpack.c.b16 %v1233_v13, %v1232_v5  ;;  %v1997_v44 = vshll.u32 %v4598_v35, 16  ;;  %v2003_v45 = vshll.u32 %v4599_v26, 16 }
  0xd6   : > { %v5618_v2 = vpop.f32.mrf.mxu1  ;;  %v5620_v7 = vpop.f32.mrf.mxu2  ;;  %v2009_v5 = vrot.slane %v2007_v27, 4 }
  0xd7   : > { %4625 = vmatmul.msk.bf16.gmra.mxu0 %vm690_vm3, %v2200_v1  ;;  %v1986_v1 = vor.u32 %v1985_v54, %v1981_v53  ;;  %v1171_v54 = vrot.slane %v5087_v46, 5 }
  0xd9   : > { %4418 = vmatmul.msk.bf16.gmra.mxu1 %vm690_vm3, %v4917_v10  ;;  %v5626_v16 = vpop.f32.mrf.mxu0  ;;  %v1989_v10 = vshll.u32 %v4597_v59, 16  ;;  %v1987_v20 = vrot.slane %v1986_v1, 4  ;;  %v4934_v59 = vld [vmem:[%s5213_s27 + $0x6c] sm:$0xff] }
  0xda   : > { %v5633_v8 = vpop.f32.mrf.mxu3 }
  0xdb   : > { %v1991_v21 = vrot.slane %v1989_v10, 5 }
  0xde   : > { %4450 = vmatmul.msk.bf16.gmra.mxu2 %vm690_vm3, %v1255_v15  ;;  %v5638_v43 = vpop.f32.mrf.mxu1  ;;  %v1977_v15 = vrot.slane %v1976_v0, 4 }
  0xe0   : > { %v1982_v34 = vsel %vm5232_vm4, %v1977_v15, %v1981_v53  ;;  %v4600_v15 = vld [vmem:[%s5213_s27 + $0x80] sm:$0x1] }
  0xe1   : > { %v5641_v56 = vpop.f32.mrf.mxu2 }
  0xe3   : > { %4562 = vmatmul.msk.bf16.gmra.mxu3 %vm690_vm3, %v4933_v4  ;;  %v1994_v4 = vshrl.u32 %v4598_v35, 16  ;;  %v4919_v35 = vld [vmem:[%s5213_s27 + $0x6c] sm:$0xff] }
  0xe4   : > { %v5649_v62 = vpop.f32.mrf.mxu0 }
  0xe5   : > { %v1996_v10 = vrot.slane %v1994_v4, 4 }
  0xe6   : > { %v5652_v9 = vpop.f32.mrf.mxu3  ;;  %v972_v11 = vpop.f32.mrf.mxu1 }
  0xe7   : > { %v973_v14 = vadd.f32 %v972_v11, %v5526_v57  ;;  %4626 = vmatmul.msk.bf16.gmra.mxu0 %vm690_vm3, %v2201_v37  ;;  %v1992_v57 = vsel %vm5232_vm4, %v1987_v20, %v1991_v21  ;;  %v2178_v37 = vunpack.c.l.b16 %v1982_v34  ;;  %v2005_v11 = vrot.slane %v2003_v45, 5 }
  0xe8   : > { %v2179_v0 = vunpack.c.l.b16 %v1992_v57  ;;  %v1169_v20 = vsel %vm5407_vm7, %v4436_v61, %v1168_v30  ;;  %v2013_v34 = vshll.u32 %v4600_v15, 16 }
  0xe9   : > { %v5656_v23 = vpop.f32.mrf.mxu2  ;;  %4419 = vmatmul.msk.bf16.gmra.mxu1 %vm690_vm3, %v4918_v3  ;;  %v1999_v3 = vrot.slane %v1997_v44, 5  ;;  %v2010_v29 = vor.u32 %v2009_v5, %v2005_v11 }
  0xea   : > { %v2202_v21 = vpack.c.b16 %v2179_v0, %v2178_v37  ;;  %v2015_v46 = vrot.slane %v2013_v34, 5  ;;  %v4602_v37 = vld [vmem:[%s5213_s27 + $0x88] sm:$0xf]  ;;  %v5088_v0 = vld [vmem:[%s5213_s27 + $0x7c] sm:$0xf] }
  0xeb   : > { %v2000_v26 = vor.u32 %v1999_v3, %v1996_v10  ;;  %v1062_v10 = vld [vmem:[%s5213_s27 + $0x78] sm:$0xe] }
  0xec   : > { %v5667_v41 = vpop.f32.mrf.mxu0 }
  0xed   : > { %v2001_v27 = vrot.slane %v2000_v26, 4 }
  0xee   : > { %v5669_v47 = vpop.f32.mrf.mxu3  ;;  %4451 = vmatmul.msk.bf16.gmra.mxu2 %vm690_vm3, %v1256_v24  ;;  %v974_v36 = vpop.f32.mrf.mxu1 }
  0xef   : > { %v975_v53 = vadd.f32 %v974_v36, %v5549_v32  ;;  %v1172_v32 = vsel %vm5407_vm7, %v1170_v51, %v1171_v54  ;;  %v2011_v36 = vrot.slane %v2010_v29, 4  ;;  %v4601_v54 = vld [vmem:[%s5213_s27 + $0x84] sm:$0xf]  ;;  %v4935_v29 = vld [vmem:[%s5213_s27 + $0x78] sm:$0xff] }
  0xf0   : > { %v1235_v4 = vunpack.c.l.b16 %v1172_v32  ;;  %v2021_v3 = vshll.u32 %v4601_v54, 16  ;;  %v2031_v32 = vshrl.u32 %v4602_v37, 16 }
  0xf1   : > { %v1324_v1 = vpop.f32.mrf.mxu2  ;;  %v2016_v15 = vsel %vm5232_vm4, %v2011_v36, %v2015_v46 }
  0xf2   : > { %v1404_v13 = vadd.f32 %v1324_v1, %v973_v14  ;;  %v1234_v14 = vunpack.c.l.b16 %v1169_v20  ;;  %v1175_v1 = vrot.slane %v5088_v0, 5  ;;  %v2027_v20 = vshll.u32 %v4602_v37, 16 }
  0xf3   : > { %4563 = vmatmul.msk.bf16.gmra.mxu3 %vm690_vm3, %v4934_v59  ;;  %v2033_v36 = vrot.slane %v2031_v32, 4 }
  0xf4   : > { %v2270_v24 = vpop.f32.mrf.mxu0  ;;  %v1257_v51 = vpack.c.b16 %v1235_v4, %v1234_v14 }
  0xf6   : > { %v1617_v57 = vpop.f32.mrf.mxu3  ;;  %v977_v40 = vpop.f32.mrf.mxu1 }
  0xf7   : > { %v1697_v44 = vadd.f32 %v1617_v57, %v1404_v13  ;;  %v978_v30 = vadd.f32 %v977_v40, %v5568_v50  ;;  %4627 = vmatmul.msk.bf16.gmra.mxu0 %vm690_vm3, %v2202_v21  ;;  %v2018_v50 = vshrl.u32 %v4601_v54, 16  ;;  %v2006_v13 = vsel %vm5232_vm4, %v2001_v27, %v2005_v11  ;;  %v5089_v21 = vld [vmem:[%s5213_s27 + $0x80] sm:$0x1] }
  0xf8   : > { %v4437_v57 = vrot.slane %v1062_v10, 9  ;;  %v1177_v40 = vrot.slane %v1175_v1, 4  ;;  %v2180_v14 = vunpack.c.l.b16 %v2006_v13  ;;  %v2181_v11 = vunpack.c.l.b16 %v2016_v15 }
  0xf9   : > { %v1326_v45 = vpop.f32.mrf.mxu2  ;;  %4420 = vmatmul.msk.bf16.gmra.mxu1 %vm690_vm3, %v4919_v35  ;;  %v5686_v59 = vadd.f32 %v2270_v24, %v1697_v44  ;;  %v1178_v24 = vrot.slane %v5089_v21, 5  ;;  %v2020_v4 = vrot.slane %v2018_v50, 4  ;;  %v2023_v44 = vrot.slane %v2021_v3, 5  ;;  %v4920_v50 = vld [vmem:[%s5213_s27 + $0x78] sm:$0xff] }
  0xfa   : > { %v1405_v61 = vadd.f32 %v1326_v45, %v975_v53  ;;  %v2029_v27 = vrot.slane %v2027_v20, 5  ;;  %v2203_v37 = vpack.c.b16 %v2181_v11, %v2180_v14  ;;  %v4605_v14 = vld [vmem:[%s5213_s27 + $0x94] sm:$0xf]  ;;  %v5090_v11 = vld [vmem:[%s5213_s27 + $0x88] sm:$0xf] }
  0xfb   : > { %v2024_v0 = vor.u32 %v2023_v44, %v2020_v4  ;;  %v1182_v4 = vrot.slane %v5090_v11, 5  ;;  %v1063_v44 = vld [vmem:[%s5213_s27 + $0x84] sm:$0xe] }
  0xfc   : > { %v2272_v5 = vpop.f32.mrf.mxu0  ;;  %v2034_v3 = vor.u32 %v2033_v36, %v2029_v27 }
  0xfd   : > { %v2025_v21 = vrot.slane %v2024_v0, 4 }
  0xfe   : > { %v1619_v53 = vpop.f32.mrf.mxu3  ;;  %4452 = vmatmul.msk.bf16.gmra.mxu2 %vm690_vm3, %v1257_v51  ;;  %v979_v35 = vpop.f32.mrf.mxu1  ;;  %v4603_v51 = vld [vmem:[%s5213_s27 + $0x8c] sm:$0x1] }
  0xff   : > { %v1698_v26 = vadd.f32 %v1619_v53, %v1405_v61  ;;  %v980_v34 = vadd.f32 %v979_v35, %v5589_v17  ;;  %v1176_v61 = vsel %vm5407_vm7, %v4437_v57, %v1175_v1  ;;  %v1179_v17 = vsel %vm5407_vm7, %v1177_v40, %v1178_v24 }
 0x100   : > { %v2037_v13 = vshll.u32 %v4603_v51, 16  ;;  %v1237_v20 = vunpack.c.l.b16 %v1179_v17  ;;  %v2035_v53 = vrot.slane %v2034_v3, 4  ;;  %v2055_v17 = vshrl.u32 %v4605_v14, 16  ;;  %v4936_v3 = vld [vmem:[%s5213_s27 + $0x84] sm:$0xff] }
 0x101   : > { %v1329_v45 = vpop.f32.mrf.mxu2  ;;  %v5699_v46 = vadd.f32 %v2272_v5, %v1698_v26  ;;  %v4604_v26 = vld [vmem:[%s5213_s27 + $0x90] sm:$0xf] }
 0x102   : > { %v1406_v54 = vadd.f32 %v1329_v45, %v978_v30  ;;  %v1236_v30 = vunpack.c.l.b16 %v1176_v61  ;;  %v2039_v35 = vrot.slane %v2037_v13, 5  ;;  %v2042_v45 = vshrl.u32 %v4604_v26, 16 }
 0x103   : > { %4564 = vmatmul.msk.bf16.gmra.mxu3 %vm690_vm3, %v4935_v29  ;;  %v2045_v51 = vshll.u32 %v4604_v26, 16  ;;  %v2051_v61 = vshll.u32 %v4605_v14, 16  ;;  %v4438_v13 = vrot.slane %v1063_v44, 9 }
 0x104   : > { %v2275_v10 = vpop.f32.mrf.mxu0  ;;  %v1258_v40 = vpack.c.b16 %v1237_v20, %v1236_v30  ;;  %v2044_v20 = vrot.slane %v2042_v45, 4 }
 0x106   : > { %v1622_v15 = vpop.f32.mrf.mxu3  ;;  %v982_v5 = vpop.f32.mrf.mxu1 }
 0x107   : > { %v1699_v32 = vadd.f32 %v1622_v15, %v1406_v54  ;;  %v983_v1 = vadd.f32 %v982_v5, %v5608_v55  ;;  %4628 = vmatmul.msk.bf16.gmra.mxu0 %vm690_vm3, %v2203_v37  ;;  %v2030_v55 = vsel %vm5232_vm4, %v2025_v21, %v2029_v27  ;;  %v2040_v54 = vsel %vm5232_vm4, %v2035_v53, %v2039_v35  ;;  %v5091_v37 = vld [vmem:[%s5213_s27 + $0x8c] sm:$0x1] }
 0x108   : > { %v1185_v0 = vrot.slane %v5091_v37, 5  ;;  %v1184_v15 = vrot.slane %v1182_v4, 4  ;;  %v2182_v5 = vunpack.c.l.b16 %v2030_v55  ;;  %v2183_v30 = vunpack.c.l.b16 %v2040_v54  ;;  %v4921_v55 = vld [vmem:[%s5213_s27 + $0x84] sm:$0xff] }
 0x109   : > { %v1331_v24 = vpop.f32.mrf.mxu2  ;;  %4421 = vmatmul.msk.bf16.gmra.mxu1 %vm690_vm3, %v4920_v50  ;;  %v5712_v29 = vadd.f32 %v2275_v10, %v1699_v32  ;;  %v2047_v21 = vrot.slane %v2045_v51, 5  ;;  %v2057_v53 = vrot.slane %v2055_v17, 4 }
 0x10a   : > { %v1407_v57 = vadd.f32 %v1331_v24, %v980_v34  ;;  %v2053_v24 = vrot.slane %v2051_v61, 5  ;;  %v2204_v14 = vpack.c.b16 %v2183_v30, %v2182_v5  ;;  %v4608_v5 = vld [vmem:[%s5213_s27 + $0xa0] sm:$0xf]  ;;  %v5092_v30 = vld [vmem:[%s5213_s27 + $0x94] sm:$0xf] }
 0x10b   : > { %v2048_v44 = vor.u32 %v2047_v21, %v2044_v20  ;;  %v1189_v20 = vrot.slane %v5092_v30, 5 }
 0x10c   : > { %v2277_v36 = vpop.f32.mrf.mxu0  ;;  %v2058_v45 = vor.u32 %v2057_v53, %v2053_v24 }
 0x10e   : > { %v1624_v34 = vpop.f32.mrf.mxu3  ;;  %4453 = vmatmul.msk.bf16.gmra.mxu2 %vm690_vm3, %v1258_v40  ;;  %v984_v10 = vpop.f32.mrf.mxu1  ;;  %v4606_v40 = vld [vmem:[%s5213_s27 + $0x98] sm:$0x1] }
 0x10f   : > { %v1700_v50 = vadd.f32 %v1624_v34, %v1407_v57  ;;  %v985_v27 = vadd.f32 %v984_v10, %v5626_v16  ;;  %v1183_v57 = vsel %vm5407_vm7, %v4438_v13, %v1182_v4  ;;  %v1186_v16 = vsel %vm5407_vm7, %v1184_v15, %v1185_v0 }
 0x110   : > { %v2061_v54 = vshll.u32 %v4606_v40, 16  ;;  %v1239_v61 = vunpack.c.l.b16 %v1186_v16  ;;  %v2049_v0 = vrot.slane %v2048_v44, 4  ;;  %v2059_v34 = vrot.slane %v2058_v45, 4  ;;  %v4937_v45 = vld [vmem:[%s5213_s27 + $0x90] sm:$0xff] }
 0x111   : > { %v1334_v32 = vpop.f32.mrf.mxu2  ;;  %v5725_v35 = vadd.f32 %v2277_v36, %v1700_v50  ;;  %v4607_v50 = vld [vmem:[%s5213_s27 + $0x9c] sm:$0xf]  ;;  %v2079_v16 = vshrl.u32 %v4608_v5, 16 }
 0x112   : > { %v1408_v26 = vadd.f32 %v1334_v32, %v983_v1  ;;  %v1238_v1 = vunpack.c.l.b16 %v1183_v57  ;;  %v2063_v10 = vrot.slane %v2061_v54, 5  ;;  %v1064_v32 = vld [vmem:[%s5213_s27 + $0x90] sm:$0xe]  ;;  %v2069_v21 = vshll.u32 %v4607_v50, 16 }
 0x113   : > { %4565 = vmatmul.msk.bf16.gmra.mxu3 %vm690_vm3, %v4936_v3  ;;  %v2075_v57 = vshll.u32 %v4608_v5, 16 }
 0x114   : > { %v2280_v11 = vpop.f32.mrf.mxu0  ;;  %v1259_v15 = vpack.c.b16 %v1239_v61, %v1238_v1  ;;  %v2064_v40 = vsel %vm5232_vm4, %v2059_v34, %v2063_v10  ;;  %v2081_v34 = vrot.slane %v2079_v16, 4 }
 0x116   : > { %v1627_v51 = vpop.f32.mrf.mxu3  ;;  %v987_v36 = vpop.f32.mrf.mxu1 }
 0x117   : > { %v1701_v17 = vadd.f32 %v1627_v51, %v1408_v26  ;;  %v988_v4 = vadd.f32 %v987_v36, %v5649_v62  ;;  %4629 = vmatmul.msk.bf16.gmra.mxu0 %vm690_vm3, %v2204_v14  ;;  %v2066_v62 = vshrl.u32 %v4607_v50, 16  ;;  %v2054_v26 = vsel %vm5232_vm4, %v2049_v0, %v2053_v24  ;;  %v5093_v14 = vld [vmem:[%s5213_s27 + $0x98] sm:$0x1] }
 0x118   : > { %v4439_v51 = vrot.slane %v1064_v32, 9  ;;  %v1191_v36 = vrot.slane %v1189_v20, 4  ;;  %v2184_v1 = vunpack.c.l.b16 %v2054_v26  ;;  %v2185_v24 = vunpack.c.l.b16 %v2064_v40 }
 0x119   : > { %v1336_v37 = vpop.f32.mrf.mxu2  ;;  %4422 = vmatmul.msk.bf16.gmra.mxu1 %vm690_vm3, %v4921_v55  ;;  %v5738_v3 = vadd.f32 %v2280_v11, %v1701_v17  ;;  %v1192_v11 = vrot.slane %v5093_v14, 5  ;;  %v2068_v61 = vrot.slane %v2066_v62, 4  ;;  %v2071_v17 = vrot.slane %v2069_v21, 5  ;;  %v4922_v62 = vld [vmem:[%s5213_s27 + $0x90] sm:$0xff] }
 0x11a   : > { %v1409_v13 = vadd.f32 %v1336_v37, %v985_v27  ;;  %v2077_v0 = vrot.slane %v2075_v57, 5  ;;  %v2205_v5 = vpack.c.b16 %v2185_v24, %v2184_v1  ;;  %v4611_v24 = vld [vmem:[%s5213_s27 + $0xac] sm:$0xf] }
 0x11b   : > { %v2072_v30 = vor.u32 %v2071_v17, %v2068_v61  ;;  %v1065_v61 = vld [vmem:[%s5213_s27 + $0x9c] sm:$0xe] }
 0x11c   : > { %v2282_v53 = vpop.f32.mrf.mxu0  ;;  %v2082_v21 = vor.u32 %v2081_v34, %v2077_v0 }
 0x11e   : > { %v1629_v27 = vpop.f32.mrf.mxu3  ;;  %4454 = vmatmul.msk.bf16.gmra.mxu2 %vm690_vm3, %v1259_v15  ;;  %v989_v55 = vpop.f32.mrf.mxu1  ;;  %v4609_v15 = vld [vmem:[%s5213_s27 + $0xa4] sm:$0x1] }
 0x11f   : > { %v1702_v44 = vadd.f32 %v1629_v27, %v1409_v13  ;;  %v990_v54 = vadd.f32 %v989_v55, %v5667_v41  ;;  %v1190_v13 = vsel %vm5407_vm7, %v4439_v51, %v1189_v20  ;;  %v1193_v41 = vsel %vm5407_vm7, %v1191_v36, %v1192_v11  ;;  %v4610_v55 = vld [vmem:[%s5213_s27 + $0xa8] sm:$0xf]  ;;  %v5094_v36 = vld [vmem:[%s5213_s27 + $0xa0] sm:$0xf] }
 0x120   : > { %v2085_v26 = vshll.u32 %v4609_v15, 16  ;;  %v1241_v57 = vunpack.c.l.b16 %v1193_v41  ;;  %v2073_v20 = vrot.slane %v2072_v30, 4  ;;  %v2083_v11 = vrot.slane %v2082_v21, 4 }
 0x121   : > { %v1339_v37 = vpop.f32.mrf.mxu2  ;;  %v5751_v10 = vadd.f32 %v2282_v53, %v1702_v44  ;;  %v1196_v1 = vrot.slane %v5094_v36, 5  ;;  %v2093_v34 = vshll.u32 %v4610_v55, 16  ;;  %v2103_v41 = vshrl.u32 %v4611_v24, 16 }
 0x122   : > { %v1410_v50 = vadd.f32 %v1339_v37, %v988_v4  ;;  %v1240_v4 = vunpack.c.l.b16 %v1190_v13  ;;  %v2087_v27 = vrot.slane %v2085_v26, 5  ;;  %v2078_v17 = vsel %vm5232_vm4, %v2073_v20, %v2077_v0 }
 0x123   : > { %4566 = vmatmul.msk.bf16.gmra.mxu3 %vm690_vm3, %v4937_v45  ;;  %v2090_v37 = vshrl.u32 %v4610_v55, 16  ;;  %v2099_v13 = vshll.u32 %v4611_v24, 16  ;;  %v1198_v21 = vrot.slane %v1196_v1, 4  ;;  %v2186_v0 = vunpack.c.l.b16 %v2078_v17  ;;  %v4612_v24 = vld [vmem:[%s5213_s27 + $0xb0] sm:$0x1]  ;;  %v4923_v17 = vld [vmem:[%s5213_s27 + $0x9c] sm:$0xff] }
 0x124   : > { %v2285_v32 = vpop.f32.mrf.mxu0  ;;  %v1260_v51 = vpack.c.b16 %v1241_v57, %v1240_v4  ;;  %v2088_v15 = vsel %vm5232_vm4, %v2083_v11, %v2087_v27  ;;  %v2095_v20 = vrot.slane %v2093_v34, 5  ;;  %v2105_v27 = vrot.slane %v2103_v41, 4 }
 0x125   : > { %v2187_v57 = vunpack.c.l.b16 %v2088_v15  ;;  %v2101_v11 = vrot.slane %v2099_v13, 5  ;;  %v2109_v15 = vshll.u32 %v4612_v24, 16 }
 0x126   : > { %v1632_v53 = vpop.f32.mrf.mxu3  ;;  %v992_v40 = vpop.f32.mrf.mxu1 }
 0x127   : > { %v1703_v16 = vadd.f32 %v1632_v53, %v1410_v50  ;;  %4630 = vmatmul.msk.bf16.gmra.mxu0 %vm690_vm3, %v2205_v5  ;;  %v5095_v5 = vld [vmem:[%s5213_s27 + $0xa4] sm:$0x1]  ;;  %v4938_v53 = vld [vmem:[%s5213_s27 + $0x9c] sm:$0xff]  ;;  %v993_v4 = vadd.f32 %v992_v40, %v5502_v19  ;;  %v2206_v19 = vpack.c.b16 %v2187_v57, %v2186_v0  ;;  %v2111_v0 = vrot.slane %v2109_v15, 5 }
 0x128   : > { %v1199_v30 = vrot.slane %v5095_v5, 5 }
 0x129   : > { %v1341_v14 = vpop.f32.mrf.mxu2  ;;  %4423 = vmatmul.msk.bf16.gmra.mxu1 %vm690_vm3, %v4922_v62  ;;  %v5763_v44 = vadd.f32 %v2285_v32, %v1703_v16  ;;  %v4440_v62 = vrot.slane %v1065_v61, 9  ;;  %v2092_v16 = vrot.slane %v2090_v37, 4 }
 0x12a   : > { %v1411_v45 = vadd.f32 %v1341_v14, %v990_v54 }
 0x12b   : > { %v2096_v40 = vor.u32 %v2095_v20, %v2092_v16 }
 0x12c   : > { %v2287_v50 = vpop.f32.mrf.mxu0 }
 0x12e   : > { %v1634_v54 = vpop.f32.mrf.mxu3  ;;  %4455 = vmatmul.msk.bf16.gmra.mxu2 %vm690_vm3, %v1260_v51  ;;  %v994_v32 = vpop.f32.mrf.mxu1  ;;  %v1197_v51 = vsel %vm5407_vm7, %v4440_v62, %v1196_v1  ;;  %v4613_v1 = vld [vmem:[%s5213_s27 + $0xb4] sm:$0xf]  ;;  %v2097_v62 = vrot.slane %v2096_v40, 4 }
 0x12f   : > { %v1704_v26 = vadd.f32 %v1634_v54, %v1411_v45  ;;  %v1200_v45 = vsel %vm5407_vm7, %v1198_v21, %v1199_v30  ;;  %v1242_v37 = vunpack.c.l.b16 %v1197_v51  ;;  %v4614_v54 = vld [vmem:[%s5213_s27 + $0xb8] sm:$0xf]  ;;  %v995_v30 = vadd.f32 %v994_v32, %v5520_v49 }
 0x130   : > { %v1243_v34 = vunpack.c.l.b16 %v1200_v45  ;;  %v2114_v16 = vshrl.u32 %v4613_v1, 16  ;;  %v2117_v20 = vshll.u32 %v4613_v1, 16  ;;  %v2127_v51 = vshrl.u32 %v4614_v54, 16  ;;  %v1066_v45 = vld [vmem:[%s5213_s27 + $0xa8] sm:$0xe] }
 0x131   : > { %v1344_v14 = vpop.f32.mrf.mxu2  ;;  %v5776_v55 = vadd.f32 %v2287_v50, %v1704_v26  ;;  %v2106_v50 = vor.u32 %v2105_v27, %v2101_v11  ;;  %v5096_v27 = vld [vmem:[%s5213_s27 + $0xac] sm:$0xf]  ;;  %v2102_v32 = vsel %vm5232_vm4, %v2097_v62, %v2101_v11 }
 0x132   : > { %v1412_v36 = vadd.f32 %v1344_v14, %v993_v4  ;;  %v1261_v26 = vpack.c.b16 %v1243_v34, %v1242_v37  ;;  %v2123_v14 = vshll.u32 %v4614_v54, 16  ;;  %v2116_v37 = vrot.slane %v2114_v16, 4 }
 0x133   : > { %4567 = vmatmul.msk.bf16.gmra.mxu3 %vm690_vm3, %v4938_v53  ;;  %v2107_v53 = vrot.slane %v2106_v50, 4  ;;  %v2119_v34 = vrot.slane %v2117_v20, 5  ;;  %v2129_v54 = vrot.slane %v2127_v51, 4  ;;  %v4924_v51 = vld [vmem:[%s5213_s27 + $0xa8] sm:$0xff] }
 0x134   : > { %v2290_v61 = vpop.f32.mrf.mxu0  ;;  %v2125_v50 = vrot.slane %v2123_v14, 5 }
 0x135   : > { %v2112_v24 = vsel %vm5232_vm4, %v2107_v53, %v2111_v0 }
 0x136   : > { %v1637_v13 = vpop.f32.mrf.mxu3  ;;  %v997_v41 = vpop.f32.mrf.mxu1  ;;  %v2189_v62 = vunpack.c.l.b16 %v2112_v24  ;;  %v2130_v20 = vor.u32 %v2129_v54, %v2125_v50 }
 0x137   : > { %v1705_v5 = vadd.f32 %v1637_v13, %v1412_v36  ;;  %4631 = vmatmul.msk.bf16.gmra.mxu0 %vm690_vm3, %v2206_v19  ;;  %v1203_v36 = vrot.slane %v5096_v27, 5  ;;  %v5097_v19 = vld [vmem:[%s5213_s27 + $0xb0] sm:$0x1]  ;;  %v4939_v13 = vld [vmem:[%s5213_s27 + $0xa8] sm:$0xff]  ;;  %v998_v11 = vadd.f32 %v997_v41, %v5541_v28 }
 0x138   : > { %v1206_v40 = vrot.slane %v5097_v19, 5 }
 0x139   : > { %v1346_v21 = vpop.f32.mrf.mxu2  ;;  %4424 = vmatmul.msk.bf16.gmra.mxu1 %vm690_vm3, %v4923_v17  ;;  %v5790_v4 = vadd.f32 %v2290_v61, %v1705_v5  ;;  %v4441_v5 = vrot.slane %v1066_v45, 9  ;;  %v1205_v1 = vrot.slane %v1203_v36, 4 }
 0x13a   : > { %v1413_v57 = vadd.f32 %v1346_v21, %v995_v30  ;;  %v2188_v30 = vunpack.c.l.b16 %v2102_v32  ;;  %v4615_v21 = vld [vmem:[%s5213_s27 + $0xbc] sm:$0x1] }
 0x13b   : > { %v1207_v16 = vsel %vm5407_vm7, %v1205_v1, %v1206_v40  ;;  %v2133_v28 = vshll.u32 %v4615_v21, 16  ;;  %v4617_v1 = vld [vmem:[%s5213_s27 + $0xc4] sm:$0xf] }
 0x13c   : > { %v2292_v49 = vpop.f32.mrf.mxu0  ;;  %v2207_v41 = vpack.c.b16 %v2189_v62, %v2188_v30  ;;  %v1245_v24 = vunpack.c.l.b16 %v1207_v16  ;;  %v1067_v30 = vld [vmem:[%s5213_s27 + $0xb4] sm:$0xe]  ;;  %v5099_v62 = vld [vmem:[%s5213_s27 + $0xb8] sm:$0xf]  ;;  %v2151_v16 = vshrl.u32 %v4617_v1, 16 }
 0x13d   : > { %v1210_v21 = vrot.slane %v5099_v62, 5 }
 0x13e   : > { %v1639_v61 = vpop.f32.mrf.mxu3  ;;  %4456 = vmatmul.msk.bf16.gmra.mxu2 %vm690_vm3, %v1261_v26  ;;  %v999_v17 = vpop.f32.mrf.mxu1  ;;  %v2120_v26 = vor.u32 %v2119_v34, %v2116_v37  ;;  %v2135_v37 = vrot.slane %v2133_v28, 5  ;;  %v4616_v34 = vld [vmem:[%s5213_s27 + $0xc0] sm:$0xf]  ;;  %v5100_v28 = vld [vmem:[%s5213_s27 + $0x14] sm:$0x1] }
 0x13f   : > { %v1706_v15 = vadd.f32 %v1639_v61, %v1413_v57  ;;  %v1204_v57 = vsel %vm5407_vm7, %v4441_v5, %v1203_v36  ;;  %v2131_v36 = vrot.slane %v2130_v20, 4  ;;  %v1000_v40 = vadd.f32 %v999_v17, %v5555_v33 }
 0x140   : > { %v1244_v32 = vunpack.c.l.b16 %v1204_v57  ;;  %v2121_v61 = vrot.slane %v2120_v26, 4  ;;  %v2138_v17 = vshrl.u32 %v4616_v34, 16  ;;  %v2141_v26 = vshll.u32 %v4616_v34, 16  ;;  %v4940_v34 = vld [vmem:[%s5213_s27 + $0xb4] sm:$0xff] }
 0x141   : > { %v1349_v53 = vpop.f32.mrf.mxu2  ;;  %v5803_v0 = vadd.f32 %v2292_v49, %v1706_v15  ;;  %v5098_v15 = vld [vmem:[%s5213_s27 + $0x10] sm:$0xf]  ;;  %v2136_v33 = vsel %vm5232_vm4, %v2131_v36, %v2135_v37  ;;  %v2147_v57 = vshll.u32 %v4617_v1, 16  ;;  %v1212_v36 = vrot.slane %v1210_v21, 4  ;;  %v4635_v37 = vld [vmem:[%s5213_s27 + $0xc] sm:$0xe] }
 0x142   : > { %v1414_v27 = vadd.f32 %v1349_v53, %v998_v11  ;;  %v1262_v11 = vpack.c.b16 %v1245_v24, %v1244_v32  ;;  %v5101_v32 = vld [vmem:[%s5213_s27 + $0xbc] sm:$0x1]  ;;  %v4651_v1 = vrot.slane %v4635_v37, 9 }
 0x143   : > { %4568 = vmatmul.msk.bf16.gmra.mxu3 %vm690_vm3, %v4939_v13  ;;  %v2448_v13 = vrot.slane %v5098_v15, 5  ;;  %v2140_v15 = vrot.slane %v2138_v17, 4 }
 0x144   : > { %v2295_v14 = vpop.f32.mrf.mxu0 }
 0x145   : > { %v2450_v20 = vrot.slane %v2448_v13, 4 }
 0x146   : > { %v1642_v45 = vpop.f32.mrf.mxu3  ;;  %v1002_v49 = vpop.f32.mrf.mxu1 }
 0x147   : > { %v1707_v19 = vadd.f32 %v1642_v45, %v1414_v27  ;;  %4632 = vmatmul.msk.bf16.gmra.mxu0 %vm690_vm3, %v2207_v41  ;;  %v2126_v27 = vsel %vm5232_vm4, %v2121_v61, %v2125_v50  ;;  %v2451_v41 = vrot.slane %v5100_v28, 5  ;;  %v4442_v45 = vrot.slane %v1067_v30, 9 }
 0x148   : > { %v2190_v50 = vunpack.c.l.b16 %v2126_v27  ;;  %v1003_v62 = vadd.f32 %v1002_v49, %v5575_v52  ;;  %v2149_v30 = vrot.slane %v2147_v57, 5  ;;  %v2153_v28 = vrot.slane %v2151_v16, 4  ;;  %v4618_v27 = vld [vmem:[%s5213_s27 + $0xc8] sm:$0x1]  ;;  %v4795_v57 = vld [vmem:[%s5213_s27 + $0x18] sm:$0xf] }
 0x149   : > { %v1351_v5 = vpop.f32.mrf.mxu2  ;;  %4425 = vmatmul.msk.bf16.gmra.mxu1 %vm690_vm3, %v4924_v51  ;;  %v5819_v53 = vadd.f32 %v2295_v14, %v1707_v19  ;;  %v1213_v14 = vrot.slane %v5101_v32, 5  ;;  %v2191_v19 = vunpack.c.l.b16 %v2136_v33  ;;  %v2449_v33 = vsel %vm5407_vm7, %v4651_v1, %v2448_v13 }
 0x14a   : > { %v1415_v54 = vadd.f32 %v1351_v5, %v1000_v40  ;;  %v2143_v5 = vrot.slane %v2141_v26, 5  ;;  %v2559_v52 = vunpack.c.l.b16 %v2449_v33  ;;  %v2157_v37 = vshll.u32 %v4618_v27, 16 }
 0x14b   : > { %v1214_v26 = vsel %vm5407_vm7, %v1212_v36, %v1213_v14  ;;  %v2208_v16 = vpack.c.b16 %v2191_v19, %v2190_v50  ;;  %v3121_v14 = vshrl.u32 %v4795_v57, 16  ;;  %v3124_v36 = vshll.u32 %v4795_v57, 16 }
 0x14c   : > { %v2297_v51 = vpop.f32.mrf.mxu0 }
 0x14d   : > { %v3123_v27 = vrot.slane %v3121_v14, 4 }
 0x14e   : > { %v1644_v24 = vpop.f32.mrf.mxu3  ;;  %4457 = vmatmul.msk.bf16.gmra.mxu2 %vm690_vm3, %v1262_v11  ;;  %v1004_v61 = vpop.f32.mrf.mxu1  ;;  %v1211_v11 = vsel %vm5407_vm7, %v4442_v45, %v1210_v21  ;;  %v5843_v21 = vld [vmem:[%s5213_s27 + $0x1c] sm:$0xf]  ;;  %v2154_v45 = vor.u32 %v2153_v28, %v2149_v30 }
 0x14f   : > { %v1708_v40 = vadd.f32 %v1644_v24, %v1415_v54  ;;  %v2452_v54 = vsel %vm5407_vm7, %v2450_v20, %v2451_v41  ;;  %v2144_v24 = vor.u32 %v2143_v5, %v2140_v15  ;;  %v4925_v41 = vld [vmem:[%s5213_s27 + $0xb4] sm:$0xff]  ;;  %v3134_v50 = vshrl.u32 %v5843_v21, 16 }
 0x150   : > { %v2560_v49 = vunpack.c.l.b16 %v2452_v54  ;;  %v1005_v15 = vadd.f32 %v1004_v61, %v5595_v31 }
 0x151   : > { %v1354_v32 = vpop.f32.mrf.mxu2  ;;  %v5847_v1 = vadd.f32 %v2297_v51, %v1708_v40  ;;  %v2145_v51 = vrot.slane %v2144_v24, 4  ;;  %v2155_v40 = vrot.slane %v2154_v45, 4  ;;  %v3136_v57 = vrot.slane %v3134_v50, 4 }
 0x152   : > { %v1416_v17 = vadd.f32 %v1354_v32, %v1003_v62  ;;  %v5845_v13 = vpack.c.b16 %v2560_v49, %v2559_v52  ;;  %v1246_v62 = vunpack.c.l.b16 %v1211_v11  ;;  %v1247_v32 = vunpack.c.l.b16 %v1214_v26 }
 0x153   : > { %4569 = vmatmul.msk.bf16.gmra.mxu3 %vm690_vm3, %v4940_v34  ;;  %6586 = vst [vmem:[#allocation2_spill] sm:$0xff] %v5847_v1  ;;  %v3130_v34 = vshll.u32 %v5843_v21, 16  ;;  %v2159_v11 = vrot.slane %v2157_v37, 5  ;;  %v3126_v26 = vrot.slane %v3124_v36, 5  ;;  %v2150_v31 = vsel %vm5232_vm4, %v2145_v51, %v2149_v30  ;;  %v4859_v51 = vld [vmem:[%s5213_s27 + $0x18] sm:$0xe] }
 0x154   : > { %v2300_v20 = vpop.f32.mrf.mxu0  ;;  %v1263_v28 = vpack.c.b16 %v1247_v32, %v1246_v62  ;;  %v4941_v32 = vld [vmem:[%s5213_s27 + $0xc0] sm:$0xff]  ;;  %v2192_v30 = vunpack.c.l.b16 %v2150_v31 }
 0x155   : > { %v3132_v49 = vrot.slane %v3130_v34, 5  ;;  %v2160_v61 = vsel %vm5232_vm4, %v2155_v40, %v2159_v11  ;;  %v3127_v37 = vor.u32 %v3126_v26, %v3123_v27  ;;  %v4798_v40 = vld [vmem:[%s5213_s27 + $0x24] sm:$0xf]  ;;  %v5873_v11 = vld [vmem:[%s5213_s27 + $0x28] sm:$0xf] }
 0x156   : > { %v1647_v33 = vpop.f32.mrf.mxu3  ;;  %v1007_v54 = vpop.f32.mrf.mxu1  ;;  %v2193_v36 = vunpack.c.l.b16 %v2160_v61 }
 0x157   : > { %v1709_v19 = vadd.f32 %v1647_v33, %v1416_v17  ;;  %4633 = vmatmul.msk.bf16.gmra.mxu0 %vm690_vm3, %v2208_v16  ;;  %v5858_v17 = vld [vmem:[%s5213_s27 + $0x20] sm:$0x1]  ;;  %v1008_v14 = vadd.f32 %v1007_v54, %v5618_v2  ;;  %v3128_v50 = vrot.slane %v3127_v37, 4  ;;  %v5102_v54 = vld [vmem:[%s5213_s27 + $0x1c] sm:$0xf] }
 0x158   : > { %v2455_v26 = vrot.slane %v5102_v54, 5  ;;  %v4636_v37 = vld [vmem:[%s5213_s27 + $0x18] sm:$0xe] }
 0x159   : > { %v1356_v5 = vpop.f32.mrf.mxu2  ;;  %4426 = vmatmul.msk.bf16.gmra.mxu1 %vm690_vm3, %v4925_v41  ;;  %v5855_v1 = vadd.f32 %v2300_v20, %v1709_v19  ;;  %v3137_v41 = vor.u32 %v3136_v57, %v3132_v49  ;;  %v3140_v20 = vshll.u32 %v5858_v17, 16  ;;  %v3133_v31 = vsel %vm5232_vm4, %v3128_v50, %v3132_v49 }
 0x15a   : > { %v1417_v52 = vadd.f32 %v1356_v5, %v1005_v15  ;;  %v2209_v5 = vpack.c.b16 %v2193_v36, %v2192_v30  ;;  %v3798_v49 = vrot.slane %v5858_v17, 5  ;;  %v5103_v30 = vld [vmem:[%s5213_s27 + $0x20] sm:$0x1]  ;;  %v4652_v50 = vrot.slane %v4636_v37, 9 }
 0x15b   : > { %v3138_v19 = vrot.slane %v3137_v41, 4  ;;  %v3142_v15 = vrot.slane %v3140_v20, 5  ;;  %v3145_v41 = vshrl.u32 %v4798_v40, 16  ;;  %v3148_v20 = vshll.u32 %v4798_v40, 16 }
 0x15c   : > { %v2302_v16 = vpop.f32.mrf.mxu0  ;;  %v2458_v36 = vrot.slane %v5103_v30, 5  ;;  %v2456_v37 = vsel %vm5407_vm7, %v4652_v50, %v2455_v26  ;;  %v4801_v50 = vld [vmem:[%s5213_s27 + $0x30] sm:$0xf] }
 0x15d   : > { %v3143_v61 = vsel %vm5232_vm4, %v3138_v19, %v3142_v15  ;;  %v2457_v19 = vrot.slane %v2455_v26, 4  ;;  %v3150_v17 = vrot.slane %v3148_v20, 5 }
 0x15e   : > { %v1649_v24 = vpop.f32.mrf.mxu3  ;;  %4458 = vmatmul.msk.bf16.gmra.mxu2 %vm690_vm3, %v1263_v28  ;;  %v1009_v45 = vpop.f32.mrf.mxu1  ;;  %v3795_v28 = vrot.slane %v5843_v21, 5  ;;  %v3506_v40 = vunpack.c.l.b16 %v3143_v61 }
 0x15f   : > { %v1710_v62 = vadd.f32 %v1649_v24, %v1417_v52  ;;  %v4875_v24 = vrot.slane %v4859_v51, 9  ;;  %v4942_v51 = vld [vmem:[%s5213_s27 + $0x18] sm:$0xff]  ;;  %v2459_v61 = vsel %vm5407_vm7, %v2457_v19, %v2458_v36  ;;  %v5913_v19 = vld [vmem:[%s5213_s27 + $0x34] sm:$0xf] }
 0x161   : > { %v1359_v33 = vpop.f32.mrf.mxu2  ;;  %v5875_v27 = vadd.f32 %v2302_v16, %v1710_v62  ;;  %v3154_v16 = vshll.u32 %v5873_v11, 16  ;;  %v3158_v62 = vshrl.u32 %v5873_v11, 16 }
 0x162   : > { %v1418_v34 = vadd.f32 %v1359_v33, %v1008_v14  ;;  %v3797_v14 = vrot.slane %v3795_v28, 4 }
 0x163   : > { %4570 = vmatmul.msk.bf16.gmra.mxu3 %vm690_vm3, %v4941_v32  ;;  %v1010_v32 = vadd.f32 %v1009_v45, %v5638_v43  ;;  %v3147_v45 = vrot.slane %v3145_v41, 4  ;;  %v5896_v54 = vrot.slane %v3154_v16, 5 }
 0x164   : > { %v2305_v2 = vpop.f32.mrf.mxu0 }
 0x165   : > { %v3151_v16 = vor.u32 %v3150_v17, %v3147_v45  ;;  %v4860_v45 = vld [vmem:[%s5213_s27 + $0x24] sm:$0xe] }
 0x166   : > { %v1652_v52 = vpop.f32.mrf.mxu3  ;;  %v1012_v57 = vpop.f32.mrf.mxu1 }
 0x167   : > { %v1711_v21 = vadd.f32 %v1652_v52, %v1418_v34  ;;  %4634 = vmatmul.msk.bf16.gmra.mxu0 %vm690_vm3, %v2209_v5  ;;  %v3505_v34 = vunpack.c.l.b16 %v3133_v31  ;;  %v3796_v5 = vsel %vm5407_vm7, %v4875_v24, %v3795_v28  ;;  %v3160_v52 = vrot.slane %v3158_v62, 4 }
 0x168   : > { %v3906_v24 = vunpack.c.l.b16 %v3796_v5  ;;  %v1013_v26 = vadd.f32 %v1012_v57, %v5518_v48  ;;  %v3802_v48 = vrot.slane %v5873_v11, 5 }
 0x169   : > { %v1361_v33 = vpop.f32.mrf.mxu2  ;;  %4667 = vmatmul.msk.bf16.vlgmr.msra.gmra.mxu1 %vm690_vm3, %v5845_v13  ;;  %v5894_v43 = vadd.f32 %v2305_v2, %v1711_v21  ;;  %v3799_v13 = vsel %vm5407_vm7, %v3797_v14, %v3798_v49  ;;  %v3537_v2 = vpack.c.b16 %v3506_v40, %v3505_v34  ;;  %v3161_v62 = vor.u32 %v3160_v52, %v5896_v54 }
 0x16a   : > { %v1419_v15 = vadd.f32 %v1361_v33, %v1010_v32  ;;  %v5905_v32 = vld [vmem:[%s5213_s27 + $0x2c] sm:$0x1]  ;;  %v3907_v20 = vunpack.c.l.b16 %v3799_v13  ;;  %v2561_v14 = vunpack.c.l.b16 %v2456_v37  ;;  %v2562_v49 = vunpack.c.l.b16 %v2459_v61 }
 0x16b   : > { %v3164_v30 = vshll.u32 %v5905_v32, 16  ;;  %v3169_v52 = vshrl.u32 %v4801_v50, 16  ;;  %v3172_v13 = vshll.u32 %v4801_v50, 16  ;;  %v3178_v37 = vshll.u32 %v5913_v19, 16 }
 0x16c   : > { %v2307_v31 = vpop.f32.mrf.mxu0  ;;  %v3938_v34 = vpack.c.b16 %v3907_v20, %v3906_v24  ;;  %v2592_v40 = vpack.c.b16 %v2562_v49, %v2561_v14  ;;  %v3182_v61 = vshrl.u32 %v5913_v19, 16  ;;  %v5104_v24 = vld [vmem:[%s5213_s27 + $0x28] sm:$0xf]  ;;  %v4876_v14 = vrot.slane %v4860_v45, 9 }
 0x16d   : > { %v3166_v5 = vrot.slane %v3164_v30, 5  ;;  %v2462_v20 = vrot.slane %v5104_v24, 5  ;;  %v3805_v11 = vrot.slane %v5905_v32, 5  ;;  %v3174_v45 = vrot.slane %v3172_v13, 5  ;;  %v4943_v24 = vld [vmem:[%s5213_s27 + $0x24] sm:$0xff] }
 0x16e   : > { %v1654_v28 = vpop.f32.mrf.mxu3  ;;  %4779 = vmatmul.msk.bf16.vlgmr.msra.gmra.mxu2 %vm690_vm3, %v4942_v51  ;;  %v1014_v41 = vpop.f32.mrf.mxu1  ;;  %v3162_v51 = vrot.slane %v3161_v62, 4  ;;  %v5934_v32 = vrot.slane %v3178_v37, 5 }
 0x16f   : > { %v1712_v21 = vadd.f32 %v1654_v28, %v1419_v15  ;;  %v3152_v15 = vrot.slane %v3151_v16, 4  ;;  %v5105_v16 = vld [vmem:[%s5213_s27 + $0x2c] sm:$0x1] }
 0x170   : > { %v2465_v62 = vrot.slane %v5105_v16, 5  ;;  %v3167_v30 = vsel %vm5232_vm4, %v3162_v51, %v3166_v5  ;;  %v3803_v5 = vsel %vm5407_vm7, %v4876_v14, %v3802_v48 }
 0x171   : > { %v1364_v36 = vpop.f32.mrf.mxu2  ;;  %v5918_v57 = vadd.f32 %v2307_v31, %v1712_v21  ;;  %v4637_v31 = vld [vmem:[%s5213_s27 + $0x24] sm:$0xe]  ;;  %v1015_v21 = vadd.f32 %v1014_v41, %v5539_v12  ;;  %v3157_v49 = vsel %vm5232_vm4, %v3152_v15, %v5896_v54  ;;  %v2464_v41 = vrot.slane %v2462_v20, 4 }
 0x172   : > { %v1420_v33 = vadd.f32 %v1364_v36, %v1013_v26  ;;  %v3804_v36 = vrot.slane %v3802_v48, 4  ;;  %v4653_v12 = vrot.slane %v4637_v31, 9  ;;  %v3507_v54 = vunpack.c.l.b16 %v3157_v49 }
 0x173   : > { %4843 = vmatmul.msk.bf16.vlgmr.msra.gmra.mxu3 %vm690_vm3, %v3537_v2  ;;  %6587 = vst [vmem:[#allocation3_spill] sm:$0xff] %v5918_v57  ;;  %v3508_v15 = vunpack.c.l.b16 %v3167_v30  ;;  %v5940_v57 = vld [vmem:[%s5213_s27 + $0x38] sm:$0x1] }
 0x174   : > { %v2310_v17 = vpop.f32.mrf.mxu0  ;;  %v3188_v48 = vshll.u32 %v5940_v57, 16 }
 0x175   : > { %v3538_v31 = vpack.c.b16 %v3508_v15, %v3507_v54  ;;  %v5106_v15 = vld [vmem:[%s5213_s27 + $0x34] sm:$0xf] }
 0x176   : > { %v1657_v28 = vpop.f32.mrf.mxu3  ;;  %v1017_v2 = vpop.f32.mrf.mxu1 }
 0x177   : > { %v1713_v26 = vadd.f32 %v1657_v28, %v1420_v33  ;;  %4891 = vmatmul.msk.bf16.vlgmr.msra.gmra.mxu0 %vm690_vm3, %v3938_v34  ;;  %v3171_v33 = vrot.slane %v3169_v52, 4  ;;  %v3184_v28 = vrot.slane %v3182_v61, 4  ;;  %v2466_v61 = vsel %vm5407_vm7, %v2464_v41, %v2465_v62  ;;  %v5959_v41 = vld [vmem:[%s5213_s27 + $0x40] sm:$0xf] }
 0x179   : > { %v1366_v50 = vpop.f32.mrf.mxu2  ;;  %4668 = vmatmul.msk.bf16.gmra.mxu1 %vm690_vm3, %v2592_v40  ;;  %v5937_v16 = vadd.f32 %v2310_v17, %v1713_v26  ;;  %v3806_v40 = vsel %vm5407_vm7, %v3804_v36, %v3805_v11  ;;  %v3175_v52 = vor.u32 %v3174_v45, %v3171_v33  ;;  %v2463_v17 = vsel %vm5407_vm7, %v4653_v12, %v2462_v20 }
 0x17a   : > { %v1421_v34 = vadd.f32 %v1366_v50, %v1015_v21  ;;  %v3185_v26 = vor.u32 %v3184_v28, %v5934_v32  ;;  %v1018_v11 = vadd.f32 %v1017_v2, %v5558_v39  ;;  %v3908_v21 = vunpack.c.l.b16 %v3803_v5  ;;  %v4861_v28 = vld [vmem:[%s5213_s27 + $0x30] sm:$0xe] }
 0x17b   : > { %v3909_v49 = vunpack.c.l.b16 %v3806_v40  ;;  %v2563_v36 = vunpack.c.l.b16 %v2463_v17  ;;  %v2564_v20 = vunpack.c.l.b16 %v2466_v61  ;;  %v3176_v33 = vrot.slane %v3175_v52, 4 }
 0x17c   : > { %v2312_v51 = vpop.f32.mrf.mxu0  ;;  %v3186_v62 = vrot.slane %v3185_v26, 4  ;;  %v3190_v45 = vrot.slane %v3188_v48, 5  ;;  %v3809_v12 = vrot.slane %v5913_v19, 5  ;;  %v2469_v5 = vrot.slane %v5106_v15, 5  ;;  %v4638_v19 = vld [vmem:[%s5213_s27 + $0x30] sm:$0xe] }
 0x17d   : > { %v2593_v54 = vpack.c.b16 %v2564_v20, %v2563_v36  ;;  %v4877_v61 = vrot.slane %v4861_v28, 9 }
 0x17e   : > { %v1659_v13 = vpop.f32.mrf.mxu3  ;;  %4780 = vmatmul.msk.bf16.gmra.mxu2 %vm690_vm3, %v4943_v24  ;;  %v1019_v37 = vpop.f32.mrf.mxu1  ;;  %v4804_v24 = vld [vmem:[%s5213_s27 + $0x3c] sm:$0xf]  ;;  %v3191_v17 = vsel %vm5232_vm4, %v3186_v62, %v3190_v45  ;;  %v4944_v45 = vld [vmem:[%s5213_s27 + $0x30] sm:$0xff] }
 0x17f   : > { %v1714_v14 = vadd.f32 %v1659_v13, %v1421_v34  ;;  %v3939_v34 = vpack.c.b16 %v3909_v49, %v3908_v21  ;;  %v3181_v13 = vsel %vm5232_vm4, %v3176_v33, %v5934_v32  ;;  %v3193_v26 = vshrl.u32 %v4804_v24, 16  ;;  %v5107_v49 = vld [vmem:[%s5213_s27 + $0x38] sm:$0x1] }
 0x180   : > { %v3811_v21 = vrot.slane %v3809_v12, 4  ;;  %v3812_v32 = vrot.slane %v5940_v57, 5  ;;  %v3509_v20 = vunpack.c.l.b16 %v3181_v13  ;;  %v2471_v33 = vrot.slane %v2469_v5, 4 }
 0x181   : > { %v1369_v30 = vpop.f32.mrf.mxu2  ;;  %v5961_v39 = vadd.f32 %v2312_v51, %v1714_v14  ;;  %v3196_v51 = vshll.u32 %v4804_v24, 16  ;;  %v3202_v14 = vshll.u32 %v5959_v41, 16  ;;  %v3510_v28 = vunpack.c.l.b16 %v3191_v17 }
 0x182   : > { %v1422_v50 = vadd.f32 %v1369_v30, %v1018_v11  ;;  %v1020_v11 = vadd.f32 %v1019_v37, %v5583_v6  ;;  %v2472_v30 = vrot.slane %v5107_v49, 5  ;;  %v3810_v24 = vsel %vm5407_vm7, %v4877_v61, %v3809_v12 }
 0x183   : > { %4844 = vmatmul.msk.bf16.gmra.mxu3 %vm690_vm3, %v3538_v31  ;;  %v3206_v31 = vshrl.u32 %v5959_v41, 16  ;;  %v3195_v6 = vrot.slane %v3193_v26, 4  ;;  %v3198_v37 = vrot.slane %v3196_v51, 5  ;;  %v5982_v57 = vrot.slane %v3202_v14, 5 }
 0x184   : > { %v2315_v2 = vpop.f32.mrf.mxu0  ;;  %v2473_v17 = vsel %vm5407_vm7, %v2471_v33, %v2472_v30  ;;  %v3910_v61 = vunpack.c.l.b16 %v3810_v24  ;;  %v4862_v24 = vld [vmem:[%s5213_s27 + $0x3c] sm:$0xe] }
 0x185   : > { %v3208_v15 = vrot.slane %v3206_v31, 4  ;;  %v3199_v14 = vor.u32 %v3198_v37, %v3195_v6 }
 0x186   : > { %v1662_v40 = vpop.f32.mrf.mxu3  ;;  %v1022_v52 = vpop.f32.mrf.mxu1 }
 0x187   : > { %v1715_v48 = vadd.f32 %v1662_v40, %v1422_v50  ;;  %4892 = vmatmul.msk.bf16.gmra.mxu0 %vm690_vm3, %v3939_v34  ;;  %v4654_v50 = vrot.slane %v4638_v19, 9  ;;  %v5991_v19 = vld [vmem:[%s5213_s27 + $0x44] sm:$0x1]  ;;  %v3209_v31 = vor.u32 %v3208_v15, %v5982_v57  ;;  %v3200_v33 = vrot.slane %v3199_v14, 4 }
 0x189   : > { %v1371_v36 = vpop.f32.mrf.mxu2  ;;  %4669 = vmatmul.msk.bf16.gmra.mxu1 %vm690_vm3, %v2593_v54  ;;  %v5980_v34 = vadd.f32 %v2315_v2, %v1715_v48  ;;  %v3813_v54 = vsel %vm5407_vm7, %v3811_v21, %v3812_v32  ;;  %v2470_v13 = vsel %vm5407_vm7, %v4654_v50, %v2469_v5  ;;  %v3539_v2 = vpack.c.b16 %v3510_v28, %v3509_v20  ;;  %v5999_v50 = vld [vmem:[%s5213_s27 + $0x4c] sm:$0xf] }
 0x18a   : > { %v1423_v62 = vadd.f32 %v1371_v36, %v1020_v11  ;;  %v3911_v51 = vunpack.c.l.b16 %v3813_v54  ;;  %v1023_v5 = vadd.f32 %v1022_v52, %v5603_v42  ;;  %v2565_v11 = vunpack.c.l.b16 %v2470_v13  ;;  %v4807_v36 = vld [vmem:[%s5213_s27 + $0x48] sm:$0xf] }
 0x18b   : > { %v2566_v21 = vunpack.c.l.b16 %v2473_v17  ;;  %v3212_v32 = vshll.u32 %v5991_v19, 16  ;;  %v3816_v42 = vrot.slane %v5959_v41, 5  ;;  %v3217_v37 = vshrl.u32 %v4807_v36, 16 }
 0x18c   : > { %v2317_v40 = vpop.f32.mrf.mxu0  ;;  %v3940_v20 = vpack.c.b16 %v3911_v51, %v3910_v61  ;;  %v3220_v15 = vshll.u32 %v4807_v36, 16  ;;  %v3226_v54 = vshll.u32 %v5999_v50, 16  ;;  %v3230_v13 = vshrl.u32 %v5999_v50, 16  ;;  %v5109_v51 = vld [vmem:[%s5213_s27 + $0x44] sm:$0x1] }
 0x18d   : > { %v3214_v28 = vrot.slane %v3212_v32, 5  ;;  %v2479_v14 = vrot.slane %v5109_v51, 5  ;;  %v3819_v41 = vrot.slane %v5991_v19, 5  ;;  %v3818_v32 = vrot.slane %v3816_v42, 4  ;;  %v6026_v51 = vld [vmem:[%s5213_s27 + $0x50] sm:$0x1] }
 0x18e   : > { %v1664_v12 = vpop.f32.mrf.mxu3  ;;  %4781 = vmatmul.msk.bf16.gmra.mxu2 %vm690_vm3, %v4944_v45  ;;  %v1024_v26 = vpop.f32.mrf.mxu1  ;;  %v2594_v45 = vpack.c.b16 %v2566_v21, %v2565_v11  ;;  %v3205_v11 = vsel %vm5232_vm4, %v3200_v33, %v5982_v57  ;;  %v3222_v36 = vrot.slane %v3220_v15, 5  ;;  %v6020_v19 = vrot.slane %v3226_v54, 5 }
 0x18f   : > { %v1716_v48 = vadd.f32 %v1664_v12, %v1423_v62  ;;  %v3210_v62 = vrot.slane %v3209_v31, 4  ;;  %v3511_v57 = vunpack.c.l.b16 %v3205_v11 }
 0x191   : > { %v1374_v49 = vpop.f32.mrf.mxu2  ;;  %v6004_v52 = vadd.f32 %v2317_v40, %v1716_v48  ;;  %v4639_v40 = vld [vmem:[%s5213_s27 + $0x3c] sm:$0xe]  ;;  %v1025_v48 = vadd.f32 %v1024_v26, %v5620_v7  ;;  %v3215_v21 = vsel %vm5232_vm4, %v3210_v62, %v3214_v28 }
 0x192   : > { %v1424_v30 = vadd.f32 %v1374_v49, %v1023_v5  ;;  %v4878_v5 = vrot.slane %v4862_v24, 9  ;;  %v3232_v24 = vrot.slane %v3230_v13, 4  ;;  %v4655_v7 = vrot.slane %v4639_v40, 9 }
 0x193   : > { %4845 = vmatmul.msk.bf16.gmra.mxu3 %vm690_vm3, %v3539_v2  ;;  %v5108_v2 = vld [vmem:[%s5213_s27 + $0x40] sm:$0xf]  ;;  %v3512_v33 = vunpack.c.l.b16 %v3215_v21 }
 0x194   : > { %v2320_v6 = vpop.f32.mrf.mxu0  ;;  %v2476_v61 = vrot.slane %v5108_v2, 5  ;;  %v3817_v28 = vsel %vm5407_vm7, %v4878_v5, %v3816_v42  ;;  %v3236_v42 = vshll.u32 %v6026_v51, 16 }
 0x195   : > { %v3540_v40 = vpack.c.b16 %v3512_v33, %v3511_v57  ;;  %v5110_v33 = vld [vmem:[%s5213_s27 + $0x4c] sm:$0xf] }
 0x196   : > { %v1667_v17 = vpop.f32.mrf.mxu3  ;;  %v1027_v12 = vpop.f32.mrf.mxu1  ;;  %v2478_v26 = vrot.slane %v2476_v61, 4 }
 0x197   : > { %v1717_v31 = vadd.f32 %v1667_v17, %v1424_v30  ;;  %4893 = vmatmul.msk.bf16.gmra.mxu0 %vm690_vm3, %v3940_v20  ;;  %v3219_v30 = vrot.slane %v3217_v37, 4  ;;  %v4945_v17 = vld [vmem:[%s5213_s27 + $0x3c] sm:$0xff] }
 0x198   : > { %v2480_v13 = vsel %vm5407_vm7, %v2478_v26, %v2479_v14  ;;  %v6045_v26 = vld [vmem:[%s5213_s27 + $0x58] sm:$0xf] }
 0x199   : > { %v1376_v49 = vpop.f32.mrf.mxu2  ;;  %4670 = vmatmul.msk.bf16.gmra.mxu1 %vm690_vm3, %v2594_v45  ;;  %v6023_v2 = vadd.f32 %v2320_v6, %v1717_v31  ;;  %v3820_v45 = vsel %vm5407_vm7, %v3818_v32, %v3819_v41  ;;  %v3223_v37 = vor.u32 %v3222_v36, %v3219_v30  ;;  %v2477_v6 = vsel %vm5407_vm7, %v4655_v7, %v2476_v61 }
 0x19a   : > { %v1425_v20 = vadd.f32 %v1376_v49, %v1025_v48  ;;  %v3233_v31 = vor.u32 %v3232_v24, %v6020_v19  ;;  %v1028_v41 = vadd.f32 %v1027_v12, %v5641_v56  ;;  %v3912_v48 = vunpack.c.l.b16 %v3817_v28  ;;  %v4863_v24 = vld [vmem:[%s5213_s27 + $0x48] sm:$0xe] }
 0x19b   : > { %v3913_v11 = vunpack.c.l.b16 %v3820_v45  ;;  %v2567_v32 = vunpack.c.l.b16 %v2477_v6  ;;  %v2568_v61 = vunpack.c.l.b16 %v2480_v13  ;;  %v3224_v30 = vrot.slane %v3223_v37, 4 }
 0x19c   : > { %v2322_v62 = vpop.f32.mrf.mxu0  ;;  %v3234_v14 = vrot.slane %v3233_v31, 4  ;;  %v3238_v36 = vrot.slane %v3236_v42, 5  ;;  %v3823_v7 = vrot.slane %v5999_v50, 5  ;;  %v2483_v28 = vrot.slane %v5110_v33, 5  ;;  %v4640_v50 = vld [vmem:[%s5213_s27 + $0x48] sm:$0xe] }
 0x19d   : > { %v2595_v57 = vpack.c.b16 %v2568_v61, %v2567_v32  ;;  %v4879_v13 = vrot.slane %v4863_v24, 9 }
 0x19e   : > { %v1669_v15 = vpop.f32.mrf.mxu3  ;;  %4782 = vmatmul.msk.bf16.gmra.mxu2 %vm690_vm3, %v4945_v17  ;;  %v1029_v54 = vpop.f32.mrf.mxu1  ;;  %v4810_v17 = vld [vmem:[%s5213_s27 + $0x54] sm:$0xf]  ;;  %v3239_v6 = vsel %vm5232_vm4, %v3234_v14, %v3238_v36  ;;  %v4946_v36 = vld [vmem:[%s5213_s27 + $0x48] sm:$0xff] }
 0x19f   : > { %v1718_v5 = vadd.f32 %v1669_v15, %v1425_v20  ;;  %v3941_v20 = vpack.c.b16 %v3913_v11, %v3912_v48  ;;  %v3229_v15 = vsel %vm5232_vm4, %v3224_v30, %v6020_v19  ;;  %v3241_v31 = vshrl.u32 %v4810_v17, 16  ;;  %v5111_v11 = vld [vmem:[%s5213_s27 + $0x50] sm:$0x1] }
 0x1a0   : > { %v3825_v48 = vrot.slane %v3823_v7, 4  ;;  %v3826_v19 = vrot.slane %v6026_v51, 5  ;;  %v3513_v61 = vunpack.c.l.b16 %v3229_v15  ;;  %v2485_v30 = vrot.slane %v2483_v28, 4 }
 0x1a1   : > { %v1379_v21 = vpop.f32.mrf.mxu2  ;;  %v6047_v56 = vadd.f32 %v2322_v62, %v1718_v5  ;;  %v3244_v62 = vshll.u32 %v4810_v17, 16  ;;  %v3250_v5 = vshll.u32 %v6045_v26, 16  ;;  %v3514_v24 = vunpack.c.l.b16 %v3239_v6 }
 0x1a2   : > { %v1426_v49 = vadd.f32 %v1379_v21, %v1028_v41  ;;  %v1030_v41 = vadd.f32 %v1029_v54, %v5656_v23  ;;  %v2486_v21 = vrot.slane %v5111_v11, 5  ;;  %v3824_v17 = vsel %vm5407_vm7, %v4879_v13, %v3823_v7 }
 0x1a3   : > { %4846 = vmatmul.msk.bf16.gmra.mxu3 %vm690_vm3, %v3540_v40  ;;  %v3254_v40 = vshrl.u32 %v6045_v26, 16  ;;  %v3243_v23 = vrot.slane %v3241_v31, 4  ;;  %v3246_v54 = vrot.slane %v3244_v62, 5  ;;  %v6068_v51 = vrot.slane %v3250_v5, 5 }
 0x1a4   : > { %v2325_v12 = vpop.f32.mrf.mxu0  ;;  %v2487_v6 = vsel %vm5407_vm7, %v2485_v30, %v2486_v21  ;;  %v3914_v13 = vunpack.c.l.b16 %v3824_v17  ;;  %v4864_v17 = vld [vmem:[%s5213_s27 + $0x54] sm:$0xe] }
 0x1a5   : > { %v3256_v33 = vrot.slane %v3254_v40, 4  ;;  %v3247_v5 = vor.u32 %v3246_v54, %v3243_v23 }
 0x1a6   : > { %v1672_v45 = vpop.f32.mrf.mxu3  ;;  %v1032_v37 = vpop.f32.mrf.mxu1 }
 0x1a7   : > { %v1719_v42 = vadd.f32 %v1672_v45, %v1426_v49  ;;  %4894 = vmatmul.msk.bf16.gmra.mxu0 %vm690_vm3, %v3941_v20  ;;  %v4656_v49 = vrot.slane %v4640_v50, 9  ;;  %v6077_v50 = vld [vmem:[%s5213_s27 + $0x5c] sm:$0x1]  ;;  %v3257_v40 = vor.u32 %v3256_v33, %v6068_v51  ;;  %v3248_v30 = vrot.slane %v3247_v5, 4 }
 0x1a9   : > { %v1381_v32 = vpop.f32.mrf.mxu2  ;;  %4671 = vmatmul.msk.bf16.gmra.mxu1 %vm690_vm3, %v2595_v57  ;;  %v6066_v20 = vadd.f32 %v2325_v12, %v1719_v42  ;;  %v3827_v57 = vsel %vm5407_vm7, %v3825_v48, %v3826_v19  ;;  %v2484_v15 = vsel %vm5407_vm7, %v4656_v49, %v2483_v28  ;;  %v3541_v12 = vpack.c.b16 %v3514_v24, %v3513_v61  ;;  %v6085_v49 = vld [vmem:[%s5213_s27 + $0x64] sm:$0xf] }
 0x1aa   : > { %v1427_v14 = vadd.f32 %v1381_v32, %v1030_v41  ;;  %v3915_v62 = vunpack.c.l.b16 %v3827_v57  ;;  %v1033_v28 = vadd.f32 %v1032_v37, %v5533_v63  ;;  %v2569_v41 = vunpack.c.l.b16 %v2484_v15  ;;  %v4813_v32 = vld [vmem:[%s5213_s27 + $0x60] sm:$0xf] }
 0x1ab   : > { %v2570_v48 = vunpack.c.l.b16 %v2487_v6  ;;  %v3260_v19 = vshll.u32 %v6077_v50, 16  ;;  %v3830_v63 = vrot.slane %v6045_v26, 5  ;;  %v3265_v54 = vshrl.u32 %v4813_v32, 16 }
 0x1ac   : > { %v2327_v45 = vpop.f32.mrf.mxu0  ;;  %v3942_v61 = vpack.c.b16 %v3915_v62, %v3914_v13  ;;  %v3268_v33 = vshll.u32 %v4813_v32, 16  ;;  %v3274_v57 = vshll.u32 %v6085_v49, 16  ;;  %v3278_v15 = vshrl.u32 %v6085_v49, 16  ;;  %v5113_v62 = vld [vmem:[%s5213_s27 + $0x5c] sm:$0x1] }
 0x1ad   : > { %v3262_v24 = vrot.slane %v3260_v19, 5  ;;  %v2493_v5 = vrot.slane %v5113_v62, 5  ;;  %v3833_v26 = vrot.slane %v6077_v50, 5  ;;  %v3832_v19 = vrot.slane %v3830_v63, 4  ;;  %v6112_v62 = vld [vmem:[%s5213_s27 + $0x68] sm:$0x1] }
 0x1ae   : > { %v1674_v7 = vpop.f32.mrf.mxu3  ;;  %4783 = vmatmul.msk.bf16.gmra.mxu2 %vm690_vm3, %v4946_v36  ;;  %v1034_v31 = vpop.f32.mrf.mxu1  ;;  %v2596_v36 = vpack.c.b16 %v2570_v48, %v2569_v41  ;;  %v3253_v41 = vsel %vm5232_vm4, %v3248_v30, %v6068_v51  ;;  %v3270_v32 = vrot.slane %v3268_v33, 5  ;;  %v6106_v50 = vrot.slane %v3274_v57, 5 }
 0x1af   : > { %v1720_v42 = vadd.f32 %v1674_v7, %v1427_v14  ;;  %v3258_v14 = vrot.slane %v3257_v40, 4  ;;  %v3515_v51 = vunpack.c.l.b16 %v3253_v41 }
 0x1b1   : > { %v1384_v11 = vpop.f32.mrf.mxu2  ;;  %v6090_v37 = vadd.f32 %v2327_v45, %v1720_v42  ;;  %v4641_v45 = vld [vmem:[%s5213_s27 + $0x54] sm:$0xe]  ;;  %v1035_v42 = vadd.f32 %v1034_v31, %v5552_v25  ;;  %v3263_v48 = vsel %vm5232_vm4, %v3258_v14, %v3262_v24 }
 0x1b2   : > { %v1428_v21 = vadd.f32 %v1384_v11, %v1033_v28  ;;  %v4880_v28 = vrot.slane %v4864_v17, 9  ;;  %v3280_v17 = vrot.slane %v3278_v15, 4  ;;  %v4657_v25 = vrot.slane %v4641_v45, 9 }
 0x1b3   : > { %4847 = vmatmul.msk.bf16.gmra.mxu3 %vm690_vm3, %v3541_v12  ;;  %v5112_v12 = vld [vmem:[%s5213_s27 + $0x58] sm:$0xf]  ;;  %v3516_v30 = vunpack.c.l.b16 %v3263_v48 }
 0x1b4   : > { %v2330_v23 = vpop.f32.mrf.mxu0  ;;  %v2490_v13 = vrot.slane %v5112_v12, 5  ;;  %v3831_v24 = vsel %vm5407_vm7, %v4880_v28, %v3830_v63  ;;  %v3284_v63 = vshll.u32 %v6112_v62, 16 }
 0x1b5   : > { %v3542_v45 = vpack.c.b16 %v3516_v30, %v3515_v51 }
 0x1b6   : > { %v1677_v6 = vpop.f32.mrf.mxu3  ;;  %v1037_v7 = vpop.f32.mrf.mxu1  ;;  %v2492_v31 = vrot.slane %v2490_v13, 4 }
 0x1b7   : > { %v1721_v40 = vadd.f32 %v1677_v6, %v1428_v21  ;;  %4895 = vmatmul.msk.bf16.gmra.mxu0 %vm690_vm3, %v3942_v61  ;;  %v3267_v21 = vrot.slane %v3265_v54, 4  ;;  %v4947_v6 = vld [vmem:[%s5213_s27 + $0x54] sm:$0xff] }
 0x1b8   : > { %v2494_v15 = vsel %vm5407_vm7, %v2492_v31, %v2493_v5  ;;  %v3286_v5 = vrot.slane %v3284_v63, 5  ;;  %v6131_v31 = vld [vmem:[%s5213_s27 + $0x70] sm:$0xf]  ;;  %v4642_v63 = vld [vmem:[%s5213_s27 + $0x60] sm:$0xe] }
 0x1b9   : > { %v1386_v11 = vpop.f32.mrf.mxu2  ;;  %4672 = vmatmul.msk.bf16.gmra.mxu1 %vm690_vm3, %v2596_v36  ;;  %v6109_v12 = vadd.f32 %v2330_v23, %v1721_v40  ;;  %v3834_v36 = vsel %vm5407_vm7, %v3832_v19, %v3833_v26  ;;  %v3271_v54 = vor.u32 %v3270_v32, %v3267_v21  ;;  %v2491_v23 = vsel %vm5407_vm7, %v4657_v25, %v2490_v13 }
 0x1ba   : > { %v1429_v61 = vadd.f32 %v1386_v11, %v1035_v42  ;;  %v3281_v40 = vor.u32 %v3280_v17, %v6106_v50  ;;  %v1038_v26 = vadd.f32 %v1037_v7, %v5573_v60  ;;  %v3916_v42 = vunpack.c.l.b16 %v3831_v24  ;;  %v4816_v17 = vld [vmem:[%s5213_s27 + $0x6c] sm:$0xf] }
 0x1bb   : > { %v3917_v41 = vunpack.c.l.b16 %v3834_v36  ;;  %v2571_v19 = vunpack.c.l.b16 %v2491_v23  ;;  %v2572_v11 = vunpack.c.l.b16 %v2494_v15  ;;  %v3272_v21 = vrot.slane %v3271_v54, 4  ;;  %v5114_v23 = vld [vmem:[%s5213_s27 + $0x64] sm:$0xf] }
 0x1bc   : > { %v2332_v14 = vpop.f32.mrf.mxu0  ;;  %v3282_v32 = vrot.slane %v3281_v40, 4  ;;  %v3837_v25 = vrot.slane %v6085_v49, 5  ;;  %v2497_v15 = vrot.slane %v5114_v23, 5  ;;  %v3289_v49 = vshrl.u32 %v4816_v17, 16 }
 0x1bd   : > { %v2597_v51 = vpack.c.b16 %v2572_v11, %v2571_v19  ;;  %v3277_v54 = vsel %vm5232_vm4, %v3272_v21, %v6106_v50  ;;  %v3840_v50 = vrot.slane %v6112_v62, 5 }
 0x1be   : > { %v1679_v33 = vpop.f32.mrf.mxu3  ;;  %4784 = vmatmul.msk.bf16.gmra.mxu2 %vm690_vm3, %v4947_v6  ;;  %v1039_v57 = vpop.f32.mrf.mxu1  ;;  %v4865_v6 = vld [vmem:[%s5213_s27 + $0x60] sm:$0xe]  ;;  %v3517_v11 = vunpack.c.l.b16 %v3277_v54  ;;  %v6159_v54 = vld [vmem:[%s5213_s27 + $0x74] sm:$0x1] }
 0x1bf   : > { %v1722_v28 = vadd.f32 %v1679_v33, %v1429_v61  ;;  %v3943_v61 = vpack.c.b16 %v3917_v41, %v3916_v42  ;;  %v4881_v30 = vrot.slane %v4865_v6, 9  ;;  %v3287_v33 = vsel %vm5232_vm4, %v3282_v32, %v3286_v5  ;;  %v5115_v41 = vld [vmem:[%s5213_s27 + $0x68] sm:$0x1]  ;;  %v4948_v5 = vld [vmem:[%s5213_s27 + $0x60] sm:$0xff] }
 0x1c0   : > { %v3839_v42 = vrot.slane %v3837_v25, 4  ;;  %v4658_v6 = vrot.slane %v4642_v63, 9 }
 0x1c1   : > { %v1389_v48 = vpop.f32.mrf.mxu2  ;;  %v6133_v60 = vadd.f32 %v2332_v14, %v1722_v28  ;;  %v3292_v14 = vshll.u32 %v4816_v17, 16  ;;  %v3298_v28 = vshll.u32 %v6131_v31, 16  ;;  %v3838_v21 = vsel %vm5407_vm7, %v4881_v30, %v3837_v25 }
 0x1c2   : > { %v1430_v13 = vadd.f32 %v1389_v48, %v1038_v26  ;;  %v1040_v26 = vadd.f32 %v1039_v57, %v5591_v18  ;;  %v2500_v48 = vrot.slane %v5115_v41, 5  ;;  %v2499_v17 = vrot.slane %v2497_v15, 4 }
 0x1c3   : > { %4848 = vmatmul.msk.bf16.gmra.mxu3 %vm690_vm3, %v3542_v45  ;;  %v3302_v45 = vshrl.u32 %v6131_v31, 16  ;;  %v3291_v18 = vrot.slane %v3289_v49, 4  ;;  %v3294_v57 = vrot.slane %v3292_v14, 5  ;;  %v6154_v62 = vrot.slane %v3298_v28, 5 }
 0x1c4   : > { %v2335_v7 = vpop.f32.mrf.mxu0  ;;  %v3841_v23 = vsel %vm5407_vm7, %v3839_v42, %v3840_v50  ;;  %v3918_v30 = vunpack.c.l.b16 %v3838_v21  ;;  %v2498_v49 = vsel %vm5407_vm7, %v4658_v6, %v2497_v15  ;;  %v3308_v42 = vshll.u32 %v6159_v54, 16  ;;  %v6171_v21 = vld [vmem:[%s5213_s27 + $0x7c] sm:$0xf]  ;;  %v4866_v6 = vld [vmem:[%s5213_s27 + $0x6c] sm:$0xe] }
 0x1c5   : > { %v3919_v14 = vunpack.c.l.b16 %v3841_v23  ;;  %v3295_v28 = vor.u32 %v3294_v57, %v3291_v18  ;;  %v2573_v41 = vunpack.c.l.b16 %v2498_v49  ;;  %v3322_v23 = vshll.u32 %v6171_v21, 16 }
 0x1c6   : > { %v1682_v24 = vpop.f32.mrf.mxu3  ;;  %v1042_v36 = vpop.f32.mrf.mxu1 }
 0x1c7   : > { %v1723_v40 = vadd.f32 %v1682_v24, %v1430_v13  ;;  %4896 = vmatmul.msk.bf16.gmra.mxu0 %vm690_vm3, %v3943_v61  ;;  %v3518_v13 = vunpack.c.l.b16 %v3287_v33  ;;  %v3304_v24 = vrot.slane %v3302_v45, 4  ;;  %v3944_v15 = vpack.c.b16 %v3919_v14, %v3918_v30  ;;  %v4643_v30 = vld [vmem:[%s5213_s27 + $0x6c] sm:$0xe] }
 0x1c9   : > { %v1391_v19 = vpop.f32.mrf.mxu2  ;;  %4673 = vmatmul.msk.bf16.gmra.mxu1 %vm690_vm3, %v2597_v51  ;;  %v6152_v61 = vadd.f32 %v2335_v7, %v1723_v40  ;;  %v3543_v25 = vpack.c.b16 %v3518_v13, %v3517_v11  ;;  %v2501_v40 = vsel %vm5407_vm7, %v2499_v17, %v2500_v48  ;;  %v3305_v45 = vor.u32 %v3304_v24, %v6154_v62  ;;  %v4819_v11 = vld [vmem:[%s5213_s27 + $0x78] sm:$0xf] }
 0x1ca   : > { %v1431_v32 = vadd.f32 %v1391_v19, %v1040_v26  ;;  %v1043_v26 = vadd.f32 %v1042_v36, %v5610_v58  ;;  %v2574_v19 = vunpack.c.l.b16 %v2501_v40  ;;  %v3296_v48 = vrot.slane %v3295_v28, 4  ;;  %v5116_v40 = vld [vmem:[%s5213_s27 + $0x70] sm:$0xf] }
 0x1cb   : > { %v3844_v58 = vrot.slane %v6131_v31, 5  ;;  %v3313_v36 = vshrl.u32 %v4819_v11, 16  ;;  %v3316_v24 = vshll.u32 %v4819_v11, 16  ;;  %v2504_v14 = vrot.slane %v5116_v40, 5 }
 0x1cc   : > { %v2337_v51 = vpop.f32.mrf.mxu0  ;;  %v2598_v57 = vpack.c.b16 %v2574_v19, %v2573_v41  ;;  %v3301_v31 = vsel %vm5232_vm4, %v3296_v48, %v6154_v62  ;;  %v4659_v19 = vrot.slane %v4643_v30, 9  ;;  %v3324_v62 = vrot.slane %v3322_v23, 5 }
 0x1cd   : > { %v3318_v11 = vrot.slane %v3316_v24, 5 }
 0x1ce   : > { %v1684_v33 = vpop.f32.mrf.mxu3  ;;  %4785 = vmatmul.msk.bf16.gmra.mxu2 %vm690_vm3, %v4948_v5  ;;  %v1044_v7 = vpop.f32.mrf.mxu1  ;;  %v3310_v5 = vrot.slane %v3308_v42, 5  ;;  %v3846_v42 = vrot.slane %v3844_v58, 4 }
 0x1cf   : > { %v1724_v63 = vadd.f32 %v1684_v33, %v1431_v32  ;;  %v3306_v32 = vrot.slane %v3305_v45, 4  ;;  %v3326_v33 = vshrl.u32 %v6171_v21, 16  ;;  %v1045_v45 = vadd.f32 %v1044_v7, %v5633_v8 }
 0x1d0   : > { %v3519_v8 = vunpack.c.l.b16 %v3301_v31 }
 0x1d1   : > { %v1394_v50 = vpop.f32.mrf.mxu2  ;;  %v6176_v17 = vadd.f32 %v2337_v51, %v1724_v63  ;;  %v4882_v51 = vrot.slane %v4866_v6, 9  ;;  %v3847_v63 = vrot.slane %v6159_v54, 5  ;;  %v4949_v6 = vld [vmem:[%s5213_s27 + $0x6c] sm:$0xff]  ;;  %v2506_v54 = vrot.slane %v2504_v14, 4 }
 0x1d2   : > { %v1432_v13 = vadd.f32 %v1394_v50, %v1043_v26  ;;  %v3311_v26 = vsel %vm5232_vm4, %v3306_v32, %v3310_v5  ;;  %v3315_v50 = vrot.slane %v3313_v36, 4  ;;  %v6196_v32 = vld [vmem:[%s5213_s27 + $0x80] sm:$0x1] }
 0x1d3   : > { %4849 = vmatmul.msk.bf16.gmra.mxu3 %vm690_vm3, %v3543_v25  ;;  %v3520_v7 = vunpack.c.l.b16 %v3311_v26  ;;  %v3845_v36 = vsel %vm5407_vm7, %v4882_v51, %v3844_v58  ;;  %v3332_v31 = vshll.u32 %v6196_v32, 16 }
 0x1d4   : > { %v2340_v18 = vpop.f32.mrf.mxu0  ;;  %v3319_v24 = vor.u32 %v3318_v11, %v3315_v50 }
 0x1d5   : > { %v3544_v51 = vpack.c.b16 %v3520_v7, %v3519_v8 }
 0x1d6   : > { %v1687_v25 = vpop.f32.mrf.mxu3  ;;  %v1047_v49 = vpop.f32.mrf.mxu1 }
 0x1d7   : > { %v1725_v28 = vadd.f32 %v1687_v25, %v1432_v13  ;;  %4897 = vmatmul.msk.bf16.gmra.mxu0 %vm690_vm3, %v3944_v15  ;;  %v3328_v13 = vrot.slane %v3326_v33, 4  ;;  %v5117_v25 = vld [vmem:[%s5213_s27 + $0x74] sm:$0x1] }
 0x1d8   : > { %v2507_v15 = vrot.slane %v5117_v25, 5 }
 0x1d9   : > { %v1396_v41 = vpop.f32.mrf.mxu2  ;;  %4674 = vmatmul.msk.bf16.gmra.mxu1 %vm690_vm3, %v2598_v57  ;;  %v6193_v40 = vadd.f32 %v2340_v18, %v1725_v28  ;;  %v3848_v57 = vsel %vm5407_vm7, %v3846_v42, %v3847_v63  ;;  %v2505_v18 = vsel %vm5407_vm7, %v4659_v19, %v2504_v14  ;;  %v3329_v28 = vor.u32 %v3328_v13, %v3324_v62 }
 0x1da   : > { %v1433_v48 = vadd.f32 %v1396_v41, %v1045_v45  ;;  %v2508_v30 = vsel %vm5407_vm7, %v2506_v54, %v2507_v15  ;;  %v1048_v63 = vadd.f32 %v1047_v49, %v5652_v9  ;;  %v3920_v45 = vunpack.c.l.b16 %v3845_v36  ;;  %v4867_v54 = vld [vmem:[%s5213_s27 + $0x78] sm:$0xe]  ;;  %v6214_v15 = vld [vmem:[%s5213_s27 + $0x88] sm:$0xf] }
 0x1db   : > { %v3921_v26 = vunpack.c.l.b16 %v3848_v57  ;;  %v2575_v50 = vunpack.c.l.b16 %v2505_v18  ;;  %v2576_v41 = vunpack.c.l.b16 %v2508_v30  ;;  %v3320_v14 = vrot.slane %v3319_v24, 4  ;;  %v5118_v57 = vld [vmem:[%s5213_s27 + $0x7c] sm:$0xf] }
 0x1dc   : > { %v2342_v5 = vpop.f32.mrf.mxu0  ;;  %v3330_v11 = vrot.slane %v3329_v28, 4  ;;  %v3851_v13 = vrot.slane %v6171_v21, 5  ;;  %v4883_v36 = vrot.slane %v4867_v54, 9  ;;  %v2511_v24 = vrot.slane %v5118_v57, 5  ;;  %v4824_v57 = vld [vmem:[%s5213_s27 + $0x8c] sm:$0x1] }
 0x1dd   : > { %v3945_v25 = vpack.c.b16 %v3921_v26, %v3920_v45  ;;  %v2599_v8 = vpack.c.b16 %v2576_v41, %v2575_v50  ;;  %v3325_v7 = vsel %vm5232_vm4, %v3320_v14, %v3324_v62  ;;  %v3854_v28 = vrot.slane %v6196_v32, 5  ;;  %v5119_v14 = vld [vmem:[%s5213_s27 + $0x80] sm:$0x1] }
 0x1de   : > { %v1689_v23 = vpop.f32.mrf.mxu3  ;;  %4786 = vmatmul.msk.bf16.gmra.mxu2 %vm690_vm3, %v4949_v6  ;;  %v1049_v33 = vpop.f32.mrf.mxu1  ;;  %v3334_v6 = vrot.slane %v3332_v31, 5  ;;  %v3853_v30 = vrot.slane %v3851_v13, 4  ;;  %v4644_v31 = vld [vmem:[%s5213_s27 + $0x78] sm:$0xe]  ;;  %v3350_v62 = vshrl.u32 %v6214_v15, 16  ;;  %v3521_v26 = vunpack.c.l.b16 %v3325_v7 }
 0x1df   : > { %v1726_v58 = vadd.f32 %v1689_v23, %v1433_v48  ;;  %v4822_v48 = vld [vmem:[%s5213_s27 + $0x84] sm:$0xf]  ;;  %v1050_v45 = vadd.f32 %v1049_v33, %v5669_v47  ;;  %v3852_v32 = vsel %vm5407_vm7, %v4883_v36, %v3851_v13  ;;  %v4660_v50 = vrot.slane %v4644_v31, 9 }
 0x1e0   : > { %v3335_v21 = vsel %vm5232_vm4, %v3330_v11, %v3334_v6  ;;  %v2513_v41 = vrot.slane %v2511_v24, 4  ;;  %v4950_v6 = vld [vmem:[%s5213_s27 + $0x78] sm:$0xff] }
 0x1e1   : > { %v1399_v42 = vpop.f32.mrf.mxu2  ;;  %v6216_v9 = vadd.f32 %v2342_v5, %v1726_v58  ;;  %v3337_v5 = vshrl.u32 %v4822_v48, 16  ;;  %v3522_v54 = vunpack.c.l.b16 %v3335_v21  ;;  %v2512_v36 = vsel %vm5407_vm7, %v4660_v50, %v2511_v24  ;;  %v4868_v24 = vld [vmem:[%s5213_s27 + $0x84] sm:$0xe] }
 0x1e2   : > { %v1434_v19 = vadd.f32 %v1399_v42, %v1048_v63  ;;  %v3346_v63 = vshll.u32 %v6214_v15, 16 }
 0x1e3   : > { %4850 = vmatmul.msk.bf16.gmra.mxu3 %vm690_vm3, %v3544_v51  ;;  %v3340_v51 = vshll.u32 %v4822_v48, 16  ;;  %v3855_v48 = vsel %vm5407_vm7, %v3853_v30, %v3854_v28  ;;  %v3339_v47 = vrot.slane %v3337_v5, 4  ;;  %v3922_v30 = vunpack.c.l.b16 %v3852_v32 }
 0x1e4   : > { %v2345_v49 = vpop.f32.mrf.mxu0  ;;  %v6238_v7 = vrot.slane %v3346_v63, 5  ;;  %v3923_v28 = vunpack.c.l.b16 %v3855_v48  ;;  %v3356_v63 = vshll.u32 %v4824_v57, 16 }
 0x1e5   : > { %v3342_v33 = vrot.slane %v3340_v51, 5 }
 0x1e6   : > { %v1692_v23 = vpop.f32.mrf.mxu3  ;;  %v2671_v18 = vpop.f32.mrf.mxu1 }
 0x1e7   : > { %v1727_v58 = vadd.f32 %v1692_v23, %v1434_v19  ;;  %4898 = vmatmul.msk.bf16.gmra.mxu0 %vm690_vm3, %v3945_v25  ;;  %v2514_v19 = vrot.slane %v5119_v14, 5  ;;  %v4825_v14 = vld [vmem:[%s5213_s27 + $0x90] sm:$0xf] }
 0x1e9   : > { %v1401_v42 = vpop.f32.mrf.mxu2  ;;  %4675 = vmatmul.msk.bf16.gmra.mxu1 %vm690_vm3, %v2599_v8  ;;  %v6236_v25 = vadd.f32 %v2345_v49, %v1727_v58  ;;  %v3352_v8 = vrot.slane %v3350_v62, 4  ;;  %v2515_v23 = vsel %vm5407_vm7, %v2513_v41, %v2514_v19  ;;  %v3545_v49 = vpack.c.b16 %v3522_v54, %v3521_v26  ;;  %v6251_v19 = vld [vmem:[%s5213_s27 + $0x94] sm:$0xf] }
 0x1ea   : > { %v1435_v11 = vadd.f32 %v1401_v42, %v1050_v45  ;;  %v3343_v58 = vor.u32 %v3342_v33, %v3339_v47  ;;  %v2577_v62 = vunpack.c.l.b16 %v2512_v36  ;;  %v2578_v45 = vunpack.c.l.b16 %v2515_v23 }
 0x1eb   : > { %6588 = vst [vmem:[#allocation4_spill] sm:$0xff] %v6236_v25  ;;  %v3353_v51 = vor.u32 %v3352_v8, %v6238_v7  ;;  %v3858_v42 = vrot.slane %v6214_v15, 5  ;;  %v3946_v41 = vpack.c.b16 %v3923_v28, %v3922_v30  ;;  %v3861_v47 = vrot.slane %v4824_v57, 5  ;;  %v5120_v28 = vld [vmem:[%s5213_s27 + $0x88] sm:$0xf] }
 0x1ec   : > { %v2347_v13 = vpop.f32.mrf.mxu0  ;;  %v3344_v26 = vrot.slane %v3343_v58, 4  ;;  %v2600_v54 = vpack.c.b16 %v2578_v45, %v2577_v62  ;;  %v2751_v15 = vadd.f32 %v2671_v18, %v5686_v59  ;;  %v3361_v36 = vshrl.u32 %v4825_v14, 16  ;;  %v4645_v57 = vld [vmem:[%s5213_s27 + $0x84] sm:$0xe]  ;;  %v4831_v25 = vld [vmem:[%s5213_s27 + $0xa8] sm:$0xf] }
 0x1ed   : > { %v3354_v32 = vrot.slane %v3353_v51, 4  ;;  %v3860_v48 = vrot.slane %v3858_v42, 4  ;;  %v3364_v23 = vshll.u32 %v4825_v14, 16  ;;  %v2518_v58 = vrot.slane %v5120_v28, 5 }
 0x1ee   : > { %v1694_v21 = vpop.f32.mrf.mxu3  ;;  %4787 = vmatmul.msk.bf16.gmra.mxu2 %vm690_vm3, %v4950_v6  ;;  %v2673_v31 = vpop.f32.mrf.mxu1  ;;  %v4884_v6 = vrot.slane %v4868_v24, 9  ;;  %v3374_v51 = vshrl.u32 %v6251_v19, 16  ;;  %v3349_v59 = vsel %vm5232_vm4, %v3344_v26, %v6238_v7  ;;  %v3363_v24 = vrot.slane %v3361_v36, 4  ;;  %v4951_v7 = vld [vmem:[%s5213_s27 + $0x84] sm:$0xff] }
 0x1ef   : > { %v1728_v5 = vadd.f32 %v1694_v21, %v1435_v11  ;;  %v3358_v11 = vrot.slane %v3356_v63, 5  ;;  %v3370_v21 = vshll.u32 %v6251_v19, 16  ;;  %v2752_v62 = vadd.f32 %v2673_v31, %v5699_v46 }
 0x1f0   : > { %v4661_v14 = vrot.slane %v4645_v57, 9  ;;  %v2520_v26 = vrot.slane %v2518_v58, 4  ;;  %v3523_v28 = vunpack.c.l.b16 %v3349_v59  ;;  %v6291_v59 = vld [vmem:[%s6580_s2] ss:$0 sm:$0xff] }
 0x1f1   : > { %v2960_v50 = vpop.f32.mrf.mxu2  ;;  %v6254_v33 = vadd.f32 %v2347_v13, %v1728_v5  ;;  %v3359_v18 = vsel %vm5232_vm4, %v3354_v32, %v3358_v11  ;;  %v3859_v13 = vsel %vm5407_vm7, %v4884_v6, %v3858_v42  ;;  %v3862_v5 = vsel %vm5407_vm7, %v3860_v48, %v3861_v47  ;;  %v5121_v32 = vld [vmem:[%s5213_s27 + $0x8c] sm:$0x1]  ;;  %v6280_v47 = vld [vmem:[%s5213_s27 + $0x98] sm:$0x1] }
 0x1f2   : > { %v3040_v63 = vadd.f32 %v2960_v50, %v2751_v15  ;;  %v3366_v50 = vrot.slane %v3364_v23, 5  ;;  %v2521_v11 = vrot.slane %v5121_v32, 5  ;;  %v3376_v15 = vrot.slane %v3374_v51, 4 }
 0x1f3   : > { %4851 = vmatmul.msk.bf16.gmra.mxu3 %vm690_vm3, %v3545_v49  ;;  %6589 = vst [vmem:[#allocation5_spill] sm:$0xff] %v6254_v33  ;;  %v3524_v48 = vunpack.c.l.b16 %v3359_v18  ;;  %v3924_v31 = vunpack.c.l.b16 %v3859_v13 }
 0x1f4   : > { %v4014_v8 = vpop.f32.mrf.mxu0  ;;  %v3367_v51 = vor.u32 %v3366_v50, %v3363_v24  ;;  %v6297_v24 = vld [vmem:[%s5213_s27 + $0xa0] sm:$0xf] }
 0x1f5   : > { %v3546_v13 = vpack.c.b16 %v3524_v48, %v3523_v28 }
 0x1f6   : > { %v3617_v30 = vpop.f32.mrf.mxu3  ;;  %v6258_v49 = vpop.f32.mrf.mxu1 }
 0x1f7   : > { %4899 = vmatmul.msk.bf16.gmra.mxu0 %vm690_vm3, %v3946_v41  ;;  %v6275_v41 = vrot.slane %v3370_v21, 5  ;;  %v3697_v42 = vadd.f32 %v3617_v30, %v3040_v63  ;;  %v2519_v21 = vsel %vm5407_vm7, %v4661_v14, %v2518_v58  ;;  %v2522_v30 = vsel %vm5407_vm7, %v2520_v26, %v2521_v11  ;;  %v4828_v14 = vld [vmem:[%s5213_s27 + $0x9c] sm:$0xf] }
 0x1f8   : > { %v3385_v28 = vshrl.u32 %v4828_v14, 16  ;;  %v3388_v48 = vshll.u32 %v4828_v14, 16 }
 0x1f9   : > { %v2962_v45 = vpop.f32.mrf.mxu2  ;;  %4676 = vmatmul.msk.bf16.gmra.mxu1 %vm690_vm3, %v2600_v54  ;;  %v3925_v54 = vunpack.c.l.b16 %v3862_v5  ;;  %v3377_v63 = vor.u32 %v3376_v15, %v6275_v41  ;;  %v4094_v57 = vadd.f32 %v4014_v8, %v3697_v42  ;;  %v3380_v5 = vshll.u32 %v6280_v47, 16  ;;  %v4869_v42 = vld [vmem:[%s5213_s27 + $0x90] sm:$0xe] }
 0x1fa   : > { %v3041_v6 = vadd.f32 %v2962_v45, %v2752_v62  ;;  %v2579_v45 = vunpack.c.l.b16 %v2519_v21  ;;  %v3368_v8 = vrot.slane %v3367_v51, 4 }
 0x1fb   : > { %v3947_v50 = vpack.c.b16 %v3925_v54, %v3924_v31  ;;  %v3378_v26 = vrot.slane %v3377_v63, 4  ;;  %v4130_v32 = vadd.f32 %v6291_v59, %v4094_v57  ;;  %v3382_v15 = vrot.slane %v3380_v5, 5 }
 0x1fc   : > { %v4016_v46 = vpop.f32.mrf.mxu0  ;;  %v3398_v31 = vshrl.u32 %v6297_v24, 16  ;;  %v4885_v63 = vrot.slane %v4869_v42, 9  ;;  %v3868_v57 = vrot.slane %v6280_v47, 5  ;;  %v3390_v47 = vrot.slane %v3388_v48, 5  ;;  %v6330_v42 = vld [vmem:[%s5213_s27 + $0xa4] sm:$0x1] }
 0x1fe   : > { %v3619_v36 = vpop.f32.mrf.mxu3  ;;  %4788 = vmatmul.msk.bf16.gmra.mxu2 %vm690_vm3, %v4951_v7  ;;  %v2678_v23 = vpop.f32.mrf.mxu1  ;;  %v2580_v7 = vunpack.c.l.b16 %v2522_v30 }
 0x1ff   : > { %v3698_v18 = vadd.f32 %v3619_v36, %v3041_v6  ;;  %v3865_v6 = vrot.slane %v6251_v19, 5  ;;  %v2753_v36 = vadd.f32 %v6258_v49, %v5712_v29  ;;  %v3383_v29 = vsel %vm5232_vm4, %v3378_v26, %v3382_v15 }
 0x200   : > { %v2601_v30 = vpack.c.b16 %v2580_v7, %v2579_v45  ;;  %v4646_v45 = vld [vmem:[%s5213_s27 + $0x90] sm:$0xe]  ;;  %v3387_v7 = vrot.slane %v3385_v28, 4  ;;  %v3526_v28 = vunpack.c.l.b16 %v3383_v29 }
 0x201   : > { %v4095_v62 = vadd.f32 %v4016_v46, %v3698_v18  ;;  %v2965_v58 = vpop.f32.mrf.mxu2  ;;  %v3394_v46 = vshll.u32 %v6297_v24, 16  ;;  %v5122_v18 = vld [vmem:[%s5213_s27 + $0x94] sm:$0xf]  ;;  %v3867_v49 = vrot.slane %v3865_v6, 4  ;;  %v4662_v26 = vrot.slane %v4646_v45, 9 }
 0x202   : > { %v3042_v5 = vadd.f32 %v2965_v58, %v2753_v36  ;;  %v3866_v48 = vsel %vm5407_vm7, %v4885_v63, %v3865_v6 }
 0x203   : > { %v4131_v11 = vadd.f32 %v6291_v59, %v4095_v62  ;;  %4852 = vmatmul.msk.bf16.gmra.mxu3 %vm690_vm3, %v3546_v13  ;;  %v2525_v13 = vrot.slane %v5122_v18, 5  ;;  %v3373_v62 = vsel %vm5232_vm4, %v3368_v8, %v6275_v41  ;;  %v6325_v14 = vrot.slane %v3394_v46, 5  ;;  %v4952_v41 = vld [vmem:[%s5213_s27 + $0x90] sm:$0xff] }
 0x204   : > { %v4019_v21 = vpop.f32.mrf.mxu0  ;;  %v3525_v8 = vunpack.c.l.b16 %v3373_v62  ;;  %v3926_v45 = vunpack.c.l.b16 %v3866_v48 }
 0x205   : > { %v4961_v54 = vpack.c.bf16 %v4131_v11, %v4130_v32  ;;  %v3400_v32 = vrot.slane %v3398_v31, 4  ;;  %v2754_v11 = vadd.f32 %v2678_v23, %v5725_v35  ;;  %v2527_v15 = vrot.slane %v2525_v13, 4 }
 0x206   : > { %v3622_v19 = vpop.f32.mrf.mxu3  ;;  %v6313_v51 = vpop.f32.mrf.mxu1  ;;  %v3869_v35 = vsel %vm5407_vm7, %v3867_v49, %v3868_v57  ;;  %v3391_v23 = vor.u32 %v3390_v47, %v3387_v7  ;;  %v3404_v31 = vshll.u32 %v6330_v42, 16  ;;  %v3547_v29 = vpack.c.b16 %v3526_v28, %v3525_v8 }
 0x207   : > { %4962 = vst [vmem:[%s6307_s19] sm:$0xff] %v4961_v54   ;;  %4900 = vmatmul.msk.bf16.gmra.mxu0 %vm690_vm3, %v3947_v50  ;;  %v5123_v54 = vld [vmem:[%s5213_s27 + $0x98] sm:$0x1]  ;;  %v3699_v18 = vadd.f32 %v3622_v19, %v3042_v5  ;;  %v3401_v46 = vor.u32 %v3400_v32, %v6325_v14  ;;  %v2526_v5 = vsel %vm5407_vm7, %v4662_v26, %v2525_v13  ;;  %v3927_v49 = vunpack.c.l.b16 %v3869_v35 }
 0x208   : > { %v2528_v36 = vrot.slane %v5123_v54, 5  ;;  %v3392_v7 = vrot.slane %v3391_v23, 4  ;;  %v3406_v32 = vrot.slane %v3404_v31, 5  ;;  %v2581_v48 = vunpack.c.l.b16 %v2526_v5 }
 0x209   : > { %v2967_v58 = vpop.f32.mrf.mxu2  ;;  %4677 = vmatmul.msk.bf16.gmra.mxu1 %vm690_vm3, %v2601_v30  ;;  %v4096_v63 = vadd.f32 %v4019_v21, %v3699_v18  ;;  %v3402_v47 = vrot.slane %v3401_v46, 4  ;;  %v3948_v21 = vpack.c.b16 %v3927_v49, %v3926_v45  ;;  %v3875_v18 = vrot.slane %v6330_v42, 5  ;;  %v5124_v45 = vld [vmem:[%s5213_s27 + $0xa0] sm:$0xf] }
 0x20a   : > { %v3043_v50 = vadd.f32 %v2967_v58, %v2754_v11  ;;  %v2529_v6 = vsel %vm5407_vm7, %v2527_v15, %v2528_v36  ;;  %v4870_v11 = vld [vmem:[%s5213_s27 + $0x9c] sm:$0xe]  ;;  %v3872_v58 = vrot.slane %v6297_v24, 5  ;;  %v3397_v15 = vsel %vm5232_vm4, %v3392_v7, %v6325_v14 }
 0x20b   : > { %v2582_v33 = vunpack.c.l.b16 %v2529_v6  ;;  %v4132_v13 = vadd.f32 %v6291_v59, %v4096_v63  ;;  %v4886_v8 = vrot.slane %v4870_v11, 9  ;;  %v3407_v24 = vsel %vm5232_vm4, %v3402_v47, %v3406_v32  ;;  %v4647_v63 = vld [vmem:[%s5213_s27 + $0x9c] sm:$0xe] }
 0x20c   : > { %v4021_v30 = vpop.f32.mrf.mxu0  ;;  %v3874_v36 = vrot.slane %v3872_v58, 4  ;;  %v2755_v35 = vadd.f32 %v6313_v51, %v5738_v3  ;;  %v3409_v31 = vshrl.u32 %v4831_v25, 16  ;;  %v2532_v14 = vrot.slane %v5124_v45, 5  ;;  %v4953_v47 = vld [vmem:[%s5213_s27 + $0x9c] sm:$0xff] }
 0x20d   : > { %v2602_v46 = vpack.c.b16 %v2582_v33, %v2581_v48  ;;  %v3412_v5 = vshll.u32 %v4831_v25, 16  ;;  %v3527_v3 = vunpack.c.l.b16 %v3397_v15  ;;  %v3528_v51 = vunpack.c.l.b16 %v3407_v24 }
 0x20e   : > { %v3624_v62 = vpop.f32.mrf.mxu3  ;;  %4789 = vmatmul.msk.bf16.gmra.mxu2 %vm690_vm3, %v4952_v41  ;;  %v2683_v19 = vpop.f32.mrf.mxu1  ;;  %v3873_v25 = vsel %vm5407_vm7, %v4886_v8, %v3872_v58  ;;  %v3876_v49 = vsel %vm5407_vm7, %v3874_v36, %v3875_v18  ;;  %v3411_v7 = vrot.slane %v3409_v31, 4  ;;  %v4663_v32 = vrot.slane %v4647_v63, 9 }
 0x20f   : > { %v3700_v57 = vadd.f32 %v3624_v62, %v3043_v50  ;;  %v6358_v50 = vld [vmem:[%s5213_s27 + $0xac] sm:$0xf]  ;;  %v2756_v33 = vadd.f32 %v2683_v19, %v5751_v10  ;;  %v2534_v11 = vrot.slane %v2532_v14, 4  ;;  %v3414_v48 = vrot.slane %v3412_v5, 5 }
 0x210   : > { %v3418_v42 = vshll.u32 %v6358_v50, 16  ;;  %v3548_v24 = vpack.c.b16 %v3528_v51, %v3527_v3  ;;  %v3928_v58 = vunpack.c.l.b16 %v3873_v25  ;;  %v3929_v36 = vunpack.c.l.b16 %v3876_v49  ;;  %v4834_v3 = vld [vmem:[%s5213_s27 + $0xb4] sm:$0xf]  ;;  %v6390_v51 = vld [vmem:[%s5213_s27 + $0xb8] sm:$0xf] }
 0x211   : > { %v4097_v41 = vadd.f32 %v4021_v30, %v3700_v57  ;;  %v2970_v54 = vpop.f32.mrf.mxu2  ;;  %v3422_v57 = vshrl.u32 %v6358_v50, 16 }
 0x212   : > { %v3044_v6 = vadd.f32 %v2970_v54, %v2755_v35  ;;  %v6376_v10 = vrot.slane %v3418_v42, 5 }
 0x213   : > { %v4133_v26 = vadd.f32 %v6291_v59, %v4097_v41  ;;  %4853 = vmatmul.msk.bf16.gmra.mxu3 %vm690_vm3, %v3547_v29  ;;  %v5125_v41 = vld [vmem:[%s5213_s27 + $0xa4] sm:$0x1]  ;;  %v3424_v19 = vrot.slane %v3422_v57, 4 }
 0x214   : > { %v4024_v23 = vpop.f32.mrf.mxu0  ;;  %v2535_v54 = vrot.slane %v5125_v41, 5  ;;  %v3446_v41 = vshrl.u32 %v6390_v51, 16 }
 0x215   : > { %v4966_v28 = vpack.c.bf16 %v4133_v26, %v4132_v13  ;;  %v3425_v45 = vor.u32 %v3424_v19, %v6376_v10  ;;  %v3879_v19 = vrot.slane %v6358_v50, 5 }
 0x216   : > { %v3627_v30 = vpop.f32.mrf.mxu3  ;;  %v2686_v62 = vpop.f32.mrf.mxu1  ;;  %v2536_v35 = vsel %vm5407_vm7, %v2534_v11, %v2535_v54  ;;  %v3442_v11 = vshll.u32 %v6390_v51, 16 }
 0x217   : > { %5038 = vst [vmem:[%s6307_s19 + $0x8] sm:$0xff] %v4966_v28   ;;  %4901 = vmatmul.msk.bf16.gmra.mxu0 %vm690_vm3, %v3948_v21  ;;  %v3701_v13 = vadd.f32 %v3627_v30, %v3044_v6  ;;  %v6379_v21 = vld [vmem:[%s5213_s27 + $0xb0] sm:$0x1]  ;;  %v2533_v28 = vsel %vm5407_vm7, %v4663_v32, %v2532_v14  ;;  %v2584_v57 = vunpack.c.l.b16 %v2536_v35  ;;  %v3436_v32 = vshll.u32 %v4834_v3, 16 }
 0x218   : > { %v3428_v5 = vshll.u32 %v6379_v21, 16  ;;  %v2583_v42 = vunpack.c.l.b16 %v2533_v28 }
 0x219   : > { %v2972_v29 = vpop.f32.mrf.mxu2  ;;  %4678 = vmatmul.msk.bf16.gmra.mxu1 %vm690_vm3, %v2602_v46  ;;  %v3415_v46 = vor.u32 %v3414_v48, %v3411_v7  ;;  %v4098_v31 = vadd.f32 %v4024_v23, %v3701_v13  ;;  %v3426_v23 = vrot.slane %v3425_v45, 4  ;;  %v4871_v7 = vld [vmem:[%s5213_s27 + $0xa8] sm:$0xe]  ;;  %v2757_v48 = vadd.f32 %v2686_v62, %v5763_v44 }
 0x21a   : > { %v3045_v26 = vadd.f32 %v2972_v29, %v2756_v33  ;;  %v3949_v33 = vpack.c.b16 %v3929_v36, %v3928_v58  ;;  %v3430_v49 = vrot.slane %v3428_v5, 5  ;;  %v5126_v58 = vld [vmem:[%s5213_s27 + $0xac] sm:$0xf]  ;;  %v4887_v44 = vrot.slane %v4871_v7, 9  ;;  %v4648_v62 = vld [vmem:[%s5213_s27 + $0xa8] sm:$0xe] }
 0x21b   : > { %v3416_v14 = vrot.slane %v3415_v46, 4  ;;  %v4134_v29 = vadd.f32 %v6291_v59, %v4098_v31  ;;  %v3438_v46 = vrot.slane %v3436_v32, 5  ;;  %v6409_v31 = vrot.slane %v3442_v11, 5 }
 0x21c   : > { %v4026_v15 = vpop.f32.mrf.mxu0  ;;  %v3431_v35 = vsel %vm5232_vm4, %v3426_v23, %v3430_v49 }
 0x21d   : > { %v3421_v28 = vsel %vm5232_vm4, %v3416_v14, %v6376_v10  ;;  %v3882_v10 = vrot.slane %v6379_v21, 5  ;;  %v5127_v14 = vld [vmem:[%s5213_s27 + $0xb0] sm:$0x1]  ;;  %v3530_v49 = vunpack.c.l.b16 %v3431_v35 }
 0x21e   : > { %v3629_v8 = vpop.f32.mrf.mxu3  ;;  %4790 = vmatmul.msk.bf16.gmra.mxu2 %vm690_vm3, %v4953_v47  ;;  %v2688_v18 = vpop.f32.mrf.mxu1  ;;  %v3433_v47 = vshrl.u32 %v4834_v3, 16  ;;  %v3529_v23 = vunpack.c.l.b16 %v3421_v28 }
 0x21f   : > { %v3702_v30 = vadd.f32 %v3629_v8, %v3045_v26  ;;  %v2603_v26 = vpack.c.b16 %v2584_v57, %v2583_v42  ;;  %v2539_v8 = vrot.slane %v5126_v58, 5  ;;  %v2758_v45 = vadd.f32 %v2688_v18, %v5776_v55  ;;  %v4954_v42 = vld [vmem:[%s5213_s27 + $0xa8] sm:$0xff] }
 0x220   : > { %v3435_v50 = vrot.slane %v3433_v47, 4  ;;  %v4664_v57 = vrot.slane %v4648_v62, 9  ;;  %v3880_v55 = vsel %vm5407_vm7, %v4887_v44, %v3879_v19 }
 0x221   : > { %v4099_v6 = vadd.f32 %v4026_v15, %v3702_v30  ;;  %v2975_v63 = vpop.f32.mrf.mxu2  ;;  %v3448_v30 = vrot.slane %v3446_v41, 4  ;;  %v2541_v3 = vrot.slane %v2539_v8, 4  ;;  %v3930_v58 = vunpack.c.l.b16 %v3880_v55 }
 0x222   : > { %v3046_v36 = vadd.f32 %v2975_v63, %v2757_v48  ;;  %v6415_v63 = vld [vmem:[%s5213_s27 + $0xbc] sm:$0x1]  ;;  %v3439_v18 = vor.u32 %v3438_v46, %v3435_v50 }
 0x223   : > { %v4135_v25 = vadd.f32 %v6291_v59, %v4099_v6  ;;  %4854 = vmatmul.msk.bf16.gmra.mxu3 %vm690_vm3, %v3548_v24  ;;  %v3881_v6 = vrot.slane %v3879_v19, 4  ;;  %v3449_v7 = vor.u32 %v3448_v30, %v6409_v31  ;;  %v3452_v47 = vshll.u32 %v6415_v63, 16 }
 0x224   : > { %v4029_v13 = vpop.f32.mrf.mxu0  ;;  %v3440_v28 = vrot.slane %v3439_v18, 4  ;;  %v5128_v18 = vld [vmem:[%s5213_s27 + $0xb8] sm:$0xf] }
 0x225   : > { %v4971_v54 = vpack.c.bf16 %v4135_v25, %v4134_v29  ;;  %v3883_v32 = vsel %vm5407_vm7, %v3881_v6, %v3882_v10  ;;  %v3450_v35 = vrot.slane %v3449_v7, 4  ;;  %v3454_v44 = vrot.slane %v3452_v47, 5 }
 0x226   : > { %v3632_v15 = vpop.f32.mrf.mxu3  ;;  %v2691_v24 = vpop.f32.mrf.mxu1  ;;  %v3445_v6 = vsel %vm5232_vm4, %v3440_v28, %v6409_v31  ;;  %v2546_v7 = vrot.slane %v5128_v18, 5 }
 0x227   : > { %5039 = vst [vmem:[%s6307_s19 + $0x10] sm:$0xff] %v4971_v54   ;;  %4902 = vmatmul.msk.bf16.gmra.mxu0 %vm690_vm3, %v3949_v33  ;;  %v2542_v33 = vrot.slane %v5127_v14, 5  ;;  %v3703_v29 = vadd.f32 %v3632_v15, %v3046_v36  ;;  %v2540_v54 = vsel %vm5407_vm7, %v4664_v57, %v2539_v8  ;;  %v3549_v15 = vpack.c.b16 %v3530_v49, %v3529_v23  ;;  %v6441_v57 = vld [vmem:[%s5213_s27 + $0xc4] sm:$0xf] }
 0x228   : > { %v3931_v36 = vunpack.c.l.b16 %v3883_v32  ;;  %v2585_v46 = vunpack.c.l.b16 %v2540_v54  ;;  %v3455_v10 = vsel %vm5232_vm4, %v3450_v35, %v3454_v44  ;;  %v2759_v14 = vadd.f32 %v2691_v24, %v5790_v4  ;;  %v5129_v35 = vld [vmem:[%s5213_s27 + $0xbc] sm:$0x1] }
 0x229   : > { %v2977_v5 = vpop.f32.mrf.mxu2  ;;  %4679 = vmatmul.msk.bf16.gmra.mxu1 %vm690_vm3, %v2603_v26  ;;  %v2543_v48 = vsel %vm5407_vm7, %v2541_v3, %v2542_v33  ;;  %v4100_v26 = vadd.f32 %v4029_v13, %v3703_v29  ;;  %v3470_v32 = vshrl.u32 %v6441_v57, 16  ;;  %v3531_v4 = vunpack.c.l.b16 %v3445_v6 }
 0x22a   : > { %v3047_v25 = vadd.f32 %v2977_v5, %v2758_v45  ;;  %v2586_v30 = vunpack.c.l.b16 %v2543_v48  ;;  %v4837_v45 = vld [vmem:[%s5213_s27 + $0xc0] sm:$0xf]  ;;  %v3950_v13 = vpack.c.b16 %v3931_v36, %v3930_v58  ;;  %v3532_v24 = vunpack.c.l.b16 %v3455_v10  ;;  %v4955_v58 = vld [vmem:[%s5213_s27 + $0xb4] sm:$0xff] }
 0x22b   : > { %v4136_v8 = vadd.f32 %v6291_v59, %v4100_v26  ;;  %v3457_v23 = vshrl.u32 %v4837_v45, 16  ;;  %v3460_v31 = vshll.u32 %v4837_v45, 16  ;;  %v2548_v28 = vrot.slane %v2546_v7, 4 }
 0x22c   : > { %v4031_v21 = vpop.f32.mrf.mxu0  ;;  %v2604_v29 = vpack.c.b16 %v2586_v30, %v2585_v46  ;;  %v2549_v44 = vrot.slane %v5129_v35, 5  ;;  %v3472_v45 = vrot.slane %v3470_v32, 4 }
 0x22e   : > { %v3634_v11 = vpop.f32.mrf.mxu3  ;;  %4791 = vmatmul.msk.bf16.gmra.mxu2 %vm690_vm3, %v4954_v42  ;;  %v2693_v41 = vpop.f32.mrf.mxu1  ;;  %v3886_v42 = vrot.slane %v6390_v51, 5  ;;  %v3466_v51 = vshll.u32 %v6441_v57, 16 }
 0x22f   : > { %v3704_v19 = vadd.f32 %v3634_v11, %v3047_v25  ;;  %v4872_v25 = vld [vmem:[%s5213_s27 + $0xb4] sm:$0xe]  ;;  %v2760_v54 = vadd.f32 %v2693_v41, %v5803_v0 }
 0x230   : > { %v4888_v11 = vrot.slane %v4872_v25, 9  ;;  %v3888_v26 = vrot.slane %v3886_v42, 4  ;;  %v3468_v30 = vrot.slane %v3466_v51, 5 }
 0x231   : > { %v4101_v62 = vadd.f32 %v4031_v21, %v3704_v19  ;;  %v2980_v50 = vpop.f32.mrf.mxu2  ;;  %v4649_v21 = vld [vmem:[%s5213_s27 + $0xb4] sm:$0xe]  ;;  %v3889_v19 = vrot.slane %v6415_v63, 5 }
 0x232   : > { %v3048_v47 = vadd.f32 %v2980_v50, %v2759_v14  ;;  %v4665_v36 = vrot.slane %v4649_v21, 9  ;;  %v3887_v41 = vsel %vm5407_vm7, %v4888_v11, %v3886_v42 }
 0x233   : > { %v4137_v5 = vadd.f32 %v6291_v59, %v4101_v62  ;;  %4855 = vmatmul.msk.bf16.gmra.mxu3 %vm690_vm3, %v3549_v15  ;;  %v3459_v15 = vrot.slane %v3457_v23, 4  ;;  %v3462_v62 = vrot.slane %v3460_v31, 5  ;;  %v3890_v63 = vsel %vm5407_vm7, %v3888_v26, %v3889_v19 }
 0x234   : > { %v4034_v33 = vpop.f32.mrf.mxu0  ;;  %v2547_v10 = vsel %vm5407_vm7, %v4665_v36, %v2546_v7  ;;  %v3473_v23 = vor.u32 %v3472_v45, %v3468_v30  ;;  %v3933_v18 = vunpack.c.l.b16 %v3890_v63  ;;  %v4840_v36 = vld [vmem:[%s5213_s27 + $0xcc] sm:$0xf] }
 0x235   : > { %v4976_v3 = vpack.c.bf16 %v4137_v5, %v4136_v8  ;;  %v6457_v8 = vld [vmem:[%s5213_s27 + $0xc8] sm:$0x1]  ;;  %v3463_v14 = vor.u32 %v3462_v62, %v3459_v15  ;;  %v2587_v21 = vunpack.c.l.b16 %v2547_v10  ;;  %v5130_v62 = vld [vmem:[%s5213_s27 + $0xc4] sm:$0xf] }
 0x236   : > { %v3637_v49 = vpop.f32.mrf.mxu3  ;;  %v2696_v55 = vpop.f32.mrf.mxu1  ;;  %v3476_v42 = vshll.u32 %v6457_v8, 16 }
 0x237   : > { %5040 = vst [vmem:[%s6307_s19 + $0x18] sm:$0xff] %v4976_v3   ;;  %4903 = vmatmul.msk.bf16.gmra.mxu0 %vm690_vm3, %v3950_v13  ;;  %v3705_v50 = vadd.f32 %v3637_v49, %v3048_v47  ;;  %v3550_v13 = vpack.c.b16 %v3532_v24, %v3531_v4  ;;  %v2550_v3 = vsel %vm5407_vm7, %v2548_v28, %v2549_v44  ;;  %v3932_v49 = vunpack.c.l.b16 %v3887_v41  ;;  %v6477_v28 = vld [vmem:[%s5213_s27 + $0xd0] sm:$0xf] }
 0x238   : > { %v2588_v51 = vunpack.c.l.b16 %v2550_v3  ;;  %v3464_v32 = vrot.slane %v3463_v14, 4  ;;  %v3478_v24 = vrot.slane %v3476_v42, 5  ;;  %v2761_v26 = vadd.f32 %v2696_v55, %v5819_v53 }
 0x239   : > { %v2982_v48 = vpop.f32.mrf.mxu2  ;;  %4680 = vmatmul.msk.bf16.gmra.mxu1 %vm690_vm3, %v2604_v29  ;;  %v4102_v29 = vadd.f32 %v4034_v33, %v3705_v50  ;;  %v3474_v33 = vrot.slane %v3473_v23, 4  ;;  %v3951_v11 = vpack.c.b16 %v3933_v18, %v3932_v49  ;;  %v2553_v50 = vrot.slane %v5130_v62, 5  ;;  %v5131_v49 = vld [vmem:[%s5213_s27 + $0xc8] sm:$0x1] }
 0x23a   : > { %v3049_v46 = vadd.f32 %v2982_v48, %v2760_v54  ;;  %v4873_v54 = vld [vmem:[%s5213_s27 + $0xc0] sm:$0xe]  ;;  %v2605_v15 = vpack.c.b16 %v2588_v51, %v2587_v21  ;;  %v3469_v45 = vsel %vm5232_vm4, %v3464_v32, %v3468_v30  ;;  %v3484_v41 = vshll.u32 %v4840_v36, 16 }
 0x23b   : > { %v4138_v7 = vadd.f32 %v6291_v59, %v4102_v29  ;;  %v3479_v53 = vsel %vm5232_vm4, %v3474_v33, %v3478_v24  ;;  %v4889_v55 = vrot.slane %v4873_v54, 9  ;;  %v3490_v63 = vshll.u32 %v6477_v28, 16  ;;  %v4956_v29 = vld [vmem:[%s5213_s27 + $0xc0] sm:$0xff]  ;;  %v4842_v24 = vld [vmem:[%s5213_s27 + $0xd4] sm:$0x1] }
 0x23c   : > { %v4036_v0 = vpop.f32.mrf.mxu0  ;;  %v3896_v14 = vrot.slane %v6457_v8, 5  ;;  %v2555_v42 = vrot.slane %v2553_v50, 4  ;;  %v2556_v18 = vrot.slane %v5131_v49, 5  ;;  %v3534_v21 = vunpack.c.l.b16 %v3479_v53  ;;  %v4874_v49 = vld [vmem:[%s5213_s27 + $0xcc] sm:$0xe] }
 0x23d   : > { %v3486_v32 = vrot.slane %v3484_v41, 5  ;;  %v3500_v53 = vshll.u32 %v4842_v24, 16 }
 0x23e   : > { %v3639_v5 = vpop.f32.mrf.mxu3  ;;  %4792 = vmatmul.msk.bf16.gmra.mxu2 %vm690_vm3, %v4955_v58  ;;  %v2698_v6 = vpop.f32.mrf.mxu1  ;;  %v3893_v58 = vrot.slane %v6441_v57, 5  ;;  %v3481_v57 = vshrl.u32 %v4840_v36, 16 }
 0x23f   : > { %v3706_v25 = vadd.f32 %v3639_v5, %v3049_v46  ;;  %v3494_v5 = vshrl.u32 %v6477_v28, 16 }
 0x240   : > { %v3895_v30 = vrot.slane %v3893_v58, 4  ;;  %v3894_v51 = vsel %vm5407_vm7, %v4889_v55, %v3893_v58 }
 0x241   : > { %v4103_v31 = vadd.f32 %v4036_v0, %v3706_v25  ;;  %v2985_v47 = vpop.f32.mrf.mxu2  ;;  %v4650_v0 = vld [vmem:[%s5213_s27 + $0xc0] sm:$0xe]  ;;  %v3533_v25 = vunpack.c.l.b16 %v3469_v45 }
 0x242   : > { %v3050_v46 = vadd.f32 %v2985_v47, %v2761_v26  ;;  %v4666_v23 = vrot.slane %v4650_v0, 9  ;;  %v3897_v8 = vsel %vm5407_vm7, %v3895_v30, %v3896_v14  ;;  %v2557_v26 = vsel %vm5407_vm7, %v2555_v42, %v2556_v18 }
 0x243   : > { %v4139_v4 = vadd.f32 %v6291_v59, %v4103_v31  ;;  %4856 = vmatmul.msk.bf16.gmra.mxu3 %vm690_vm3, %v3550_v13  ;;  %v6590_v13 = vld [vmem:[#allocation2_spill] sm:$0xff]  ;;  %v3551_v36 = vpack.c.b16 %v3534_v21, %v3533_v25  ;;  %v3935_v62 = vunpack.c.l.b16 %v3897_v8  ;;  %v2590_v41 = vunpack.c.l.b16 %v2557_v26 }
 0x244   : > { %v4039_v19 = vpop.f32.mrf.mxu0  ;;  %v2762_v10 = vadd.f32 %v2698_v6, %v6590_v13  ;;  %v3483_v6 = vrot.slane %v3481_v57, 4  ;;  %v3900_v25 = vrot.slane %v6477_v28, 5  ;;  %v4890_v21 = vrot.slane %v4874_v49, 9 }
 0x245   : > { %v4981_v48 = vpack.c.bf16 %v4139_v4, %v4138_v7  ;;  %v3492_v7 = vrot.slane %v3490_v63, 5  ;;  %v3496_v4 = vrot.slane %v3494_v5, 4 }
 0x246   : > { %v3642_v35 = vpop.f32.mrf.mxu3  ;;  %v2701_v44 = vpop.f32.mrf.mxu1  ;;  %v3902_v28 = vrot.slane %v3900_v25, 4 }
 0x247   : > { %5041 = vst [vmem:[%s6307_s19 + $0x20] sm:$0xff] %v4981_v48   ;;  %4904 = vmatmul.msk.bf16.gmra.mxu0 %vm690_vm3, %v3951_v11  ;;  %v3707_v31 = vadd.f32 %v3642_v35, %v3050_v46  ;;  %v2554_v48 = vsel %vm5407_vm7, %v4666_v23, %v2553_v50  ;;  %v3934_v35 = vunpack.c.l.b16 %v3894_v51  ;;  %v3487_v46 = vor.u32 %v3486_v32, %v3483_v6  ;;  %v4957_v6 = vld [vmem:[%s5213_s27 + $0xcc] sm:$0xff] }
 0x248   : > { %v3497_v45 = vor.u32 %v3496_v4, %v3492_v7  ;;  %v2589_v57 = vunpack.c.l.b16 %v2554_v48  ;;  %v2763_v30 = vadd.f32 %v2701_v44, %v5855_v1  ;;  %v3903_v51 = vrot.slane %v4842_v24, 5 }
 0x249   : > { %v2987_v3 = vpop.f32.mrf.mxu2  ;;  %4681 = vmatmul.msk.bf16.gmra.mxu1 %vm690_vm3, %v2605_v15  ;;  %v4104_v15 = vadd.f32 %v4039_v19, %v3707_v31  ;;  %v3952_v19 = vpack.c.b16 %v3935_v62, %v3934_v35  ;;  %v3488_v5 = vrot.slane %v3487_v46, 4 }
 0x24a   : > { %v3051_v47 = vadd.f32 %v2987_v3, %v2762_v10  ;;  %v3498_v13 = vrot.slane %v3497_v45, 4  ;;  %v3502_v10 = vrot.slane %v3500_v53, 5  ;;  %v3904_v38 = vsel %vm5407_vm7, %v3902_v28, %v3903_v51 }
 0x24b   : > { %v4140_v63 = vadd.f32 %v6291_v59, %v4104_v15  ;;  %v3493_v31 = vsel %vm5232_vm4, %v3488_v5, %v3492_v7  ;;  %v3901_v7 = vsel %vm5407_vm7, %v4890_v21, %v3900_v25 }
 0x24c   : > { %v4041_v33 = vpop.f32.mrf.mxu0  ;;  %v3936_v15 = vunpack.c.l.b16 %v3901_v7 }
 0x24e   : > { %v3644_v11 = vpop.f32.mrf.mxu3  ;;  %4793 = vmatmul.msk.bf16.gmra.mxu2 %vm690_vm3, %v4956_v29  ;;  %v2703_v54 = vpop.f32.mrf.mxu1  ;;  %v2606_v29 = vpack.c.b16 %v2590_v41, %v2589_v57 }
 0x24f   : > { %v3708_v58 = vadd.f32 %v3644_v11, %v3051_v47  ;;  %v3503_v47 = vsel %vm5232_vm4, %v3498_v13, %v3502_v10  ;;  %v2764_v1 = vadd.f32 %v2703_v54, %v5875_v27 }
 0x250   : > { %v3536_v8 = vunpack.c.l.b16 %v3503_v47 }
 0x251   : > { %v4105_v55 = vadd.f32 %v4041_v33, %v3708_v58  ;;  %v2990_v0 = vpop.f32.mrf.mxu2  ;;  %v3535_v33 = vunpack.c.l.b16 %v3493_v31  ;;  %v3937_v58 = vunpack.c.l.b16 %v3904_v38 }
 0x252   : > { %v3052_v18 = vadd.f32 %v2990_v0, %v2763_v30 }
 0x253   : > { %v4141_v50 = vadd.f32 %v6291_v59, %v4105_v55  ;;  %4857 = vmatmul.msk.bf16.gmra.mxu3 %vm690_vm3, %v3551_v36  ;;  %v3552_v24 = vpack.c.b16 %v3536_v8, %v3535_v33  ;;  %v3953_v22 = vpack.c.b16 %v3937_v58, %v3936_v15 }
 0x254   : > { %v4044_v14 = vpop.f32.mrf.mxu0 }
 0x255   : > { %v4986_v3 = vpack.c.bf16 %v4141_v50, %v4140_v63  ;;  %v6591_v63 = vld [vmem:[#allocation3_spill] sm:$0xff] }
 0x256   : > { %v3647_v23 = vpop.f32.mrf.mxu3  ;;  %v2706_v42 = vpop.f32.mrf.mxu1 }
 0x257   : > { %5042 = vst [vmem:[%s6307_s19 + $0x28] sm:$0xff] %v4986_v3   ;;  %4905 = vmatmul.msk.bf16.gmra.mxu0 %vm690_vm3, %v3952_v19  ;;  %v3709_v32 = vadd.f32 %v3647_v23, %v3052_v18  ;;  %v2765_v53 = vadd.f32 %v2706_v42, %v5894_v43 }
 0x259   : > { %v2992_v44 = vpop.f32.mrf.mxu2  ;;  %4682 = vmatmul.msk.bf16.gmra.mxu1 %vm690_vm3, %v2606_v29  ;;  %v4106_v54 = vadd.f32 %v4044_v14, %v3709_v32 }
 0x25a   : > { %v3053_v4 = vadd.f32 %v2992_v44, %v2764_v1 }
 0x25b   : > { %v4142_v62 = vadd.f32 %v6291_v59, %v4106_v54 }
 0x25c   : > { %v4046_v11 = vpop.f32.mrf.mxu0 }
 0x25e   : > { %v3649_v48 = vpop.f32.mrf.mxu3  ;;  %4794 = vmatmul.msk.bf16.gmra.mxu2 %vm690_vm3, %v4957_v6  ;;  %v2708_v27 = vpop.f32.mrf.mxu1 }
 0x25f   : > { %v3710_v26 = vadd.f32 %v3649_v48, %v3053_v4  ;;  %v2766_v50 = vadd.f32 %v2708_v27, %v6591_v63 }
 0x261   : > { %v4107_v36 = vadd.f32 %v4046_v11, %v3710_v26  ;;  %v2995_v35 = vpop.f32.mrf.mxu2 }
 0x262   : > { %v3054_v41 = vadd.f32 %v2995_v35, %v2765_v53 }
 0x263   : > { %v4143_v46 = vadd.f32 %v6291_v59, %v4107_v36  ;;  %4858 = vmatmul.msk.bf16.gmra.mxu3 %vm690_vm3, %v3552_v24 }
 0x264   : > { %v4049_v55 = vpop.f32.mrf.mxu0 }
 0x265   : > { %v4991_v45 = vpack.c.bf16 %v4143_v46, %v4142_v62 }
 0x266   : > { %v3652_v0 = vpop.f32.mrf.mxu3  ;;  %v2711_v57 = vpop.f32.mrf.mxu1 }
 0x267   : > { %5043 = vst [vmem:[%s6307_s19 + $0x30] sm:$0xff] %v4991_v45   ;;  %4906 = vmatmul.msk.bf16.gmra.mxu0 %vm690_vm3, %v3953_v22  ;;  %v3711_v5 = vadd.f32 %v3652_v0, %v3054_v41  ;;  %v2767_v18 = vadd.f32 %v2711_v57, %v5937_v16 }
 0x269   : > { %v2997_v19 = vpop.f32.mrf.mxu2  ;;  %v4108_v14 = vadd.f32 %v4049_v55, %v3711_v5 }
 0x26a   : > { %v3055_v13 = vadd.f32 %v2997_v19, %v2766_v50 }
 0x26b   : > { %v4144_v23 = vadd.f32 %v6291_v59, %v4108_v14 }
 0x26c   : > { %v4051_v10 = vpop.f32.mrf.mxu0 }
 0x26e   : > { %v3654_v3 = vpop.f32.mrf.mxu3  ;;  %v2713_v30 = vpop.f32.mrf.mxu1 }
 0x26f   : > { %v3712_v29 = vadd.f32 %v3654_v3, %v3055_v13  ;;  %v2768_v21 = vadd.f32 %v2713_v30, %v5961_v39 }
 0x271   : > { %v4109_v25 = vadd.f32 %v4051_v10, %v3712_v29  ;;  %v3000_v43 = vpop.f32.mrf.mxu2 }
 0x272   : > { %v3056_v44 = vadd.f32 %v3000_v43, %v2767_v18 }
 0x273   : > { %v4145_v42 = vadd.f32 %v6291_v59, %v4109_v25 }
 0x274   : > { %v4054_v31 = vpop.f32.mrf.mxu0 }
 0x275   : > { %v4996_v49 = vpack.c.bf16 %v4145_v42, %v4144_v23 }
 0x276   : > { %v3657_v47 = vpop.f32.mrf.mxu3  ;;  %v2716_v1 = vpop.f32.mrf.mxu1 }
 0x277   : > { %5044 = vst [vmem:[%s6307_s19 + $0x38] sm:$0xff] %v4996_v49   ;;  %v3713_v51 = vadd.f32 %v3657_v47, %v3056_v44  ;;  %v2769_v54 = vadd.f32 %v2716_v1, %v5980_v34 }
 0x279   : > { %v3002_v28 = vpop.f32.mrf.mxu2  ;;  %v4110_v8 = vadd.f32 %v4054_v31, %v3713_v51 }
 0x27a   : > { %v3057_v6 = vadd.f32 %v3002_v28, %v2768_v21 }
 0x27b   : > { %v4146_v16 = vadd.f32 %v6291_v59, %v4110_v8 }
 0x27c   : > { %v4056_v32 = vpop.f32.mrf.mxu0 }
 0x27e   : > { %v3659_v4 = vpop.f32.mrf.mxu3  ;;  %v2718_v33 = vpop.f32.mrf.mxu1 }
 0x27f   : > { %v3714_v11 = vadd.f32 %v3659_v4, %v3057_v6  ;;  %v2770_v58 = vadd.f32 %v2718_v33, %v6004_v52 }
 0x281   : > { %v4111_v7 = vadd.f32 %v4056_v32, %v3714_v11  ;;  %v3005_v38 = vpop.f32.mrf.mxu2 }
 0x282   : > { %v3058_v15 = vadd.f32 %v3005_v38, %v2769_v54 }
 0x283   : > { %v4147_v48 = vadd.f32 %v6291_v59, %v4111_v7 }
 0x284   : > { %v4059_v26 = vpop.f32.mrf.mxu0 }
 0x285   : > { %v5001_v27 = vpack.c.bf16 %v4147_v48, %v4146_v16 }
 0x286   : > { %v3662_v39 = vpop.f32.mrf.mxu3  ;;  %v2721_v24 = vpop.f32.mrf.mxu1 }
 0x287   : > { %5045 = vst [vmem:[%s6307_s19 + $0x40] sm:$0xff] %v5001_v27   ;;  %v3715_v35 = vadd.f32 %v3662_v39, %v3058_v15  ;;  %v2771_v50 = vadd.f32 %v2721_v24, %v6023_v2 }
 0x289   : > { %v3007_v36 = vpop.f32.mrf.mxu2  ;;  %v4112_v53 = vadd.f32 %v4059_v26, %v3715_v35 }
 0x28a   : > { %v3059_v62 = vadd.f32 %v3007_v36, %v2770_v58 }
 0x28b   : > { %v4148_v34 = vadd.f32 %v6291_v59, %v4112_v53 }
 0x28c   : > { %v4061_v46 = vpop.f32.mrf.mxu0 }
 0x28e   : > { %v3664_v22 = vpop.f32.mrf.mxu3  ;;  %v2723_v45 = vpop.f32.mrf.mxu1 }
 0x28f   : > { %v3716_v55 = vadd.f32 %v3664_v22, %v3059_v62  ;;  %v2772_v10 = vadd.f32 %v2723_v45, %v6047_v56 }
 0x291   : > { %v4113_v0 = vadd.f32 %v4061_v46, %v3716_v55  ;;  %v3010_v57 = vpop.f32.mrf.mxu2 }
 0x292   : > { %v3060_v13 = vadd.f32 %v3010_v57, %v2771_v50 }
 0x293   : > { %v4149_v41 = vadd.f32 %v6291_v59, %v4113_v0 }
 0x294   : > { %v4064_v19 = vpop.f32.mrf.mxu0 }
 0x295   : > { %v5006_v63 = vpack.c.bf16 %v4149_v41, %v4148_v34 }
 0x296   : > { %v3667_v52 = vpop.f32.mrf.mxu3  ;;  %v2726_v5 = vpop.f32.mrf.mxu1 }
 0x297   : > { %5046 = vst [vmem:[%s6307_s19 + $0x48] sm:$0xff] %v5006_v63   ;;  %v3717_v30 = vadd.f32 %v3667_v52, %v3060_v13  ;;  %v2773_v1 = vadd.f32 %v2726_v5, %v6066_v20 }
 0x299   : > { %v3012_v3 = vpop.f32.mrf.mxu2  ;;  %v4114_v23 = vadd.f32 %v4064_v19, %v3717_v30 }
 0x29a   : > { %v3061_v14 = vadd.f32 %v3012_v3, %v2772_v10 }
 0x29b   : > { %v4150_v2 = vadd.f32 %v6291_v59, %v4114_v23 }
 0x29c   : > { %v4066_v29 = vpop.f32.mrf.mxu0 }
 0x29e   : > { %v3669_v25 = vpop.f32.mrf.mxu3  ;;  %v2728_v43 = vpop.f32.mrf.mxu1 }
 0x29f   : > { %v3718_v42 = vadd.f32 %v3669_v25, %v3061_v14  ;;  %v2774_v51 = vadd.f32 %v2728_v43, %v6090_v37 }
 0x2a1   : > { %v4115_v49 = vadd.f32 %v4066_v29, %v3718_v42  ;;  %v3015_v18 = vpop.f32.mrf.mxu2 }
 0x2a2   : > { %v3062_v28 = vadd.f32 %v3015_v18, %v2773_v1 }
 0x2a3   : > { %v4151_v31 = vadd.f32 %v6291_v59, %v4115_v49 }
 0x2a4   : > { %v4069_v44 = vpop.f32.mrf.mxu0 }
 0x2a5   : > { %v5011_v47 = vpack.c.bf16 %v4151_v31, %v4150_v2 }
 0x2a6   : > { %v3672_v56 = vpop.f32.mrf.mxu3  ;;  %v2731_v21 = vpop.f32.mrf.mxu1 }
 0x2a7   : > { %5047 = vst [vmem:[%s6307_s19 + $0x50] sm:$0xff] %v5011_v47   ;;  %v3719_v32 = vadd.f32 %v3672_v56, %v3062_v28  ;;  %v2775_v26 = vadd.f32 %v2731_v21, %v6109_v12  ;;  %v5132_v12 = vld [vmem:[%s6580_s2] ss:$0 sm:$0xff] }
 0x2a9   : > { %v3017_v6 = vpop.f32.mrf.mxu2  ;;  %v4116_v7 = vadd.f32 %v4069_v44, %v3719_v32 }
 0x2aa   : > { %v3063_v4 = vadd.f32 %v3017_v6, %v2774_v51 }
 0x2ab   : > { %v4152_v20 = vadd.f32 %v6291_v59, %v4116_v7 }
 0x2ac   : > { %v4071_v33 = vpop.f32.mrf.mxu0 }
 0x2ae   : > { %v3674_v8 = vpop.f32.mrf.mxu3  ;;  %v2733_v11 = vpop.f32.mrf.mxu1 }
 0x2af   : > { %v3720_v38 = vadd.f32 %v3674_v8, %v3063_v4  ;;  %v2776_v58 = vadd.f32 %v2733_v11, %v6133_v60 }
 0x2b1   : > { %v4117_v16 = vadd.f32 %v4071_v33, %v3720_v38  ;;  %v3020_v48 = vpop.f32.mrf.mxu2  ;;  %v6592_v38 = vld [vmem:[#allocation4_spill] sm:$0xff] }
 0x2b2   : > { %v3064_v15 = vadd.f32 %v3020_v48, %v2775_v26 }
 0x2b3   : > { %v4153_v27 = vadd.f32 %v6291_v59, %v4117_v16 }
 0x2b4   : > { %v4074_v39 = vpop.f32.mrf.mxu0 }
 0x2b5   : > { %v5016_v54 = vpack.c.bf16 %v4153_v27, %v4152_v20 }
 0x2b6   : > { %v3677_v37 = vpop.f32.mrf.mxu3  ;;  %v2736_v24 = vpop.f32.mrf.mxu1 }
 0x2b7   : > { %5048 = vst [vmem:[%s6307_s19 + $0x58] sm:$0xff] %v5016_v54   ;;  %v3721_v35 = vadd.f32 %v3677_v37, %v3064_v15  ;;  %v2777_v60 = vadd.f32 %v2736_v24, %v6152_v61  ;;  %v6593_v54 = vld [vmem:[#allocation5_spill] sm:$0xff] }
 0x2b9   : > { %v3022_v36 = vpop.f32.mrf.mxu2  ;;  %v4118_v53 = vadd.f32 %v4074_v39, %v3721_v35 }
 0x2ba   : > { %v3065_v62 = vadd.f32 %v3022_v36, %v2776_v58 }
 0x2bb   : > { %v4154_v57 = vadd.f32 %v5132_v12, %v4118_v53 }
 0x2bc   : > { %v4076_v46 = vpop.f32.mrf.mxu0 }
 0x2be   : > { %v3679_v22 = vpop.f32.mrf.mxu3  ;;  %v2738_v45 = vpop.f32.mrf.mxu1 }
 0x2bf   : > { %v3722_v55 = vadd.f32 %v3679_v22, %v3065_v62  ;;  %v2778_v5 = vadd.f32 %v2738_v45, %v6176_v17 }
 0x2c1   : > { %v4119_v59 = vadd.f32 %v4076_v46, %v3722_v55  ;;  %v3025_v0 = vpop.f32.mrf.mxu2 }
 0x2c2   : > { %v3066_v19 = vadd.f32 %v3025_v0, %v2777_v60 }
 0x2c3   : > { %v4155_v34 = vadd.f32 %v5132_v12, %v4119_v59 }
 0x2c4   : > { %v4079_v63 = vpop.f32.mrf.mxu0 }
 0x2c5   : > { %v5021_v41 = vpack.c.bf16 %v4155_v34, %v4154_v57 }
 0x2c6   : > { %v3682_v50 = vpop.f32.mrf.mxu3  ;;  %v2741_v52 = vpop.f32.mrf.mxu1 }
 0x2c7   : > { %5049 = vst [vmem:[%s6307_s19 + $0x60] sm:$0xff] %v5021_v41   ;;  %v3723_v10 = vadd.f32 %v3682_v50, %v3066_v19  ;;  %v2779_v2 = vadd.f32 %v2741_v52, %v6193_v40 }
 0x2c9   : > { %v3027_v13 = vpop.f32.mrf.mxu2  ;;  %v4120_v29 = vadd.f32 %v4079_v63, %v3723_v10 }
 0x2ca   : > { %v3067_v3 = vadd.f32 %v3027_v13, %v2778_v5 }
 0x2cb   : > { %v4156_v49 = vadd.f32 %v5132_v12, %v4120_v29 }
 0x2cc   : > { %v4081_v30 = vpop.f32.mrf.mxu0 }
 0x2ce   : > { %v3684_v14 = vpop.f32.mrf.mxu3  ;;  %v2743_v42 = vpop.f32.mrf.mxu1 }
 0x2cf   : > { %v3724_v25 = vadd.f32 %v3684_v14, %v3067_v3  ;;  %v2780_v1 = vadd.f32 %v2743_v42, %v6216_v9 }
 0x2d1   : > { %v4121_v43 = vadd.f32 %v4081_v30, %v3724_v25  ;;  %v3030_v23 = vpop.f32.mrf.mxu2 }
 0x2d2   : > { %v3068_v17 = vadd.f32 %v3030_v23, %v2779_v2 }
 0x2d3   : > { %v4157_v61 = vadd.f32 %v5132_v12, %v4121_v43 }
 0x2d4   : > { %v4084_v31 = vpop.f32.mrf.mxu0 }
 0x2d5   : > { %v5026_v18 = vpack.c.bf16 %v4157_v61, %v4156_v49 }
 0x2d6   : > { %v3687_v47 = vpop.f32.mrf.mxu3  ;;  %v2746_v28 = vpop.f32.mrf.mxu1 }
 0x2d7   : > { %5050 = vst [vmem:[%s6307_s19 + $0x68] sm:$0xff] %v5026_v18   ;;  %v3725_v56 = vadd.f32 %v3687_v47, %v3068_v17  ;;  %v2781_v16 = vadd.f32 %v2746_v28, %v6592_v38 }
 0x2d9   : > { %v3032_v44 = vpop.f32.mrf.mxu2  ;;  %v4122_v32 = vadd.f32 %v4084_v31, %v3725_v56 }
 0x2da   : > { %v3069_v21 = vadd.f32 %v3032_v44, %v2780_v1 }
 0x2db   : > { %v4158_v11 = vadd.f32 %v5132_v12, %v4122_v32 }
 0x2dc   : > { %v4086_v51 = vpop.f32.mrf.mxu0 }
 0x2de   : > { %v3689_v6 = vpop.f32.mrf.mxu3  ;;  %v2748_v48 = vpop.f32.mrf.mxu1 }
 0x2df   : > { %v3726_v4 = vadd.f32 %v3689_v6, %v3069_v21  ;;  %v2782_v26 = vadd.f32 %v2748_v48, %v6593_v54 }
 0x2e1   : > { %v4123_v33 = vadd.f32 %v4086_v51, %v3726_v4  ;;  %v3035_v8 = vpop.f32.mrf.mxu2 }
 0x2e2   : > { %v3070_v27 = vadd.f32 %v3035_v8, %v2781_v16 }
 0x2e3   : > { %v4159_v7 = vadd.f32 %v5132_v12, %v4123_v33 }
 0x2e4   : > { %v4089_v20 = vpop.f32.mrf.mxu0 }
 0x2e5   : > { %v5031_v40 = vpack.c.bf16 %v4159_v7, %v4158_v11 }
 0x2e6   : > { %v3692_v9 = vpop.f32.mrf.mxu3 }
 0x2e7   : > { %5051 = vst [vmem:[%s6307_s19 + $0x70] sm:$0xff] %v5031_v40   ;;  %v3727_v37 = vadd.f32 %v3692_v9, %v3070_v27 }
 0x2e9   : > { %v3037_v39 = vpop.f32.mrf.mxu2  ;;  %v4124_v58 = vadd.f32 %v4089_v20, %v3727_v37 }
 0x2ea   : > { %v3071_v24 = vadd.f32 %v3037_v39, %v2782_v26 }
 0x2eb   : > { %v4160_v46 = vadd.f32 %v5132_v12, %v4124_v58 }
 0x2ec   : > { %v4091_v35 = vpop.f32.mrf.mxu0 }
 0x2ee   : > { %v3694_v15 = vpop.f32.mrf.mxu3 }
 0x2ef   : > { %v3728_v36 = vadd.f32 %v3694_v15, %v3071_v24 }
 0x2f1   : > { %v4125_v62 = vadd.f32 %v4091_v35, %v3728_v36 }
 0x2f3   : > { %v4161_v22 = vadd.f32 %v5132_v12, %v4125_v62 }
 0x2f5   : > { %v5036_v45 = vpack.c.bf16 %v4161_v22, %v4160_v46 }
 0x2f7   : > { %5052 = vst [vmem:[%s6307_s19 + $0x78] sm:$0xff] %v5036_v45  }
 0x2f8 PF: > { %s13_s14 = sadd.s32 1, %s5155_s14   ;;  %s6594_s12 = smov %s5151_s13 }
 0x2f9   : > { %p10_p5 = scmp.ge.s32.totalorder %s13_s14, 4   ;;  %s6595_s13 = smov %s6597_s15 }
 0x2fb   :  { %12 = sbr.rel (!%p10_p5) target bundleno = 2 (0x2), region = 65 }

</bundles_post_ra>
